<compile_context>
chip_gen: v7x
topology: tpu7x:2x2x1
jax: 0.10.0
libtpu: 0.0.40
codegen_flags: <defaults>
</compile_context>

<pallas_src>
import math

import jax
import jax.numpy as jnp
from jax.experimental import pallas as pl
from jax.experimental.pallas import tpu as pltpu


# ---------------------------------------------------------------------------
# fused encoder + decoder kernel (one grid program per batch slab)
# ---------------------------------------------------------------------------
def _rnnlm_vae_kernel(emb_inp_ref, msk_ref, emb_tgt_ref,
                      enc_wih_ref, enc_whh_ref, enc_b_ref,
                      dec_wih_ref, dec_whh_ref, dec_b_ref,
                      wout_ref, bout_ref,
                      logp_ref, tok_ref,
                      xg_enc_ref, xg_dec_ref, hdec_ref):
    T_enc, Bp, D = emb_inp_ref.shape
    T_dec = emb_tgt_ref.shape[0]
    H = enc_whh_ref.shape[0]
    V = wout_ref.shape[1]
    G = 4 * H

    # Weights resident for the whole kernel (hoisted out of the time loops).
    enc_whh = enc_whh_ref[...]                                  # (H, 4H) bf16
    dec_whh = dec_whh_ref[...]                                  # (H, 4H) bf16
    # Hoisted bias broadcasts (JAX does not CSE broadcast_in_dim).
    enc_b = jnp.broadcast_to(enc_b_ref[...], (Bp, G))           # (Bp, 4H) f32
    dec_b = jnp.broadcast_to(dec_b_ref[...], (Bp, G))           # (Bp, 4H) f32

    # ---- batched non-recurrent input projections (one MXU push each) ------
    x_enc = emb_inp_ref[...].reshape(T_enc * Bp, D)             # bf16
    xg_enc_ref[...] = jnp.dot(
        x_enc, enc_wih_ref[...],
        preferred_element_type=jnp.float32).reshape(T_enc, Bp, G)
    x_dec = emb_tgt_ref[...].reshape(T_dec * Bp, D)             # bf16
    xg_dec_ref[...] = jnp.dot(
        x_dec, dec_wih_ref[...],
        preferred_element_type=jnp.float32).reshape(T_dec, Bp, G)

    def lstm_step(xg, h, c, w_hh, b):
        # Only the recurrent matmul remains on the serial critical path.
        gates = xg + jnp.dot(h.astype(jnp.bfloat16), w_hh,
                             preferred_element_type=jnp.float32) + b
        # Gate layout (i, f, o | g): one sigmoid slab, one tanh slab (2 EUP
        # pushes per step instead of 4).
        sig = jax.nn.sigmoid(gates[:, :3 * H])
        i = sig[:, 0 * H:1 * H]
        f = sig[:, 1 * H:2 * H]
        o = sig[:, 2 * H:3 * H]
        g = jnp.tanh(gates[:, 3 * H:4 * H])
        c_new = f * c + i * g
        h_new = o * jnp.tanh(c_new)
        return h_new, c_new

    # Full unroll only while the recurrence is short; bounded unroll beyond
    # that to keep vreg live ranges / code size sane.
    enc_unroll = True if T_enc <= 16 else 8
    dec_unroll = True if T_dec <= 16 else 8

    # ---- encoder: masked LSTM over the input sequence ---------------------
    def enc_body(t, carry):
        h, c = carry
        m = msk_ref[t]                                          # (Bp, 1) f32
        h_new, c_new = lstm_step(xg_enc_ref[t], h, c, enc_whh, enc_b)
        # Keep the previous state on padded (mask == 0) positions.
        h = jnp.where(m > 0.0, h_new, h)
        c = jnp.where(m > 0.0, c_new, c)
        return h, c

    h0 = jnp.zeros((Bp, H), jnp.float32)
    c0 = jnp.zeros((Bp, H), jnp.float32)
    h, c = jax.lax.fori_loop(0, T_enc, enc_body, (h0, c0), unroll=enc_unroll)

    # ---- decoder recurrence: store hidden states only ----------------------
    def dec_body(t, carry):
        h, c = carry
        h, c = lstm_step(xg_dec_ref[t], h, c, dec_whh, dec_b)
        hdec_ref[t] = h
        return h, c

    jax.lax.fori_loop(0, T_dec, dec_body, (h, c), unroll=dec_unroll)

    # ---- batched vocab projection + log-softmax + greedy argmax ------------
    h_all = hdec_ref[...].reshape(T_dec * Bp, H).astype(jnp.bfloat16)
    logits = jnp.dot(h_all, wout_ref[...],
                     preferred_element_type=jnp.float32)
    logits = logits + jnp.broadcast_to(bout_ref[...], (T_dec * Bp, V))
    mx = jnp.max(logits, axis=-1, keepdims=True)
    z = logits - mx
    lse = jnp.log(jnp.sum(jnp.exp(z), axis=-1, keepdims=True))
    logp_ref[...] = (z - lse).reshape(T_dec, Bp, V)
    # First-occurrence argmax over the vocab (lane) axis; mx is an exact
    # element of logits so the equality is safe.
    lane_iota = jax.lax.broadcasted_iota(jnp.int32, (T_dec * Bp, V), 1)
    tok = jnp.min(jnp.where(logits == mx, lane_iota, V),
                  axis=-1, keepdims=True)                       # (T*Bp, 1)
    tok_ref[...] = tok.reshape(T_dec, Bp, 1).astype(jnp.int32)


def _nbytes(shape, dtype):
    return math.prod(shape) * jnp.dtype(dtype).itemsize


def rnnlm_vae_pallas(emb_inp, msk, emb_tgt,
                     enc_wih, enc_whh, enc_b,
                     dec_wih, dec_whh, dec_b,
                     w_out, b_out):
    T_enc, B, D = emb_inp.shape
    T_dec = emb_tgt.shape[0]
    H = enc_whh.shape[0]
    G = 4 * H
    V = w_out.shape[1]

    # Batch split over a "parallel" grid axis (v7x: both TensorCores).  Fall
    # back to a single program if the per-program batch is not sublane (8)
    # aligned, so the BlockSpec (8, 128) rule always holds.
    NB = 2 if (B % 2 == 0 and (B // 2) % 8 == 0) else 1
    Bp = B // NB

    batch_blk = lambda shape: pl.BlockSpec(shape, lambda i: (0, i, 0))
    full_blk = lambda arr: pl.BlockSpec(arr.shape, lambda i: (0, 0))

    in_specs = [
        batch_blk((T_enc, Bp, D)),          # emb_inp (bf16)
        batch_blk((T_enc, Bp, 1)),          # msk     (f32)
        batch_blk((T_dec, Bp, D)),          # emb_tgt (bf16)
        full_blk(enc_wih), full_blk(enc_whh), full_blk(enc_b),
        full_blk(dec_wih), full_blk(dec_whh), full_blk(dec_b),
        full_blk(w_out), full_blk(b_out),
    ]
    out_specs = (
        batch_blk((T_dec, Bp, V)),          # log-probs
        batch_blk((T_dec, Bp, 1)),          # greedy tokens
    )
    scratch_shapes = [
        pltpu.VMEM((T_enc, Bp, G), jnp.float32),   # precomputed enc x-gates
        pltpu.VMEM((T_dec, Bp, G), jnp.float32),   # precomputed dec x-gates
        pltpu.VMEM((T_dec, Bp, H), jnp.float32),   # decoder hidden states
    ]

    # Explicit VMEM limit sized from the resident set (double-buffered blocks
    # + scratch) with headroom; v5e's scoped default is only 16 MiB.
    block_bytes = (
        _nbytes((T_enc, Bp, D), jnp.bfloat16) + _nbytes((T_enc, Bp, 1), jnp.float32)
        + _nbytes((T_dec, Bp, D), jnp.bfloat16)
        + _nbytes(enc_wih.shape, jnp.bfloat16) + _nbytes(enc_whh.shape, jnp.bfloat16)
        + _nbytes(enc_b.shape, jnp.float32)
        + _nbytes(dec_wih.shape, jnp.bfloat16) + _nbytes(dec_whh.shape, jnp.bfloat16)
        + _nbytes(dec_b.shape, jnp.float32)
        + _nbytes(w_out.shape, jnp.bfloat16) + _nbytes(b_out.shape, jnp.float32)
        + _nbytes((T_dec, Bp, V), jnp.float32) + _nbytes((T_dec, Bp, 1), jnp.int32)
    )
    scratch_bytes = (_nbytes((T_enc, Bp, G), jnp.float32)
                     + _nbytes((T_dec, Bp, G), jnp.float32)
                     + _nbytes((T_dec, Bp, H), jnp.float32))
    est = 2 * block_bytes + scratch_bytes + (8 << 20)
    vmem_limit = min(64 << 20, max(est, 32 << 20))

    return pl.pallas_call(
        _rnnlm_vae_kernel,
        grid=(NB,),
        out_shape=(jax.ShapeDtypeStruct((T_dec, B, V), jnp.float32),
                   jax.ShapeDtypeStruct((T_dec, B, 1), jnp.int32)),
        in_specs=in_specs,
        out_specs=out_specs,
        scratch_shapes=scratch_shapes,
        compiler_params=pltpu.CompilerParams(
            dimension_semantics=("parallel",),
            vmem_limit_bytes=vmem_limit),
    )(emb_inp, msk, emb_tgt,
      enc_wih, enc_whh, enc_b,
      dec_wih, dec_whh, dec_b,
      w_out, b_out)


# ---------------------------------------------------------------------------
# RNNLM_VAE.forward equivalent
# ---------------------------------------------------------------------------
@jax.jit
def rnnlm_vae_forward(params, inp_var, inp_msk, tgt_var, tgt_msk=None, aux=None):
    # self.emb.forward(inp_var) -- embedding gather kept in plain JAX glue,
    # transported to the kernel in bf16 (halves the largest activation DMA).
    emb_inp = jnp.take(params["emb"], inp_var, axis=0)        # (T,  B, D) bf16
    emb_tgt = jnp.take(params["emb"], tgt_var, axis=0)        # (Td, B, D) bf16
    msk = inp_msk.astype(jnp.float32)[..., None]              # (T,  B, 1)

    # self.enc.forward(emb, inp_msk) + self.dec.forward(h_t, tgt_var, ...)
    # fused into a single Pallas kernel (state handed over inside the kernel).
    logp, tok = rnnlm_vae_pallas(
        emb_inp, msk, emb_tgt,
        params["enc_wih"], params["enc_whh"], params["enc_b"],
        params["dec_wih"], params["dec_whh"], params["dec_b"],
        params["w_out"], params["b_out"])
    decoder_outputs_prob = logp          # (Td, B, V) log-probs
    decoder_outputs = tok[..., 0]        # (Td, B) greedy tokens
    return decoder_outputs_prob, decoder_outputs


# ---------------------------------------------------------------------------
# deterministic synthetic parameters
# ---------------------------------------------------------------------------
def init_params(key, vocab, inp_dim, hid_dim):
    # Synthetic parameters generated directly in the split layout used by the
    # kernel:
    #   *_wih : W_ih, shape (inp_dim, 4*hid_dim), bf16 (batched input proj).
    #   *_whh : W_hh, shape (hid_dim, 4*hid_dim), bf16 (recurrent proj).
    #   *_b   : combined bias (b_ih + b_hh), shape (1, 4*hid_dim), f32.
    #   gate column order (i, f, o, g).
    # A loader for real PyTorch checkpoints would transpose the weights and
    # permute gate columns from PyTorch's (i, f, g, o) order.
    ks = jax.random.split(key, 9)
    s = 0.1
    n = lambda k, shape: jax.random.normal(k, shape, jnp.float32) * s
    return {
        "emb":     n(ks[0], (vocab, inp_dim)).astype(jnp.bfloat16),
        "enc_wih": n(ks[1], (inp_dim, 4 * hid_dim)).astype(jnp.bfloat16),
        "enc_whh": n(ks[2], (hid_dim, 4 * hid_dim)).astype(jnp.bfloat16),
        "enc_b":   n(ks[3], (1, 4 * hid_dim)),
        "dec_wih": n(ks[4], (inp_dim, 4 * hid_dim)).astype(jnp.bfloat16),
        "dec_whh": n(ks[5], (hid_dim, 4 * hid_dim)).astype(jnp.bfloat16),
        "dec_b":   n(ks[6], (1, 4 * hid_dim)),
        "w_out":   n(ks[7], (hid_dim, vocab)).astype(jnp.bfloat16),
        "b_out":   n(ks[8], (1, vocab)),
    }


if __name__ == "__main__":
    VOCAB, D, H = 128, 32, 32
    T_ENC, T_DEC, B = 8, 8, 16   # B=16 -> two 8-row batch slabs (v7x: 2 TCs)

    key = jax.random.PRNGKey(0)
    k_par, k_inp, k_tgt = jax.random.split(key, 3)
    params = init_params(k_par, VOCAB, D, H)

    inp_var = jax.random.randint(k_inp, (T_ENC, B), 0, VOCAB, dtype=jnp.int32)
    tgt_var = jax.random.randint(k_tgt, (T_DEC, B), 0, VOCAB, dtype=jnp.int32)
    # variable-length mask: batch element b has length 3 + b % (T_ENC - 2)
    lengths = 3 + (jnp.arange(B) % (T_ENC - 2))
    inp_msk = (jnp.arange(T_ENC)[:, None] < lengths[None, :]).astype(jnp.float32)
    tgt_msk = jnp.ones((T_DEC, B), jnp.float32)

    logp, toks = rnnlm_vae_forward(params, inp_var, inp_msk, tgt_var, tgt_msk)
    jax.block_until_ready((logp, toks))

    assert logp.shape == (T_DEC, B, VOCAB)
    assert toks.shape == (T_DEC, B)
    assert bool(jnp.all(jnp.isfinite(logp)))
    # log-softmax rows must sum to ~1 in prob space
    assert bool(jnp.allclose(jnp.sum(jnp.exp(logp), axis=-1), 1.0, atol=1e-4))
    assert bool(jnp.all((toks >= 0) & (toks < VOCAB)))
    print("KERNEL_OK")
</pallas_src>

<mosaic_0001>
module attributes {stable_mosaic.version = 11 : i64} {
  func.func @_rnnlm_vae_kernel(%arg0: i32, %arg1: memref<8x8x32xbf16, #tpu.memory_space<vmem>>, %arg2: memref<8x8x1xf32, #tpu.memory_space<vmem>>, %arg3: memref<8x8x32xbf16, #tpu.memory_space<vmem>>, %arg4: memref<32x128xbf16, #tpu.memory_space<vmem>>, %arg5: memref<32x128xbf16, #tpu.memory_space<vmem>>, %arg6: memref<1x128xf32, #tpu.memory_space<vmem>>, %arg7: memref<32x128xbf16, #tpu.memory_space<vmem>>, %arg8: memref<32x128xbf16, #tpu.memory_space<vmem>>, %arg9: memref<1x128xf32, #tpu.memory_space<vmem>>, %arg10: memref<32x128xbf16, #tpu.memory_space<vmem>>, %arg11: memref<1x128xf32, #tpu.memory_space<vmem>>, %arg12: memref<8x8x128xf32, #tpu.memory_space<vmem>>, %arg13: memref<8x8x1xi32, #tpu.memory_space<vmem>>, %arg14: memref<8x8x128xf32, #tpu.memory_space<vmem>>, %arg15: memref<8x8x128xf32, #tpu.memory_space<vmem>>, %arg16: memref<8x8x32xf32, #tpu.memory_space<vmem>>) attributes {dimension_semantics = [#tpu.dimension_semantics<parallel>], iteration_bounds = array<i64: 2>, scalar_prefetch = 0 : i64, scratch_operands = 3 : i64, tpu.core_type = #tpu.core_type<tc>, window_params = [{transform_indices = @transform_0, window_bounds = array<i64: 8, 8, 32>}, {transform_indices = @transform_1, window_bounds = array<i64: 8, 8, 1>}, {transform_indices = @transform_2, window_bounds = array<i64: 8, 8, 32>}, {pipeline_mode = #tpu.pipeline_mode<synchronous>, transform_indices = @transform_3, window_bounds = array<i64: 32, 128>}, {pipeline_mode = #tpu.pipeline_mode<synchronous>, transform_indices = @transform_4, window_bounds = array<i64: 32, 128>}, {pipeline_mode = #tpu.pipeline_mode<synchronous>, transform_indices = @transform_5, window_bounds = array<i64: 1, 128>}, {pipeline_mode = #tpu.pipeline_mode<synchronous>, transform_indices = @transform_6, window_bounds = array<i64: 32, 128>}, {pipeline_mode = #tpu.pipeline_mode<synchronous>, transform_indices = @transform_7, window_bounds = array<i64: 32, 128>}, {pipeline_mode = #tpu.pipeline_mode<synchronous>, transform_indices = @transform_8, window_bounds = array<i64: 1, 128>}, {pipeline_mode = #tpu.pipeline_mode<synchronous>, transform_indices = @transform_9, window_bounds = array<i64: 32, 128>}, {pipeline_mode = #tpu.pipeline_mode<synchronous>, transform_indices = @transform_10, window_bounds = array<i64: 1, 128>}, {transform_indices = @transform_11, window_bounds = array<i64: 8, 8, 128>}, {transform_indices = @transform_12, window_bounds = array<i64: 8, 8, 1>}]} {
    %c0 = arith.constant 0 : index
    %c0_0 = arith.constant 0 : index
    %0 = vector.load %arg5[%c0, %c0_0] : memref<32x128xbf16, #tpu.memory_space<vmem>>, vector<32x128xbf16>
    %c0_1 = arith.constant 0 : index
    %c0_2 = arith.constant 0 : index
    %1 = vector.load %arg8[%c0_1, %c0_2] : memref<32x128xbf16, #tpu.memory_space<vmem>>, vector<32x128xbf16>
    %c0_3 = arith.constant 0 : index
    %c0_4 = arith.constant 0 : index
    %2 = vector.load %arg6[%c0_3, %c0_4] : memref<1x128xf32, #tpu.memory_space<vmem>>, vector<1x128xf32>
    %3 = vector.shape_cast %2 : vector<1x128xf32> to vector<1x128xf32>
    %4 = vector.broadcast %3 : vector<1x128xf32> to vector<8x128xf32>
    %c0_5 = arith.constant 0 : index
    %c0_6 = arith.constant 0 : index
    %5 = vector.load %arg9[%c0_5, %c0_6] : memref<1x128xf32, #tpu.memory_space<vmem>>, vector<1x128xf32>
    %6 = vector.shape_cast %5 : vector<1x128xf32> to vector<1x128xf32>
    %7 = vector.broadcast %6 : vector<1x128xf32> to vector<8x128xf32>
    %c0_7 = arith.constant 0 : index
    %c0_8 = arith.constant 0 : index
    %c0_9 = arith.constant 0 : index
    %8 = vector.load %arg1[%c0_7, %c0_8, %c0_9] : memref<8x8x32xbf16, #tpu.memory_space<vmem>>, vector<8x8x32xbf16>
    %9 = vector.shape_cast %8 : vector<8x8x32xbf16> to vector<64x32xbf16>
    %c0_10 = arith.constant 0 : index
    %c0_11 = arith.constant 0 : index
    %10 = vector.load %arg4[%c0_10, %c0_11] : memref<32x128xbf16, #tpu.memory_space<vmem>>, vector<32x128xbf16>
    %cst = arith.constant dense<0.000000e+00> : vector<64x128xf32>
    %11 = tpu.matmul %9, %10, %cst {dimension_numbers = #tpu.dot_dimension_numbers<[1], [0], [0], [1], [0, 0, 1, 1], [], []>} : vector<64x32xbf16>, vector<32x128xbf16>, vector<64x128xf32> -> vector<64x128xf32>
    %12 = vector.shape_cast %11 : vector<64x128xf32> to vector<8x8x128xf32>
    %c0_12 = arith.constant 0 : index
    %c0_13 = arith.constant 0 : index
    %c0_14 = arith.constant 0 : index
    %13 = vector.load %arg14[%c0_12, %c0_13, %c0_14] : memref<8x8x128xf32, #tpu.memory_space<vmem>>, vector<8x8x128xf32>
    tpu.vector_store %arg14[%c0_12, %c0_13, %c0_14], %12 {strides = array<i32>} : memref<8x8x128xf32, #tpu.memory_space<vmem>>, vector<8x8x128xf32>,
    %c0_15 = arith.constant 0 : index
    %c0_16 = arith.constant 0 : index
    %c0_17 = arith.constant 0 : index
    %14 = vector.load %arg3[%c0_15, %c0_16, %c0_17] : memref<8x8x32xbf16, #tpu.memory_space<vmem>>, vector<8x8x32xbf16>
    %15 = vector.shape_cast %14 : vector<8x8x32xbf16> to vector<64x32xbf16>
    %c0_18 = arith.constant 0 : index
    %c0_19 = arith.constant 0 : index
    %16 = vector.load %arg7[%c0_18, %c0_19] : memref<32x128xbf16, #tpu.memory_space<vmem>>, vector<32x128xbf16>
    %cst_20 = arith.constant dense<0.000000e+00> : vector<64x128xf32>
    %17 = tpu.matmul %15, %16, %cst_20 {dimension_numbers = #tpu.dot_dimension_numbers<[1], [0], [0], [1], [0, 0, 1, 1], [], []>} : vector<64x32xbf16>, vector<32x128xbf16>, vector<64x128xf32> -> vector<64x128xf32>
    %18 = vector.shape_cast %17 : vector<64x128xf32> to vector<8x8x128xf32>
    %c0_21 = arith.constant 0 : index
    %c0_22 = arith.constant 0 : index
    %c0_23 = arith.constant 0 : index
    %19 = vector.load %arg15[%c0_21, %c0_22, %c0_23] : memref<8x8x128xf32, #tpu.memory_space<vmem>>, vector<8x8x128xf32>
    tpu.vector_store %arg15[%c0_21, %c0_22, %c0_23], %18 {strides = array<i32>} : memref<8x8x128xf32, #tpu.memory_space<vmem>>, vector<8x8x128xf32>,
    %cst_24 = arith.constant 0.000000e+00 : f32
    %20 = vector.broadcast %cst_24 : f32 to vector<8x32xf32>
    %cst_25 = arith.constant 0.000000e+00 : f32
    %21 = vector.broadcast %cst_25 : f32 to vector<8x32xf32>
    %c0_i32 = arith.constant 0 : i32
    %22 = arith.index_cast %c0_i32 : i32 to index
    %c0_26 = arith.constant 0 : index
    %c0_27 = arith.constant 0 : index
    %23 = vector.load %arg2[%22, %c0_26, %c0_27] : memref<8x8x1xf32, #tpu.memory_space<vmem>>, vector<1x8x1xf32>
    %24 = vector.shape_cast %23 : vector<1x8x1xf32> to vector<8x1xf32>
    %25 = arith.index_cast %c0_i32 : i32 to index
    %c0_28 = arith.constant 0 : index
    %c0_29 = arith.constant 0 : index
    %26 = vector.load %arg14[%25, %c0_28, %c0_29] : memref<8x8x128xf32, #tpu.memory_space<vmem>>, vector<1x8x128xf32>
    %27 = vector.shape_cast %26 : vector<1x8x128xf32> to vector<8x128xf32>
    %28 = arith.truncf %20 : vector<8x32xf32> to vector<8x32xbf16>
    %cst_30 = arith.constant dense<0.000000e+00> : vector<8x128xf32>
    %29 = tpu.matmul %28, %0, %cst_30 {dimension_numbers = #tpu.dot_dimension_numbers<[1], [0], [0], [1], [0, 0, 1, 1], [], []>} : vector<8x32xbf16>, vector<32x128xbf16>, vector<8x128xf32> -> vector<8x128xf32>
    %30 = arith.addf %27, %29 : vector<8x128xf32>
    %31 = arith.addf %30, %4 : vector<8x128xf32>
    %32 = vector.extract_strided_slice %31 {offsets = [0, 0], sizes = [8, 96], strides = [1, 1]} : vector<8x128xf32> to vector<8x96xf32>
    %33 = arith.negf %32 : vector<8x96xf32>
    %34 = math.exp %33 : vector<8x96xf32>
    %cst_31 = arith.constant 1.000000e+00 : f32
    %35 = vector.broadcast %cst_31 : f32 to vector<8x96xf32>
    %36 = arith.addf %35, %34 : vector<8x96xf32>
    %37 = arith.divf %35, %36 : vector<8x96xf32>
    %38 = vector.extract_strided_slice %37 {offsets = [0, 0], sizes = [8, 32], strides = [1, 1]} : vector<8x96xf32> to vector<8x32xf32>
    %39 = vector.extract_strided_slice %37 {offsets = [0, 32], sizes = [8, 32], strides = [1, 1]} : vector<8x96xf32> to vector<8x32xf32>
    %40 = vector.extract_strided_slice %37 {offsets = [0, 64], sizes = [8, 32], strides = [1, 1]} : vector<8x96xf32> to vector<8x32xf32>
    %41 = vector.extract_strided_slice %31 {offsets = [0, 96], sizes = [8, 32], strides = [1, 1]} : vector<8x128xf32> to vector<8x32xf32>
    %42 = math.tanh %41 : vector<8x32xf32>
    %43 = arith.mulf %39, %21 : vector<8x32xf32>
    %44 = arith.mulf %38, %42 : vector<8x32xf32>
    %45 = arith.addf %43, %44 : vector<8x32xf32>
    %46 = math.tanh %45 : vector<8x32xf32>
    %47 = arith.mulf %40, %46 : vector<8x32xf32>
    %cst_32 = arith.constant 0.000000e+00 : f32
    %48 = vector.broadcast %cst_32 : f32 to vector<8x1xf32>
    %49 = arith.cmpf ogt, %24, %48 : vector<8x1xf32>
    %50 = vector.shape_cast %49 : vector<8x1xi1> to vector<8x1xi1>
    %51 = vector.broadcast %50 : vector<8x1xi1> to vector<8x32xi1>
    %52 = arith.select %51, %47, %20 : vector<8x32xi1>, vector<8x32xf32>
    %cst_33 = arith.constant 0.000000e+00 : f32
    %53 = vector.broadcast %cst_33 : f32 to vector<8x1xf32>
    %54 = arith.cmpf ogt, %24, %53 : vector<8x1xf32>
    %55 = vector.shape_cast %54 : vector<8x1xi1> to vector<8x1xi1>
    %56 = vector.broadcast %55 : vector<8x1xi1> to vector<8x32xi1>
    %57 = arith.select %56, %45, %21 : vector<8x32xi1>, vector<8x32xf32>
    %c1_i32 = arith.constant 1 : i32
    %58 = arith.index_cast %c1_i32 : i32 to index
    %c0_34 = arith.constant 0 : index
    %c0_35 = arith.constant 0 : index
    %59 = vector.load %arg2[%58, %c0_34, %c0_35] : memref<8x8x1xf32, #tpu.memory_space<vmem>>, vector<1x8x1xf32>
    %60 = vector.shape_cast %59 : vector<1x8x1xf32> to vector<8x1xf32>
    %61 = arith.index_cast %c1_i32 : i32 to index
    %c0_36 = arith.constant 0 : index
    %c0_37 = arith.constant 0 : index
    %62 = vector.load %arg14[%61, %c0_36, %c0_37] : memref<8x8x128xf32, #tpu.memory_space<vmem>>, vector<1x8x128xf32>
    %63 = vector.shape_cast %62 : vector<1x8x128xf32> to vector<8x128xf32>
    %64 = arith.truncf %52 : vector<8x32xf32> to vector<8x32xbf16>
    %cst_38 = arith.constant dense<0.000000e+00> : vector<8x128xf32>
    %65 = tpu.matmul %64, %0, %cst_38 {dimension_numbers = #tpu.dot_dimension_numbers<[1], [0], [0], [1], [0, 0, 1, 1], [], []>} : vector<8x32xbf16>, vector<32x128xbf16>, vector<8x128xf32> -> vector<8x128xf32>
    %66 = arith.addf %63, %65 : vector<8x128xf32>
    %67 = arith.addf %66, %4 : vector<8x128xf32>
    %68 = vector.extract_strided_slice %67 {offsets = [0, 0], sizes = [8, 96], strides = [1, 1]} : vector<8x128xf32> to vector<8x96xf32>
    %69 = arith.negf %68 : vector<8x96xf32>
    %70 = math.exp %69 : vector<8x96xf32>
    %cst_39 = arith.constant 1.000000e+00 : f32
    %71 = vector.broadcast %cst_39 : f32 to vector<8x96xf32>
    %72 = arith.addf %71, %70 : vector<8x96xf32>
    %73 = arith.divf %71, %72 : vector<8x96xf32>
    %74 = vector.extract_strided_slice %73 {offsets = [0, 0], sizes = [8, 32], strides = [1, 1]} : vector<8x96xf32> to vector<8x32xf32>
    %75 = vector.extract_strided_slice %73 {offsets = [0, 32], sizes = [8, 32], strides = [1, 1]} : vector<8x96xf32> to vector<8x32xf32>
    %76 = vector.extract_strided_slice %73 {offsets = [0, 64], sizes = [8, 32], strides = [1, 1]} : vector<8x96xf32> to vector<8x32xf32>
    %77 = vector.extract_strided_slice %67 {offsets = [0, 96], sizes = [8, 32], strides = [1, 1]} : vector<8x128xf32> to vector<8x32xf32>
    %78 = math.tanh %77 : vector<8x32xf32>
    %79 = arith.mulf %75, %57 : vector<8x32xf32>
    %80 = arith.mulf %74, %78 : vector<8x32xf32>
    %81 = arith.addf %79, %80 : vector<8x32xf32>
    %82 = math.tanh %81 : vector<8x32xf32>
    %83 = arith.mulf %76, %82 : vector<8x32xf32>
    %cst_40 = arith.constant 0.000000e+00 : f32
    %84 = vector.broadcast %cst_40 : f32 to vector<8x1xf32>
    %85 = arith.cmpf ogt, %60, %84 : vector<8x1xf32>
    %86 = vector.shape_cast %85 : vector<8x1xi1> to vector<8x1xi1>
    %87 = vector.broadcast %86 : vector<8x1xi1> to vector<8x32xi1>
    %88 = arith.select %87, %83, %52 : vector<8x32xi1>, vector<8x32xf32>
    %cst_41 = arith.constant 0.000000e+00 : f32
    %89 = vector.broadcast %cst_41 : f32 to vector<8x1xf32>
    %90 = arith.cmpf ogt, %60, %89 : vector<8x1xf32>
    %91 = vector.shape_cast %90 : vector<8x1xi1> to vector<8x1xi1>
    %92 = vector.broadcast %91 : vector<8x1xi1> to vector<8x32xi1>
    %93 = arith.select %92, %81, %57 : vector<8x32xi1>, vector<8x32xf32>
    %c2_i32 = arith.constant 2 : i32
    %94 = arith.index_cast %c2_i32 : i32 to index
    %c0_42 = arith.constant 0 : index
    %c0_43 = arith.constant 0 : index
    %95 = vector.load %arg2[%94, %c0_42, %c0_43] : memref<8x8x1xf32, #tpu.memory_space<vmem>>, vector<1x8x1xf32>
    %96 = vector.shape_cast %95 : vector<1x8x1xf32> to vector<8x1xf32>
    %97 = arith.index_cast %c2_i32 : i32 to index
    %c0_44 = arith.constant 0 : index
    %c0_45 = arith.constant 0 : index
    %98 = vector.load %arg14[%97, %c0_44, %c0_45] : memref<8x8x128xf32, #tpu.memory_space<vmem>>, vector<1x8x128xf32>
    %99 = vector.shape_cast %98 : vector<1x8x128xf32> to vector<8x128xf32>
    %100 = arith.truncf %88 : vector<8x32xf32> to vector<8x32xbf16>
    %cst_46 = arith.constant dense<0.000000e+00> : vector<8x128xf32>
    %101 = tpu.matmul %100, %0, %cst_46 {dimension_numbers = #tpu.dot_dimension_numbers<[1], [0], [0], [1], [0, 0, 1, 1], [], []>} : vector<8x32xbf16>, vector<32x128xbf16>, vector<8x128xf32> -> vector<8x128xf32>
    %102 = arith.addf %99, %101 : vector<8x128xf32>
    %103 = arith.addf %102, %4 : vector<8x128xf32>
    %104 = vector.extract_strided_slice %103 {offsets = [0, 0], sizes = [8, 96], strides = [1, 1]} : vector<8x128xf32> to vector<8x96xf32>
    %105 = arith.negf %104 : vector<8x96xf32>
    %106 = math.exp %105 : vector<8x96xf32>
    %cst_47 = arith.constant 1.000000e+00 : f32
    %107 = vector.broadcast %cst_47 : f32 to vector<8x96xf32>
    %108 = arith.addf %107, %106 : vector<8x96xf32>
    %109 = arith.divf %107, %108 : vector<8x96xf32>
    %110 = vector.extract_strided_slice %109 {offsets = [0, 0], sizes = [8, 32], strides = [1, 1]} : vector<8x96xf32> to vector<8x32xf32>
    %111 = vector.extract_strided_slice %109 {offsets = [0, 32], sizes = [8, 32], strides = [1, 1]} : vector<8x96xf32> to vector<8x32xf32>
    %112 = vector.extract_strided_slice %109 {offsets = [0, 64], sizes = [8, 32], strides = [1, 1]} : vector<8x96xf32> to vector<8x32xf32>
    %113 = vector.extract_strided_slice %103 {offsets = [0, 96], sizes = [8, 32], strides = [1, 1]} : vector<8x128xf32> to vector<8x32xf32>
    %114 = math.tanh %113 : vector<8x32xf32>
    %115 = arith.mulf %111, %93 : vector<8x32xf32>
    %116 = arith.mulf %110, %114 : vector<8x32xf32>
    %117 = arith.addf %115, %116 : vector<8x32xf32>
    %118 = math.tanh %117 : vector<8x32xf32>
    %119 = arith.mulf %112, %118 : vector<8x32xf32>
    %cst_48 = arith.constant 0.000000e+00 : f32
    %120 = vector.broadcast %cst_48 : f32 to vector<8x1xf32>
    %121 = arith.cmpf ogt, %96, %120 : vector<8x1xf32>
    %122 = vector.shape_cast %121 : vector<8x1xi1> to vector<8x1xi1>
    %123 = vector.broadcast %122 : vector<8x1xi1> to vector<8x32xi1>
    %124 = arith.select %123, %119, %88 : vector<8x32xi1>, vector<8x32xf32>
    %cst_49 = arith.constant 0.000000e+00 : f32
    %125 = vector.broadcast %cst_49 : f32 to vector<8x1xf32>
    %126 = arith.cmpf ogt, %96, %125 : vector<8x1xf32>
    %127 = vector.shape_cast %126 : vector<8x1xi1> to vector<8x1xi1>
    %128 = vector.broadcast %127 : vector<8x1xi1> to vector<8x32xi1>
    %129 = arith.select %128, %117, %93 : vector<8x32xi1>, vector<8x32xf32>
    %c3_i32 = arith.constant 3 : i32
    %130 = arith.index_cast %c3_i32 : i32 to index
    %c0_50 = arith.constant 0 : index
    %c0_51 = arith.constant 0 : index
    %131 = vector.load %arg2[%130, %c0_50, %c0_51] : memref<8x8x1xf32, #tpu.memory_space<vmem>>, vector<1x8x1xf32>
    %132 = vector.shape_cast %131 : vector<1x8x1xf32> to vector<8x1xf32>
    %133 = arith.index_cast %c3_i32 : i32 to index
    %c0_52 = arith.constant 0 : index
    %c0_53 = arith.constant 0 : index
    %134 = vector.load %arg14[%133, %c0_52, %c0_53] : memref<8x8x128xf32, #tpu.memory_space<vmem>>, vector<1x8x128xf32>
    %135 = vector.shape_cast %134 : vector<1x8x128xf32> to vector<8x128xf32>
    %136 = arith.truncf %124 : vector<8x32xf32> to vector<8x32xbf16>
    %cst_54 = arith.constant dense<0.000000e+00> : vector<8x128xf32>
    %137 = tpu.matmul %136, %0, %cst_54 {dimension_numbers = #tpu.dot_dimension_numbers<[1], [0], [0], [1], [0, 0, 1, 1], [], []>} : vector<8x32xbf16>, vector<32x128xbf16>, vector<8x128xf32> -> vector<8x128xf32>
    %138 = arith.addf %135, %137 : vector<8x128xf32>
    %139 = arith.addf %138, %4 : vector<8x128xf32>
    %140 = vector.extract_strided_slice %139 {offsets = [0, 0], sizes = [8, 96], strides = [1, 1]} : vector<8x128xf32> to vector<8x96xf32>
    %141 = arith.negf %140 : vector<8x96xf32>
    %142 = math.exp %141 : vector<8x96xf32>
    %cst_55 = arith.constant 1.000000e+00 : f32
    %143 = vector.broadcast %cst_55 : f32 to vector<8x96xf32>
    %144 = arith.addf %143, %142 : vector<8x96xf32>
    %145 = arith.divf %143, %144 : vector<8x96xf32>
    %146 = vector.extract_strided_slice %145 {offsets = [0, 0], sizes = [8, 32], strides = [1, 1]} : vector<8x96xf32> to vector<8x32xf32>
    %147 = vector.extract_strided_slice %145 {offsets = [0, 32], sizes = [8, 32], strides = [1, 1]} : vector<8x96xf32> to vector<8x32xf32>
    %148 = vector.extract_strided_slice %145 {offsets = [0, 64], sizes = [8, 32], strides = [1, 1]} : vector<8x96xf32> to vector<8x32xf32>
    %149 = vector.extract_strided_slice %139 {offsets = [0, 96], sizes = [8, 32], strides = [1, 1]} : vector<8x128xf32> to vector<8x32xf32>
    %150 = math.tanh %149 : vector<8x32xf32>
    %151 = arith.mulf %147, %129 : vector<8x32xf32>
    %152 = arith.mulf %146, %150 : vector<8x32xf32>
    %153 = arith.addf %151, %152 : vector<8x32xf32>
    %154 = math.tanh %153 : vector<8x32xf32>
    %155 = arith.mulf %148, %154 : vector<8x32xf32>
    %cst_56 = arith.constant 0.000000e+00 : f32
    %156 = vector.broadcast %cst_56 : f32 to vector<8x1xf32>
    %157 = arith.cmpf ogt, %132, %156 : vector<8x1xf32>
    %158 = vector.shape_cast %157 : vector<8x1xi1> to vector<8x1xi1>
    %159 = vector.broadcast %158 : vector<8x1xi1> to vector<8x32xi1>
    %160 = arith.select %159, %155, %124 : vector<8x32xi1>, vector<8x32xf32>
    %cst_57 = arith.constant 0.000000e+00 : f32
    %161 = vector.broadcast %cst_57 : f32 to vector<8x1xf32>
    %162 = arith.cmpf ogt, %132, %161 : vector<8x1xf32>
    %163 = vector.shape_cast %162 : vector<8x1xi1> to vector<8x1xi1>
    %164 = vector.broadcast %163 : vector<8x1xi1> to vector<8x32xi1>
    %165 = arith.select %164, %153, %129 : vector<8x32xi1>, vector<8x32xf32>
    %c4_i32 = arith.constant 4 : i32
    %166 = arith.index_cast %c4_i32 : i32 to index
    %c0_58 = arith.constant 0 : index
    %c0_59 = arith.constant 0 : index
    %167 = vector.load %arg2[%166, %c0_58, %c0_59] : memref<8x8x1xf32, #tpu.memory_space<vmem>>, vector<1x8x1xf32>
    %168 = vector.shape_cast %167 : vector<1x8x1xf32> to vector<8x1xf32>
    %169 = arith.index_cast %c4_i32 : i32 to index
    %c0_60 = arith.constant 0 : index
    %c0_61 = arith.constant 0 : index
    %170 = vector.load %arg14[%169, %c0_60, %c0_61] : memref<8x8x128xf32, #tpu.memory_space<vmem>>, vector<1x8x128xf32>
    %171 = vector.shape_cast %170 : vector<1x8x128xf32> to vector<8x128xf32>
    %172 = arith.truncf %160 : vector<8x32xf32> to vector<8x32xbf16>
    %cst_62 = arith.constant dense<0.000000e+00> : vector<8x128xf32>
    %173 = tpu.matmul %172, %0, %cst_62 {dimension_numbers = #tpu.dot_dimension_numbers<[1], [0], [0], [1], [0, 0, 1, 1], [], []>} : vector<8x32xbf16>, vector<32x128xbf16>, vector<8x128xf32> -> vector<8x128xf32>
    %174 = arith.addf %171, %173 : vector<8x128xf32>
    %175 = arith.addf %174, %4 : vector<8x128xf32>
    %176 = vector.extract_strided_slice %175 {offsets = [0, 0], sizes = [8, 96], strides = [1, 1]} : vector<8x128xf32> to vector<8x96xf32>
    %177 = arith.negf %176 : vector<8x96xf32>
    %178 = math.exp %177 : vector<8x96xf32>
    %cst_63 = arith.constant 1.000000e+00 : f32
    %179 = vector.broadcast %cst_63 : f32 to vector<8x96xf32>
    %180 = arith.addf %179, %178 : vector<8x96xf32>
    %181 = arith.divf %179, %180 : vector<8x96xf32>
    %182 = vector.extract_strided_slice %181 {offsets = [0, 0], sizes = [8, 32], strides = [1, 1]} : vector<8x96xf32> to vector<8x32xf32>
    %183 = vector.extract_strided_slice %181 {offsets = [0, 32], sizes = [8, 32], strides = [1, 1]} : vector<8x96xf32> to vector<8x32xf32>
    %184 = vector.extract_strided_slice %181 {offsets = [0, 64], sizes = [8, 32], strides = [1, 1]} : vector<8x96xf32> to vector<8x32xf32>
    %185 = vector.extract_strided_slice %175 {offsets = [0, 96], sizes = [8, 32], strides = [1, 1]} : vector<8x128xf32> to vector<8x32xf32>
    %186 = math.tanh %185 : vector<8x32xf32>
    %187 = arith.mulf %183, %165 : vector<8x32xf32>
    %188 = arith.mulf %182, %186 : vector<8x32xf32>
    %189 = arith.addf %187, %188 : vector<8x32xf32>
    %190 = math.tanh %189 : vector<8x32xf32>
    %191 = arith.mulf %184, %190 : vector<8x32xf32>
    %cst_64 = arith.constant 0.000000e+00 : f32
    %192 = vector.broadcast %cst_64 : f32 to vector<8x1xf32>
    %193 = arith.cmpf ogt, %168, %192 : vector<8x1xf32>
    %194 = vector.shape_cast %193 : vector<8x1xi1> to vector<8x1xi1>
    %195 = vector.broadcast %194 : vector<8x1xi1> to vector<8x32xi1>
    %196 = arith.select %195, %191, %160 : vector<8x32xi1>, vector<8x32xf32>
    %cst_65 = arith.constant 0.000000e+00 : f32
    %197 = vector.broadcast %cst_65 : f32 to vector<8x1xf32>
    %198 = arith.cmpf ogt, %168, %197 : vector<8x1xf32>
    %199 = vector.shape_cast %198 : vector<8x1xi1> to vector<8x1xi1>
    %200 = vector.broadcast %199 : vector<8x1xi1> to vector<8x32xi1>
    %201 = arith.select %200, %189, %165 : vector<8x32xi1>, vector<8x32xf32>
    %c5_i32 = arith.constant 5 : i32
    %202 = arith.index_cast %c5_i32 : i32 to index
    %c0_66 = arith.constant 0 : index
    %c0_67 = arith.constant 0 : index
    %203 = vector.load %arg2[%202, %c0_66, %c0_67] : memref<8x8x1xf32, #tpu.memory_space<vmem>>, vector<1x8x1xf32>
    %204 = vector.shape_cast %203 : vector<1x8x1xf32> to vector<8x1xf32>
    %205 = arith.index_cast %c5_i32 : i32 to index
    %c0_68 = arith.constant 0 : index
    %c0_69 = arith.constant 0 : index
    %206 = vector.load %arg14[%205, %c0_68, %c0_69] : memref<8x8x128xf32, #tpu.memory_space<vmem>>, vector<1x8x128xf32>
    %207 = vector.shape_cast %206 : vector<1x8x128xf32> to vector<8x128xf32>
    %208 = arith.truncf %196 : vector<8x32xf32> to vector<8x32xbf16>
    %cst_70 = arith.constant dense<0.000000e+00> : vector<8x128xf32>
    %209 = tpu.matmul %208, %0, %cst_70 {dimension_numbers = #tpu.dot_dimension_numbers<[1], [0], [0], [1], [0, 0, 1, 1], [], []>} : vector<8x32xbf16>, vector<32x128xbf16>, vector<8x128xf32> -> vector<8x128xf32>
    %210 = arith.addf %207, %209 : vector<8x128xf32>
    %211 = arith.addf %210, %4 : vector<8x128xf32>
    %212 = vector.extract_strided_slice %211 {offsets = [0, 0], sizes = [8, 96], strides = [1, 1]} : vector<8x128xf32> to vector<8x96xf32>
    %213 = arith.negf %212 : vector<8x96xf32>
    %214 = math.exp %213 : vector<8x96xf32>
    %cst_71 = arith.constant 1.000000e+00 : f32
    %215 = vector.broadcast %cst_71 : f32 to vector<8x96xf32>
    %216 = arith.addf %215, %214 : vector<8x96xf32>
    %217 = arith.divf %215, %216 : vector<8x96xf32>
    %218 = vector.extract_strided_slice %217 {offsets = [0, 0], sizes = [8, 32], strides = [1, 1]} : vector<8x96xf32> to vector<8x32xf32>
    %219 = vector.extract_strided_slice %217 {offsets = [0, 32], sizes = [8, 32], strides = [1, 1]} : vector<8x96xf32> to vector<8x32xf32>
    %220 = vector.extract_strided_slice %217 {offsets = [0, 64], sizes = [8, 32], strides = [1, 1]} : vector<8x96xf32> to vector<8x32xf32>
    %221 = vector.extract_strided_slice %211 {offsets = [0, 96], sizes = [8, 32], strides = [1, 1]} : vector<8x128xf32> to vector<8x32xf32>
    %222 = math.tanh %221 : vector<8x32xf32>
    %223 = arith.mulf %219, %201 : vector<8x32xf32>
    %224 = arith.mulf %218, %222 : vector<8x32xf32>
    %225 = arith.addf %223, %224 : vector<8x32xf32>
    %226 = math.tanh %225 : vector<8x32xf32>
    %227 = arith.mulf %220, %226 : vector<8x32xf32>
    %cst_72 = arith.constant 0.000000e+00 : f32
    %228 = vector.broadcast %cst_72 : f32 to vector<8x1xf32>
    %229 = arith.cmpf ogt, %204, %228 : vector<8x1xf32>
    %230 = vector.shape_cast %229 : vector<8x1xi1> to vector<8x1xi1>
    %231 = vector.broadcast %230 : vector<8x1xi1> to vector<8x32xi1>
    %232 = arith.select %231, %227, %196 : vector<8x32xi1>, vector<8x32xf32>
    %cst_73 = arith.constant 0.000000e+00 : f32
    %233 = vector.broadcast %cst_73 : f32 to vector<8x1xf32>
    %234 = arith.cmpf ogt, %204, %233 : vector<8x1xf32>
    %235 = vector.shape_cast %234 : vector<8x1xi1> to vector<8x1xi1>
    %236 = vector.broadcast %235 : vector<8x1xi1> to vector<8x32xi1>
    %237 = arith.select %236, %225, %201 : vector<8x32xi1>, vector<8x32xf32>
    %c6_i32 = arith.constant 6 : i32
    %238 = arith.index_cast %c6_i32 : i32 to index
    %c0_74 = arith.constant 0 : index
    %c0_75 = arith.constant 0 : index
    %239 = vector.load %arg2[%238, %c0_74, %c0_75] : memref<8x8x1xf32, #tpu.memory_space<vmem>>, vector<1x8x1xf32>
    %240 = vector.shape_cast %239 : vector<1x8x1xf32> to vector<8x1xf32>
    %241 = arith.index_cast %c6_i32 : i32 to index
    %c0_76 = arith.constant 0 : index
    %c0_77 = arith.constant 0 : index
    %242 = vector.load %arg14[%241, %c0_76, %c0_77] : memref<8x8x128xf32, #tpu.memory_space<vmem>>, vector<1x8x128xf32>
    %243 = vector.shape_cast %242 : vector<1x8x128xf32> to vector<8x128xf32>
    %244 = arith.truncf %232 : vector<8x32xf32> to vector<8x32xbf16>
    %cst_78 = arith.constant dense<0.000000e+00> : vector<8x128xf32>
    %245 = tpu.matmul %244, %0, %cst_78 {dimension_numbers = #tpu.dot_dimension_numbers<[1], [0], [0], [1], [0, 0, 1, 1], [], []>} : vector<8x32xbf16>, vector<32x128xbf16>, vector<8x128xf32> -> vector<8x128xf32>
    %246 = arith.addf %243, %245 : vector<8x128xf32>
    %247 = arith.addf %246, %4 : vector<8x128xf32>
    %248 = vector.extract_strided_slice %247 {offsets = [0, 0], sizes = [8, 96], strides = [1, 1]} : vector<8x128xf32> to vector<8x96xf32>
    %249 = arith.negf %248 : vector<8x96xf32>
    %250 = math.exp %249 : vector<8x96xf32>
    %cst_79 = arith.constant 1.000000e+00 : f32
    %251 = vector.broadcast %cst_79 : f32 to vector<8x96xf32>
    %252 = arith.addf %251, %250 : vector<8x96xf32>
    %253 = arith.divf %251, %252 : vector<8x96xf32>
    %254 = vector.extract_strided_slice %253 {offsets = [0, 0], sizes = [8, 32], strides = [1, 1]} : vector<8x96xf32> to vector<8x32xf32>
    %255 = vector.extract_strided_slice %253 {offsets = [0, 32], sizes = [8, 32], strides = [1, 1]} : vector<8x96xf32> to vector<8x32xf32>
    %256 = vector.extract_strided_slice %253 {offsets = [0, 64], sizes = [8, 32], strides = [1, 1]} : vector<8x96xf32> to vector<8x32xf32>
    %257 = vector.extract_strided_slice %247 {offsets = [0, 96], sizes = [8, 32], strides = [1, 1]} : vector<8x128xf32> to vector<8x32xf32>
    %258 = math.tanh %257 : vector<8x32xf32>
    %259 = arith.mulf %255, %237 : vector<8x32xf32>
    %260 = arith.mulf %254, %258 : vector<8x32xf32>
    %261 = arith.addf %259, %260 : vector<8x32xf32>
    %262 = math.tanh %261 : vector<8x32xf32>
    %263 = arith.mulf %256, %262 : vector<8x32xf32>
    %cst_80 = arith.constant 0.000000e+00 : f32
    %264 = vector.broadcast %cst_80 : f32 to vector<8x1xf32>
    %265 = arith.cmpf ogt, %240, %264 : vector<8x1xf32>
    %266 = vector.shape_cast %265 : vector<8x1xi1> to vector<8x1xi1>
    %267 = vector.broadcast %266 : vector<8x1xi1> to vector<8x32xi1>
    %268 = arith.select %267, %263, %232 : vector<8x32xi1>, vector<8x32xf32>
    %cst_81 = arith.constant 0.000000e+00 : f32
    %269 = vector.broadcast %cst_81 : f32 to vector<8x1xf32>
    %270 = arith.cmpf ogt, %240, %269 : vector<8x1xf32>
    %271 = vector.shape_cast %270 : vector<8x1xi1> to vector<8x1xi1>
    %272 = vector.broadcast %271 : vector<8x1xi1> to vector<8x32xi1>
    %273 = arith.select %272, %261, %237 : vector<8x32xi1>, vector<8x32xf32>
    %c7_i32 = arith.constant 7 : i32
    %274 = arith.index_cast %c7_i32 : i32 to index
    %c0_82 = arith.constant 0 : index
    %c0_83 = arith.constant 0 : index
    %275 = vector.load %arg2[%274, %c0_82, %c0_83] : memref<8x8x1xf32, #tpu.memory_space<vmem>>, vector<1x8x1xf32>
    %276 = vector.shape_cast %275 : vector<1x8x1xf32> to vector<8x1xf32>
    %277 = arith.index_cast %c7_i32 : i32 to index
    %c0_84 = arith.constant 0 : index
    %c0_85 = arith.constant 0 : index
    %278 = vector.load %arg14[%277, %c0_84, %c0_85] : memref<8x8x128xf32, #tpu.memory_space<vmem>>, vector<1x8x128xf32>
    %279 = vector.shape_cast %278 : vector<1x8x128xf32> to vector<8x128xf32>
    %280 = arith.truncf %268 : vector<8x32xf32> to vector<8x32xbf16>
    %cst_86 = arith.constant dense<0.000000e+00> : vector<8x128xf32>
    %281 = tpu.matmul %280, %0, %cst_86 {dimension_numbers = #tpu.dot_dimension_numbers<[1], [0], [0], [1], [0, 0, 1, 1], [], []>} : vector<8x32xbf16>, vector<32x128xbf16>, vector<8x128xf32> -> vector<8x128xf32>
    %282 = arith.addf %279, %281 : vector<8x128xf32>
    %283 = arith.addf %282, %4 : vector<8x128xf32>
    %284 = vector.extract_strided_slice %283 {offsets = [0, 0], sizes = [8, 96], strides = [1, 1]} : vector<8x128xf32> to vector<8x96xf32>
    %285 = arith.negf %284 : vector<8x96xf32>
    %286 = math.exp %285 : vector<8x96xf32>
    %cst_87 = arith.constant 1.000000e+00 : f32
    %287 = vector.broadcast %cst_87 : f32 to vector<8x96xf32>
    %288 = arith.addf %287, %286 : vector<8x96xf32>
    %289 = arith.divf %287, %288 : vector<8x96xf32>
    %290 = vector.extract_strided_slice %289 {offsets = [0, 0], sizes = [8, 32], strides = [1, 1]} : vector<8x96xf32> to vector<8x32xf32>
    %291 = vector.extract_strided_slice %289 {offsets = [0, 32], sizes = [8, 32], strides = [1, 1]} : vector<8x96xf32> to vector<8x32xf32>
    %292 = vector.extract_strided_slice %289 {offsets = [0, 64], sizes = [8, 32], strides = [1, 1]} : vector<8x96xf32> to vector<8x32xf32>
    %293 = vector.extract_strided_slice %283 {offsets = [0, 96], sizes = [8, 32], strides = [1, 1]} : vector<8x128xf32> to vector<8x32xf32>
    %294 = math.tanh %293 : vector<8x32xf32>
    %295 = arith.mulf %291, %273 : vector<8x32xf32>
    %296 = arith.mulf %290, %294 : vector<8x32xf32>
    %297 = arith.addf %295, %296 : vector<8x32xf32>
    %298 = math.tanh %297 : vector<8x32xf32>
    %299 = arith.mulf %292, %298 : vector<8x32xf32>
    %cst_88 = arith.constant 0.000000e+00 : f32
    %300 = vector.broadcast %cst_88 : f32 to vector<8x1xf32>
    %301 = arith.cmpf ogt, %276, %300 : vector<8x1xf32>
    %302 = vector.shape_cast %301 : vector<8x1xi1> to vector<8x1xi1>
    %303 = vector.broadcast %302 : vector<8x1xi1> to vector<8x32xi1>
    %304 = arith.select %303, %299, %268 : vector<8x32xi1>, vector<8x32xf32>
    %cst_89 = arith.constant 0.000000e+00 : f32
    %305 = vector.broadcast %cst_89 : f32 to vector<8x1xf32>
    %306 = arith.cmpf ogt, %276, %305 : vector<8x1xf32>
    %307 = vector.shape_cast %306 : vector<8x1xi1> to vector<8x1xi1>
    %308 = vector.broadcast %307 : vector<8x1xi1> to vector<8x32xi1>
    %309 = arith.select %308, %297, %273 : vector<8x32xi1>, vector<8x32xf32>
    %c8_i32 = arith.constant 8 : i32
    %c0_i32_90 = arith.constant 0 : i32
    %310 = arith.index_cast %c0_i32_90 : i32 to index
    %c0_91 = arith.constant 0 : index
    %c0_92 = arith.constant 0 : index
    %311 = vector.load %arg15[%310, %c0_91, %c0_92] : memref<8x8x128xf32, #tpu.memory_space<vmem>>, vector<1x8x128xf32>
    %312 = vector.shape_cast %311 : vector<1x8x128xf32> to vector<8x128xf32>
    %313 = arith.truncf %304 : vector<8x32xf32> to vector<8x32xbf16>
    %cst_93 = arith.constant dense<0.000000e+00> : vector<8x128xf32>
    %314 = tpu.matmul %313, %1, %cst_93 {dimension_numbers = #tpu.dot_dimension_numbers<[1], [0], [0], [1], [0, 0, 1, 1], [], []>} : vector<8x32xbf16>, vector<32x128xbf16>, vector<8x128xf32> -> vector<8x128xf32>
    %315 = arith.addf %312, %314 : vector<8x128xf32>
    %316 = arith.addf %315, %7 : vector<8x128xf32>
    %317 = vector.extract_strided_slice %316 {offsets = [0, 0], sizes = [8, 96], strides = [1, 1]} : vector<8x128xf32> to vector<8x96xf32>
    %318 = arith.negf %317 : vector<8x96xf32>
    %319 = math.exp %318 : vector<8x96xf32>
    %cst_94 = arith.constant 1.000000e+00 : f32
    %320 = vector.broadcast %cst_94 : f32 to vector<8x96xf32>
    %321 = arith.addf %320, %319 : vector<8x96xf32>
    %322 = arith.divf %320, %321 : vector<8x96xf32>
    %323 = vector.extract_strided_slice %322 {offsets = [0, 0], sizes = [8, 32], strides = [1, 1]} : vector<8x96xf32> to vector<8x32xf32>
    %324 = vector.extract_strided_slice %322 {offsets = [0, 32], sizes = [8, 32], strides = [1, 1]} : vector<8x96xf32> to vector<8x32xf32>
    %325 = vector.extract_strided_slice %322 {offsets = [0, 64], sizes = [8, 32], strides = [1, 1]} : vector<8x96xf32> to vector<8x32xf32>
    %326 = vector.extract_strided_slice %316 {offsets = [0, 96], sizes = [8, 32], strides = [1, 1]} : vector<8x128xf32> to vector<8x32xf32>
    %327 = math.tanh %326 : vector<8x32xf32>
    %328 = arith.mulf %324, %309 : vector<8x32xf32>
    %329 = arith.mulf %323, %327 : vector<8x32xf32>
    %330 = arith.addf %328, %329 : vector<8x32xf32>
    %331 = math.tanh %330 : vector<8x32xf32>
    %332 = arith.mulf %325, %331 : vector<8x32xf32>
    %333 = arith.index_cast %c0_i32_90 : i32 to index
    %c0_95 = arith.constant 0 : index
    %c0_96 = arith.constant 0 : index
    %334 = vector.load %arg16[%333, %c0_95, %c0_96] : memref<8x8x32xf32, #tpu.memory_space<vmem>>, vector<1x8x32xf32>
    %335 = vector.shape_cast %334 : vector<1x8x32xf32> to vector<8x32xf32>
    %336 = vector.shape_cast %332 : vector<8x32xf32> to vector<1x8x32xf32>
    tpu.vector_store %arg16[%333, %c0_95, %c0_96], %336 {strides = array<i32>} : memref<8x8x32xf32, #tpu.memory_space<vmem>>, vector<1x8x32xf32>,
    %c1_i32_97 = arith.constant 1 : i32
    %337 = arith.index_cast %c1_i32_97 : i32 to index
    %c0_98 = arith.constant 0 : index
    %c0_99 = arith.constant 0 : index
    %338 = vector.load %arg15[%337, %c0_98, %c0_99] : memref<8x8x128xf32, #tpu.memory_space<vmem>>, vector<1x8x128xf32>
    %339 = vector.shape_cast %338 : vector<1x8x128xf32> to vector<8x128xf32>
    %340 = arith.truncf %332 : vector<8x32xf32> to vector<8x32xbf16>
    %cst_100 = arith.constant dense<0.000000e+00> : vector<8x128xf32>
    %341 = tpu.matmul %340, %1, %cst_100 {dimension_numbers = #tpu.dot_dimension_numbers<[1], [0], [0], [1], [0, 0, 1, 1], [], []>} : vector<8x32xbf16>, vector<32x128xbf16>, vector<8x128xf32> -> vector<8x128xf32>
    %342 = arith.addf %339, %341 : vector<8x128xf32>
    %343 = arith.addf %342, %7 : vector<8x128xf32>
    %344 = vector.extract_strided_slice %343 {offsets = [0, 0], sizes = [8, 96], strides = [1, 1]} : vector<8x128xf32> to vector<8x96xf32>
    %345 = arith.negf %344 : vector<8x96xf32>
    %346 = math.exp %345 : vector<8x96xf32>
    %cst_101 = arith.constant 1.000000e+00 : f32
    %347 = vector.broadcast %cst_101 : f32 to vector<8x96xf32>
    %348 = arith.addf %347, %346 : vector<8x96xf32>
    %349 = arith.divf %347, %348 : vector<8x96xf32>
    %350 = vector.extract_strided_slice %349 {offsets = [0, 0], sizes = [8, 32], strides = [1, 1]} : vector<8x96xf32> to vector<8x32xf32>
    %351 = vector.extract_strided_slice %349 {offsets = [0, 32], sizes = [8, 32], strides = [1, 1]} : vector<8x96xf32> to vector<8x32xf32>
    %352 = vector.extract_strided_slice %349 {offsets = [0, 64], sizes = [8, 32], strides = [1, 1]} : vector<8x96xf32> to vector<8x32xf32>
    %353 = vector.extract_strided_slice %343 {offsets = [0, 96], sizes = [8, 32], strides = [1, 1]} : vector<8x128xf32> to vector<8x32xf32>
    %354 = math.tanh %353 : vector<8x32xf32>
    %355 = arith.mulf %351, %330 : vector<8x32xf32>
    %356 = arith.mulf %350, %354 : vector<8x32xf32>
    %357 = arith.addf %355, %356 : vector<8x32xf32>
    %358 = math.tanh %357 : vector<8x32xf32>
    %359 = arith.mulf %352, %358 : vector<8x32xf32>
    %360 = arith.index_cast %c1_i32_97 : i32 to index
    %c0_102 = arith.constant 0 : index
    %c0_103 = arith.constant 0 : index
    %361 = vector.load %arg16[%360, %c0_102, %c0_103] : memref<8x8x32xf32, #tpu.memory_space<vmem>>, vector<1x8x32xf32>
    %362 = vector.shape_cast %361 : vector<1x8x32xf32> to vector<8x32xf32>
    %363 = vector.shape_cast %359 : vector<8x32xf32> to vector<1x8x32xf32>
    tpu.vector_store %arg16[%360, %c0_102, %c0_103], %363 {strides = array<i32>} : memref<8x8x32xf32, #tpu.memory_space<vmem>>, vector<1x8x32xf32>,
    %c2_i32_104 = arith.constant 2 : i32
    %364 = arith.index_cast %c2_i32_104 : i32 to index
    %c0_105 = arith.constant 0 : index
    %c0_106 = arith.constant 0 : index
    %365 = vector.load %arg15[%364, %c0_105, %c0_106] : memref<8x8x128xf32, #tpu.memory_space<vmem>>, vector<1x8x128xf32>
    %366 = vector.shape_cast %365 : vector<1x8x128xf32> to vector<8x128xf32>
    %367 = arith.truncf %359 : vector<8x32xf32> to vector<8x32xbf16>
    %cst_107 = arith.constant dense<0.000000e+00> : vector<8x128xf32>
    %368 = tpu.matmul %367, %1, %cst_107 {dimension_numbers = #tpu.dot_dimension_numbers<[1], [0], [0], [1], [0, 0, 1, 1], [], []>} : vector<8x32xbf16>, vector<32x128xbf16>, vector<8x128xf32> -> vector<8x128xf32>
    %369 = arith.addf %366, %368 : vector<8x128xf32>
    %370 = arith.addf %369, %7 : vector<8x128xf32>
    %371 = vector.extract_strided_slice %370 {offsets = [0, 0], sizes = [8, 96], strides = [1, 1]} : vector<8x128xf32> to vector<8x96xf32>
    %372 = arith.negf %371 : vector<8x96xf32>
    %373 = math.exp %372 : vector<8x96xf32>
    %cst_108 = arith.constant 1.000000e+00 : f32
    %374 = vector.broadcast %cst_108 : f32 to vector<8x96xf32>
    %375 = arith.addf %374, %373 : vector<8x96xf32>
    %376 = arith.divf %374, %375 : vector<8x96xf32>
    %377 = vector.extract_strided_slice %376 {offsets = [0, 0], sizes = [8, 32], strides = [1, 1]} : vector<8x96xf32> to vector<8x32xf32>
    %378 = vector.extract_strided_slice %376 {offsets = [0, 32], sizes = [8, 32], strides = [1, 1]} : vector<8x96xf32> to vector<8x32xf32>
    %379 = vector.extract_strided_slice %376 {offsets = [0, 64], sizes = [8, 32], strides = [1, 1]} : vector<8x96xf32> to vector<8x32xf32>
    %380 = vector.extract_strided_slice %370 {offsets = [0, 96], sizes = [8, 32], strides = [1, 1]} : vector<8x128xf32> to vector<8x32xf32>
    %381 = math.tanh %380 : vector<8x32xf32>
    %382 = arith.mulf %378, %357 : vector<8x32xf32>
    %383 = arith.mulf %377, %381 : vector<8x32xf32>
    %384 = arith.addf %382, %383 : vector<8x32xf32>
    %385 = math.tanh %384 : vector<8x32xf32>
    %386 = arith.mulf %379, %385 : vector<8x32xf32>
    %387 = arith.index_cast %c2_i32_104 : i32 to index
    %c0_109 = arith.constant 0 : index
    %c0_110 = arith.constant 0 : index
    %388 = vector.load %arg16[%387, %c0_109, %c0_110] : memref<8x8x32xf32, #tpu.memory_space<vmem>>, vector<1x8x32xf32>
    %389 = vector.shape_cast %388 : vector<1x8x32xf32> to vector<8x32xf32>
    %390 = vector.shape_cast %386 : vector<8x32xf32> to vector<1x8x32xf32>
    tpu.vector_store %arg16[%387, %c0_109, %c0_110], %390 {strides = array<i32>} : memref<8x8x32xf32, #tpu.memory_space<vmem>>, vector<1x8x32xf32>,
    %c3_i32_111 = arith.constant 3 : i32
    %391 = arith.index_cast %c3_i32_111 : i32 to index
    %c0_112 = arith.constant 0 : index
    %c0_113 = arith.constant 0 : index
    %392 = vector.load %arg15[%391, %c0_112, %c0_113] : memref<8x8x128xf32, #tpu.memory_space<vmem>>, vector<1x8x128xf32>
    %393 = vector.shape_cast %392 : vector<1x8x128xf32> to vector<8x128xf32>
    %394 = arith.truncf %386 : vector<8x32xf32> to vector<8x32xbf16>
    %cst_114 = arith.constant dense<0.000000e+00> : vector<8x128xf32>
    %395 = tpu.matmul %394, %1, %cst_114 {dimension_numbers = #tpu.dot_dimension_numbers<[1], [0], [0], [1], [0, 0, 1, 1], [], []>} : vector<8x32xbf16>, vector<32x128xbf16>, vector<8x128xf32> -> vector<8x128xf32>
    %396 = arith.addf %393, %395 : vector<8x128xf32>
    %397 = arith.addf %396, %7 : vector<8x128xf32>
    %398 = vector.extract_strided_slice %397 {offsets = [0, 0], sizes = [8, 96], strides = [1, 1]} : vector<8x128xf32> to vector<8x96xf32>
    %399 = arith.negf %398 : vector<8x96xf32>
    %400 = math.exp %399 : vector<8x96xf32>
    %cst_115 = arith.constant 1.000000e+00 : f32
    %401 = vector.broadcast %cst_115 : f32 to vector<8x96xf32>
    %402 = arith.addf %401, %400 : vector<8x96xf32>
    %403 = arith.divf %401, %402 : vector<8x96xf32>
    %404 = vector.extract_strided_slice %403 {offsets = [0, 0], sizes = [8, 32], strides = [1, 1]} : vector<8x96xf32> to vector<8x32xf32>
    %405 = vector.extract_strided_slice %403 {offsets = [0, 32], sizes = [8, 32], strides = [1, 1]} : vector<8x96xf32> to vector<8x32xf32>
    %406 = vector.extract_strided_slice %403 {offsets = [0, 64], sizes = [8, 32], strides = [1, 1]} : vector<8x96xf32> to vector<8x32xf32>
    %407 = vector.extract_strided_slice %397 {offsets = [0, 96], sizes = [8, 32], strides = [1, 1]} : vector<8x128xf32> to vector<8x32xf32>
    %408 = math.tanh %407 : vector<8x32xf32>
    %409 = arith.mulf %405, %384 : vector<8x32xf32>
    %410 = arith.mulf %404, %408 : vector<8x32xf32>
    %411 = arith.addf %409, %410 : vector<8x32xf32>
    %412 = math.tanh %411 : vector<8x32xf32>
    %413 = arith.mulf %406, %412 : vector<8x32xf32>
    %414 = arith.index_cast %c3_i32_111 : i32 to index
    %c0_116 = arith.constant 0 : index
    %c0_117 = arith.constant 0 : index
    %415 = vector.load %arg16[%414, %c0_116, %c0_117] : memref<8x8x32xf32, #tpu.memory_space<vmem>>, vector<1x8x32xf32>
    %416 = vector.shape_cast %415 : vector<1x8x32xf32> to vector<8x32xf32>
    %417 = vector.shape_cast %413 : vector<8x32xf32> to vector<1x8x32xf32>
    tpu.vector_store %arg16[%414, %c0_116, %c0_117], %417 {strides = array<i32>} : memref<8x8x32xf32, #tpu.memory_space<vmem>>, vector<1x8x32xf32>,
    %c4_i32_118 = arith.constant 4 : i32
    %418 = arith.index_cast %c4_i32_118 : i32 to index
    %c0_119 = arith.constant 0 : index
    %c0_120 = arith.constant 0 : index
    %419 = vector.load %arg15[%418, %c0_119, %c0_120] : memref<8x8x128xf32, #tpu.memory_space<vmem>>, vector<1x8x128xf32>
    %420 = vector.shape_cast %419 : vector<1x8x128xf32> to vector<8x128xf32>
    %421 = arith.truncf %413 : vector<8x32xf32> to vector<8x32xbf16>
    %cst_121 = arith.constant dense<0.000000e+00> : vector<8x128xf32>
    %422 = tpu.matmul %421, %1, %cst_121 {dimension_numbers = #tpu.dot_dimension_numbers<[1], [0], [0], [1], [0, 0, 1, 1], [], []>} : vector<8x32xbf16>, vector<32x128xbf16>, vector<8x128xf32> -> vector<8x128xf32>
    %423 = arith.addf %420, %422 : vector<8x128xf32>
    %424 = arith.addf %423, %7 : vector<8x128xf32>
    %425 = vector.extract_strided_slice %424 {offsets = [0, 0], sizes = [8, 96], strides = [1, 1]} : vector<8x128xf32> to vector<8x96xf32>
    %426 = arith.negf %425 : vector<8x96xf32>
    %427 = math.exp %426 : vector<8x96xf32>
    %cst_122 = arith.constant 1.000000e+00 : f32
    %428 = vector.broadcast %cst_122 : f32 to vector<8x96xf32>
    %429 = arith.addf %428, %427 : vector<8x96xf32>
    %430 = arith.divf %428, %429 : vector<8x96xf32>
    %431 = vector.extract_strided_slice %430 {offsets = [0, 0], sizes = [8, 32], strides = [1, 1]} : vector<8x96xf32> to vector<8x32xf32>
    %432 = vector.extract_strided_slice %430 {offsets = [0, 32], sizes = [8, 32], strides = [1, 1]} : vector<8x96xf32> to vector<8x32xf32>
    %433 = vector.extract_strided_slice %430 {offsets = [0, 64], sizes = [8, 32], strides = [1, 1]} : vector<8x96xf32> to vector<8x32xf32>
    %434 = vector.extract_strided_slice %424 {offsets = [0, 96], sizes = [8, 32], strides = [1, 1]} : vector<8x128xf32> to vector<8x32xf32>
    %435 = math.tanh %434 : vector<8x32xf32>
    %436 = arith.mulf %432, %411 : vector<8x32xf32>
    %437 = arith.mulf %431, %435 : vector<8x32xf32>
    %438 = arith.addf %436, %437 : vector<8x32xf32>
    %439 = math.tanh %438 : vector<8x32xf32>
    %440 = arith.mulf %433, %439 : vector<8x32xf32>
    %441 = arith.index_cast %c4_i32_118 : i32 to index
    %c0_123 = arith.constant 0 : index
    %c0_124 = arith.constant 0 : index
    %442 = vector.load %arg16[%441, %c0_123, %c0_124] : memref<8x8x32xf32, #tpu.memory_space<vmem>>, vector<1x8x32xf32>
    %443 = vector.shape_cast %442 : vector<1x8x32xf32> to vector<8x32xf32>
    %444 = vector.shape_cast %440 : vector<8x32xf32> to vector<1x8x32xf32>
    tpu.vector_store %arg16[%441, %c0_123, %c0_124], %444 {strides = array<i32>} : memref<8x8x32xf32, #tpu.memory_space<vmem>>, vector<1x8x32xf32>,
    %c5_i32_125 = arith.constant 5 : i32
    %445 = arith.index_cast %c5_i32_125 : i32 to index
    %c0_126 = arith.constant 0 : index
    %c0_127 = arith.constant 0 : index
    %446 = vector.load %arg15[%445, %c0_126, %c0_127] : memref<8x8x128xf32, #tpu.memory_space<vmem>>, vector<1x8x128xf32>
    %447 = vector.shape_cast %446 : vector<1x8x128xf32> to vector<8x128xf32>
    %448 = arith.truncf %440 : vector<8x32xf32> to vector<8x32xbf16>
    %cst_128 = arith.constant dense<0.000000e+00> : vector<8x128xf32>
    %449 = tpu.matmul %448, %1, %cst_128 {dimension_numbers = #tpu.dot_dimension_numbers<[1], [0], [0], [1], [0, 0, 1, 1], [], []>} : vector<8x32xbf16>, vector<32x128xbf16>, vector<8x128xf32> -> vector<8x128xf32>
    %450 = arith.addf %447, %449 : vector<8x128xf32>
    %451 = arith.addf %450, %7 : vector<8x128xf32>
    %452 = vector.extract_strided_slice %451 {offsets = [0, 0], sizes = [8, 96], strides = [1, 1]} : vector<8x128xf32> to vector<8x96xf32>
    %453 = arith.negf %452 : vector<8x96xf32>
    %454 = math.exp %453 : vector<8x96xf32>
    %cst_129 = arith.constant 1.000000e+00 : f32
    %455 = vector.broadcast %cst_129 : f32 to vector<8x96xf32>
    %456 = arith.addf %455, %454 : vector<8x96xf32>
    %457 = arith.divf %455, %456 : vector<8x96xf32>
    %458 = vector.extract_strided_slice %457 {offsets = [0, 0], sizes = [8, 32], strides = [1, 1]} : vector<8x96xf32> to vector<8x32xf32>
    %459 = vector.extract_strided_slice %457 {offsets = [0, 32], sizes = [8, 32], strides = [1, 1]} : vector<8x96xf32> to vector<8x32xf32>
    %460 = vector.extract_strided_slice %457 {offsets = [0, 64], sizes = [8, 32], strides = [1, 1]} : vector<8x96xf32> to vector<8x32xf32>
    %461 = vector.extract_strided_slice %451 {offsets = [0, 96], sizes = [8, 32], strides = [1, 1]} : vector<8x128xf32> to vector<8x32xf32>
    %462 = math.tanh %461 : vector<8x32xf32>
    %463 = arith.mulf %459, %438 : vector<8x32xf32>
    %464 = arith.mulf %458, %462 : vector<8x32xf32>
    %465 = arith.addf %463, %464 : vector<8x32xf32>
    %466 = math.tanh %465 : vector<8x32xf32>
    %467 = arith.mulf %460, %466 : vector<8x32xf32>
    %468 = arith.index_cast %c5_i32_125 : i32 to index
    %c0_130 = arith.constant 0 : index
    %c0_131 = arith.constant 0 : index
    %469 = vector.load %arg16[%468, %c0_130, %c0_131] : memref<8x8x32xf32, #tpu.memory_space<vmem>>, vector<1x8x32xf32>
    %470 = vector.shape_cast %469 : vector<1x8x32xf32> to vector<8x32xf32>
    %471 = vector.shape_cast %467 : vector<8x32xf32> to vector<1x8x32xf32>
    tpu.vector_store %arg16[%468, %c0_130, %c0_131], %471 {strides = array<i32>} : memref<8x8x32xf32, #tpu.memory_space<vmem>>, vector<1x8x32xf32>,
    %c6_i32_132 = arith.constant 6 : i32
    %472 = arith.index_cast %c6_i32_132 : i32 to index
    %c0_133 = arith.constant 0 : index
    %c0_134 = arith.constant 0 : index
    %473 = vector.load %arg15[%472, %c0_133, %c0_134] : memref<8x8x128xf32, #tpu.memory_space<vmem>>, vector<1x8x128xf32>
    %474 = vector.shape_cast %473 : vector<1x8x128xf32> to vector<8x128xf32>
    %475 = arith.truncf %467 : vector<8x32xf32> to vector<8x32xbf16>
    %cst_135 = arith.constant dense<0.000000e+00> : vector<8x128xf32>
    %476 = tpu.matmul %475, %1, %cst_135 {dimension_numbers = #tpu.dot_dimension_numbers<[1], [0], [0], [1], [0, 0, 1, 1], [], []>} : vector<8x32xbf16>, vector<32x128xbf16>, vector<8x128xf32> -> vector<8x128xf32>
    %477 = arith.addf %474, %476 : vector<8x128xf32>
    %478 = arith.addf %477, %7 : vector<8x128xf32>
    %479 = vector.extract_strided_slice %478 {offsets = [0, 0], sizes = [8, 96], strides = [1, 1]} : vector<8x128xf32> to vector<8x96xf32>
    %480 = arith.negf %479 : vector<8x96xf32>
    %481 = math.exp %480 : vector<8x96xf32>
    %cst_136 = arith.constant 1.000000e+00 : f32
    %482 = vector.broadcast %cst_136 : f32 to vector<8x96xf32>
    %483 = arith.addf %482, %481 : vector<8x96xf32>
    %484 = arith.divf %482, %483 : vector<8x96xf32>
    %485 = vector.extract_strided_slice %484 {offsets = [0, 0], sizes = [8, 32], strides = [1, 1]} : vector<8x96xf32> to vector<8x32xf32>
    %486 = vector.extract_strided_slice %484 {offsets = [0, 32], sizes = [8, 32], strides = [1, 1]} : vector<8x96xf32> to vector<8x32xf32>
    %487 = vector.extract_strided_slice %484 {offsets = [0, 64], sizes = [8, 32], strides = [1, 1]} : vector<8x96xf32> to vector<8x32xf32>
    %488 = vector.extract_strided_slice %478 {offsets = [0, 96], sizes = [8, 32], strides = [1, 1]} : vector<8x128xf32> to vector<8x32xf32>
    %489 = math.tanh %488 : vector<8x32xf32>
    %490 = arith.mulf %486, %465 : vector<8x32xf32>
    %491 = arith.mulf %485, %489 : vector<8x32xf32>
    %492 = arith.addf %490, %491 : vector<8x32xf32>
    %493 = math.tanh %492 : vector<8x32xf32>
    %494 = arith.mulf %487, %493 : vector<8x32xf32>
    %495 = arith.index_cast %c6_i32_132 : i32 to index
    %c0_137 = arith.constant 0 : index
    %c0_138 = arith.constant 0 : index
    %496 = vector.load %arg16[%495, %c0_137, %c0_138] : memref<8x8x32xf32, #tpu.memory_space<vmem>>, vector<1x8x32xf32>
    %497 = vector.shape_cast %496 : vector<1x8x32xf32> to vector<8x32xf32>
    %498 = vector.shape_cast %494 : vector<8x32xf32> to vector<1x8x32xf32>
    tpu.vector_store %arg16[%495, %c0_137, %c0_138], %498 {strides = array<i32>} : memref<8x8x32xf32, #tpu.memory_space<vmem>>, vector<1x8x32xf32>,
    %c7_i32_139 = arith.constant 7 : i32
    %499 = arith.index_cast %c7_i32_139 : i32 to index
    %c0_140 = arith.constant 0 : index
    %c0_141 = arith.constant 0 : index
    %500 = vector.load %arg15[%499, %c0_140, %c0_141] : memref<8x8x128xf32, #tpu.memory_space<vmem>>, vector<1x8x128xf32>
    %501 = vector.shape_cast %500 : vector<1x8x128xf32> to vector<8x128xf32>
    %502 = arith.truncf %494 : vector<8x32xf32> to vector<8x32xbf16>
    %cst_142 = arith.constant dense<0.000000e+00> : vector<8x128xf32>
    %503 = tpu.matmul %502, %1, %cst_142 {dimension_numbers = #tpu.dot_dimension_numbers<[1], [0], [0], [1], [0, 0, 1, 1], [], []>} : vector<8x32xbf16>, vector<32x128xbf16>, vector<8x128xf32> -> vector<8x128xf32>
    %504 = arith.addf %501, %503 : vector<8x128xf32>
    %505 = arith.addf %504, %7 : vector<8x128xf32>
    %506 = vector.extract_strided_slice %505 {offsets = [0, 0], sizes = [8, 96], strides = [1, 1]} : vector<8x128xf32> to vector<8x96xf32>
    %507 = arith.negf %506 : vector<8x96xf32>
    %508 = math.exp %507 : vector<8x96xf32>
    %cst_143 = arith.constant 1.000000e+00 : f32
    %509 = vector.broadcast %cst_143 : f32 to vector<8x96xf32>
    %510 = arith.addf %509, %508 : vector<8x96xf32>
    %511 = arith.divf %509, %510 : vector<8x96xf32>
    %512 = vector.extract_strided_slice %511 {offsets = [0, 0], sizes = [8, 32], strides = [1, 1]} : vector<8x96xf32> to vector<8x32xf32>
    %513 = vector.extract_strided_slice %511 {offsets = [0, 32], sizes = [8, 32], strides = [1, 1]} : vector<8x96xf32> to vector<8x32xf32>
    %514 = vector.extract_strided_slice %511 {offsets = [0, 64], sizes = [8, 32], strides = [1, 1]} : vector<8x96xf32> to vector<8x32xf32>
    %515 = vector.extract_strided_slice %505 {offsets = [0, 96], sizes = [8, 32], strides = [1, 1]} : vector<8x128xf32> to vector<8x32xf32>
    %516 = math.tanh %515 : vector<8x32xf32>
    %517 = arith.mulf %513, %492 : vector<8x32xf32>
    %518 = arith.mulf %512, %516 : vector<8x32xf32>
    %519 = arith.addf %517, %518 : vector<8x32xf32>
    %520 = math.tanh %519 : vector<8x32xf32>
    %521 = arith.mulf %514, %520 : vector<8x32xf32>
    %522 = arith.index_cast %c7_i32_139 : i32 to index
    %c0_144 = arith.constant 0 : index
    %c0_145 = arith.constant 0 : index
    %523 = vector.load %arg16[%522, %c0_144, %c0_145] : memref<8x8x32xf32, #tpu.memory_space<vmem>>, vector<1x8x32xf32>
    %524 = vector.shape_cast %523 : vector<1x8x32xf32> to vector<8x32xf32>
    %525 = vector.shape_cast %521 : vector<8x32xf32> to vector<1x8x32xf32>
    tpu.vector_store %arg16[%522, %c0_144, %c0_145], %525 {strides = array<i32>} : memref<8x8x32xf32, #tpu.memory_space<vmem>>, vector<1x8x32xf32>,
    %c8_i32_146 = arith.constant 8 : i32
    %c0_147 = arith.constant 0 : index
    %c0_148 = arith.constant 0 : index
    %c0_149 = arith.constant 0 : index
    %526 = vector.load %arg16[%c0_147, %c0_148, %c0_149] : memref<8x8x32xf32, #tpu.memory_space<vmem>>, vector<8x8x32xf32>
    %527 = vector.shape_cast %526 : vector<8x8x32xf32> to vector<64x32xf32>
    %528 = arith.truncf %527 : vector<64x32xf32> to vector<64x32xbf16>
    %c0_150 = arith.constant 0 : index
    %c0_151 = arith.constant 0 : index
    %529 = vector.load %arg10[%c0_150, %c0_151] : memref<32x128xbf16, #tpu.memory_space<vmem>>, vector<32x128xbf16>
    %cst_152 = arith.constant dense<0.000000e+00> : vector<64x128xf32>
    %530 = tpu.matmul %528, %529, %cst_152 {dimension_numbers = #tpu.dot_dimension_numbers<[1], [0], [0], [1], [0, 0, 1, 1], [], []>} : vector<64x32xbf16>, vector<32x128xbf16>, vector<64x128xf32> -> vector<64x128xf32>
    %c0_153 = arith.constant 0 : index
    %c0_154 = arith.constant 0 : index
    %531 = vector.load %arg11[%c0_153, %c0_154] : memref<1x128xf32, #tpu.memory_space<vmem>>, vector<1x128xf32>
    %532 = vector.shape_cast %531 : vector<1x128xf32> to vector<1x128xf32>
    %533 = vector.broadcast %532 : vector<1x128xf32> to vector<64x128xf32>
    %534 = arith.addf %530, %533 : vector<64x128xf32>
    %cst_155 = arith.constant dense<0xFF800000> : vector<64xf32>
    %535 = vector.multi_reduction <maximumf>, %534, %cst_155 [1] : vector<64x128xf32> to vector<64xf32>
    %536 = vector.shape_cast %535 : vector<64xf32> to vector<64x1xf32>
    %537 = vector.broadcast %536 : vector<64x1xf32> to vector<64x128xf32>
    %538 = arith.subf %534, %537 : vector<64x128xf32>
    %539 = math.exp %538 : vector<64x128xf32>
    %cst_156 = arith.constant dense<0.000000e+00> : vector<64xf32>
    %540 = vector.multi_reduction <add>, %539, %cst_156 [1] : vector<64x128xf32> to vector<64xf32>
    %541 = vector.shape_cast %540 : vector<64xf32> to vector<64x1xf32>
    %542 = math.log %541 : vector<64x1xf32>
    %543 = vector.broadcast %542 : vector<64x1xf32> to vector<64x128xf32>
    %544 = arith.subf %538, %543 : vector<64x128xf32>
    %545 = vector.shape_cast %544 : vector<64x128xf32> to vector<8x8x128xf32>
    %c0_157 = arith.constant 0 : index
    %c0_158 = arith.constant 0 : index
    %c0_159 = arith.constant 0 : index
    %546 = vector.load %arg12[%c0_157, %c0_158, %c0_159] : memref<8x8x128xf32, #tpu.memory_space<vmem>>, vector<8x8x128xf32>
    tpu.vector_store %arg12[%c0_157, %c0_158, %c0_159], %545 {strides = array<i32>} : memref<8x8x128xf32, #tpu.memory_space<vmem>>, vector<8x8x128xf32>,
    %547 = tpu.iota {dimensions = array<i32: 1>} : vector<64x128xi32>
    %548 = vector.broadcast %536 : vector<64x1xf32> to vector<64x128xf32>
    %549 = arith.cmpf oeq, %534, %548 : vector<64x128xf32>
    %c128_i32 = arith.constant 128 : i32
    %550 = vector.broadcast %c128_i32 : i32 to vector<64x128xi32>
    %551 = arith.select %549, %547, %550 : vector<64x128xi1>, vector<64x128xi32>
    %cst_160 = arith.constant dense<2147483647> : vector<64xi32>
    %552 = vector.multi_reduction <minsi>, %551, %cst_160 [1] : vector<64x128xi32> to vector<64xi32>
    %553 = vector.shape_cast %552 : vector<64xi32> to vector<64x1xi32>
    %554 = vector.shape_cast %553 : vector<64x1xi32> to vector<8x8x1xi32>
    %c0_161 = arith.constant 0 : index
    %c0_162 = arith.constant 0 : index
    %c0_163 = arith.constant 0 : index
    %555 = vector.load %arg13[%c0_161, %c0_162, %c0_163] : memref<8x8x1xi32, #tpu.memory_space<vmem>>, vector<8x8x1xi32>
    tpu.vector_store %arg13[%c0_161, %c0_162, %c0_163], %554 {strides = array<i32>} : memref<8x8x1xi32, #tpu.memory_space<vmem>>, vector<8x8x1xi32>,
    return
  }
  func.func @transform_0(%arg0: i32) -> (i32, i32, i32) {
    %c0_i32 = arith.constant 0 : i32
    %c0_i32_0 = arith.constant 0 : i32
    %c0_i32_1 = arith.constant 0 : i32
    return %c0_i32, %arg0, %c0_i32_0 : i32, i32, i32
  }
  func.func @transform_1(%arg0: i32) -> (i32, i32, i32) {
    %c0_i32 = arith.constant 0 : i32
    %c0_i32_0 = arith.constant 0 : i32
    %c0_i32_1 = arith.constant 0 : i32
    return %c0_i32, %arg0, %c0_i32_0 : i32, i32, i32
  }
  func.func @transform_2(%arg0: i32) -> (i32, i32, i32) {
    %c0_i32 = arith.constant 0 : i32
    %c0_i32_0 = arith.constant 0 : i32
    %c0_i32_1 = arith.constant 0 : i32
    return %c0_i32, %arg0, %c0_i32_0 : i32, i32, i32
  }
  func.func @transform_3(%arg0: i32) -> (i32, i32) {
    %c0_i32 = arith.constant 0 : i32
    %c0_i32_0 = arith.constant 0 : i32
    %c0_i32_1 = arith.constant 0 : i32
    return %c0_i32, %c0_i32_0 : i32, i32
  }
  func.func @transform_4(%arg0: i32) -> (i32, i32) {
    %c0_i32 = arith.constant 0 : i32
    %c0_i32_0 = arith.constant 0 : i32
    %c0_i32_1 = arith.constant 0 : i32
    return %c0_i32, %c0_i32_0 : i32, i32
  }
  func.func @transform_5(%arg0: i32) -> (i32, i32) {
    %c0_i32 = arith.constant 0 : i32
    %c0_i32_0 = arith.constant 0 : i32
    %c0_i32_1 = arith.constant 0 : i32
    return %c0_i32, %c0_i32_0 : i32, i32
  }
  func.func @transform_6(%arg0: i32) -> (i32, i32) {
    %c0_i32 = arith.constant 0 : i32
    %c0_i32_0 = arith.constant 0 : i32
    %c0_i32_1 = arith.constant 0 : i32
    return %c0_i32, %c0_i32_0 : i32, i32
  }
  func.func @transform_7(%arg0: i32) -> (i32, i32) {
    %c0_i32 = arith.constant 0 : i32
    %c0_i32_0 = arith.constant 0 : i32
    %c0_i32_1 = arith.constant 0 : i32
    return %c0_i32, %c0_i32_0 : i32, i32
  }
  func.func @transform_8(%arg0: i32) -> (i32, i32) {
    %c0_i32 = arith.constant 0 : i32
    %c0_i32_0 = arith.constant 0 : i32
    %c0_i32_1 = arith.constant 0 : i32
    return %c0_i32, %c0_i32_0 : i32, i32
  }
  func.func @transform_9(%arg0: i32) -> (i32, i32) {
    %c0_i32 = arith.constant 0 : i32
    %c0_i32_0 = arith.constant 0 : i32
    %c0_i32_1 = arith.constant 0 : i32
    return %c0_i32, %c0_i32_0 : i32, i32
  }
  func.func @transform_10(%arg0: i32) -> (i32, i32) {
    %c0_i32 = arith.constant 0 : i32
    %c0_i32_0 = arith.constant 0 : i32
    %c0_i32_1 = arith.constant 0 : i32
    return %c0_i32, %c0_i32_0 : i32, i32
  }
  func.func @transform_11(%arg0: i32) -> (i32, i32, i32) {
    %c0_i32 = arith.constant 0 : i32
    %c0_i32_0 = arith.constant 0 : i32
    %c0_i32_1 = arith.constant 0 : i32
    return %c0_i32, %arg0, %c0_i32_0 : i32, i32, i32
  }
  func.func @transform_12(%arg0: i32) -> (i32, i32, i32) {
    %c0_i32 = arith.constant 0 : i32
    %c0_i32_0 = arith.constant 0 : i32
    %c0_i32_1 = arith.constant 0 : i32
    return %c0_i32, %arg0, %c0_i32_0 : i32, i32, i32
  }
}

</mosaic_0001>

<bundles_post_ra>
// kernel: rnnlm_vae_forward.1
= control target key start
LH: loop header
LB: loop body
LE: loop exit
PB: predicated region body
PF: predicated region fallthrough
CT: control target
= control target key end

     0   :  { %s4254_s0 = inlined_call_operand.vmem [shape: bf16[8,16,32], index: 0, kind: input, shape index: {}]   ;;  %s4255_s1 = inlined_call_operand.vmem [shape: f32[8,16,1], index: 1, kind: input, shape index: {}]   ;;  %s4256_s2 = inlined_call_operand.vmem [shape: bf16[8,16,32], index: 2, kind: input, shape index: {}]   ;;  %s4257_s3 = inlined_call_operand.vmem [shape: bf16[32,128], index: 3, kind: input, shape index: {}]   ;;  %s4258_s4 = inlined_call_operand.vmem [shape: bf16[32,128], index: 4, kind: input, shape index: {}]   ;;  %s4259_s5 = inlined_call_operand.vmem [shape: f32[1,128], index: 5, kind: input, shape index: {}]   ;;  %s4260_s6 = inlined_call_operand.vmem [shape: bf16[32,128], index: 6, kind: input, shape index: {}]   ;;  %s4261_s7 = inlined_call_operand.vmem [shape: bf16[32,128], index: 7, kind: input, shape index: {}]   ;;  %s4262_s8 = inlined_call_operand.vmem [shape: f32[1,128], index: 8, kind: input, shape index: {}]   ;;  %s4263_s9 = inlined_call_operand.vmem [shape: bf16[32,128], index: 9, kind: input, shape index: {}]   ;;  %s4264_s10 = inlined_call_operand.vmem [shape: f32[1,128], index: 10, kind: input, shape index: {}]   ;;  %s4265_s11 = inlined_call_operand.hbm [shape: f32[8,16,128], index: 11, kind: output, shape index: {0}]   ;;  %s4266_s12 = inlined_call_operand.vmem [shape: s32[8,16,1], index: 12, kind: output, shape index: {1}]  }
   0x1   :  { %4267 = sst [smem:[#allocation12_spill]] %s4254_s0 }
   0x2   :  { %4268 = sst [smem:[#allocation13_spill]] %s4255_s1 }
   0x3   :  { %4269 = sst [smem:[#allocation14_spill]] %s4256_s2 }
   0x4   :  { %4270 = sst [smem:[#allocation15_spill]] %s4257_s3 }
   0x5   :  { %18 = vsyncpa [#allocation9], 0 }
   0x6   :  { %20 = vsyncpa [#allocation9 + $0x1], 0  ;;  %s3529_s21 = smov 0   ;;  %s3531_s22 = smov 0  }
   0x7   :  { %s3533_s23 = smov 0   ;;  %s3535_s24 = smov 0  }
   0x8 LB: > { %s3550_s25 = sadd.s32 4294967295, %s3453_s24   ;;  %s2838_s26 = sadd.s32 4294967294, %s3453_s24   ;;  %s3453_s24 = sphi %s3535_s24, %s4282_s24   ;;  %s3449_s23 = sphi %s3533_s23, %s4281_s23   ;;  %s3445_s22 = sphi %s3531_s22, %s4280_s22   ;;  %s3441_s21 = sphi %s3529_s21, %s4279_s21  }
   0x9   : > { %s3554_s27 = sadd.s32 1, %s3453_s24   ;;  %s33_s28 = sadd.s32 1, %s3449_s23 }
   0xa   : > { %s30_s29 = ssub.s32 %s3453_s24, %s3554_s27  ;;  %p40_p0 = scmp.ne.s32.totalorder %s3449_s23, %s3445_s22 }
   0xb   : > { %p31_p1 = scmp.eq.s32.totalorder %s30_s29, 0  ;;  %p41_p2 = scmp.eq.s32.totalorder %s3453_s24, 0 }
   0xc   : > { %p290_p3 = scmp.eq.s32.totalorder %s3550_s25, 1  ;;  %p295_p4 = scmp.ne.s32.totalorder %s3445_s22, %s3441_s21 }
   0xd   : > { %s3566_s30 = scalar_select %p31_p1, %s3449_s23, %s33_s28  }
   0xe   : > { %p3568_p5 = por %p41_p2, %p40_p0  ;;  %p3572_p6 = por %p290_p3, %p40_p0 }
   0xf   : > { %p296_p7 = scmp.eq.s32.totalorder %s2838_s26, 1  ;;  %p2840_p9 = scmp.ge.s32.totalorder %s3453_s24, 2 }
  0x11   : > { %p3576_p8 = por %p296_p7, %p295_p4  ;;  %362 = sbr.rel (%p2840_p9) target bundleno = 68 (0x44), region = 48 }
  0x18   : > { %365 = sbr.rel (!%p3568_p5) target bundleno = 39 (0x27), region = 52  ;;  %s367_s16 = sand.u32 (%p3568_p5), 1, %s3449_s23  }
  0x19   : > { %s2842_s17 = sshll.u32 (%p3568_p5), %s3453_s24, 2  ;;  %s2841_s18 = sshll.u32 (%p3568_p5), %s367_s16, 5 }
  0x1a   : > { %s4274_s0 = sld [smem:[#allocation12_spill]] (%p3568_p5)  ;;  %s369_s28 = scalar_lea.vmem (%p3568_p5), [#allocation5], %s2841_s18 }
  0x20   : > { %s371_s26 = scalar_lea.vmem %s4274_s0, %s2842_s17 }
  0x21   : > { %v387_v0 = vld [vmem:[%s371_s26] sm:$0xf]  ;;  %v389_v1 = vld [vmem:[%s371_s26 + $0x8] sm:$0xf]  ;;  %v391_v2 = vld [vmem:[%s371_s26 + $0x10] sm:$0xf] }
  0x22   : > { %388 = vst [vmem:[%s369_s28] sm:$0xf] %v387_v0  ;;  %390 = vst [vmem:[%s369_s28 + $0x4] sm:$0xf] %v389_v1  ;;  %v393_v3 = vld [vmem:[%s371_s26 + $0x18] sm:$0xf] }
  0x23   : > { %v395_v4 = vld [vmem:[%s371_s26 + $0x20] sm:$0xf]  ;;  %392 = vst [vmem:[%s369_s28 + $0x8] sm:$0xf] %v391_v2  ;;  %394 = vst [vmem:[%s369_s28 + $0xc] sm:$0xf] %v393_v3 }
  0x24   : > { %396 = vst [vmem:[%s369_s28 + $0x10] sm:$0xf] %v395_v4  ;;  %v397_v5 = vld [vmem:[%s371_s26 + $0x28] sm:$0xf]  ;;  %v399_v6 = vld [vmem:[%s371_s26 + $0x30] sm:$0xf] }
  0x25   : > { %v401_v7 = vld [vmem:[%s371_s26 + $0x38] sm:$0xf]  ;;  %398 = vst [vmem:[%s369_s28 + $0x14] sm:$0xf] %v397_v5  ;;  %400 = vst [vmem:[%s369_s28 + $0x18] sm:$0xf] %v399_v6 }
  0x26   : > { %402 = vst [vmem:[%s369_s28 + $0x1c] sm:$0xf] %v401_v7 }
  0x27 PF: > { %441 = sbr.rel (!%p3568_p5) target bundleno = 53 (0x35), region = 93  ;;  %s443_s29 = sand.u32 (%p3568_p5), 1, %s3449_s23  }
  0x28   : > { %s2844_s16 = sshll.u32 (%p3568_p5), %s3453_s24, 3  ;;  %s2843_s17 = sshll.u32 (%p3568_p5), %s443_s29, 6 }
  0x29   : > { %s4275_s1 = sld [smem:[#allocation13_spill]] (%p3568_p5)  ;;  %s445_s26 = scalar_lea.vmem (%p3568_p5), [#allocation6], %s2843_s17 }
  0x2f   : > { %s447_s20 = scalar_lea.vmem %s4275_s1, %s2844_s16 }
  0x30   : > { %v489_v8 = vld [vmem:[%s447_s20] sm:$0xff]  ;;  %v491_v9 = vld [vmem:[%s447_s20 + $0x10] sm:$0xff] }
  0x31   : > { %v493_v10 = vld [vmem:[%s447_s20 + $0x20] sm:$0xff]  ;;  %490 = vst [vmem:[%s445_s26] sm:$0xff] %v489_v8  ;;  %492 = vst [vmem:[%s445_s26 + $0x8] sm:$0xff] %v491_v9  ;;  %v495_v11 = vld [vmem:[%s447_s20 + $0x30] sm:$0xff] }
  0x32   : > { %494 = vst [vmem:[%s445_s26 + $0x10] sm:$0xff] %v493_v10  ;;  %v497_v12 = vld [vmem:[%s447_s20 + $0x40] sm:$0xff]  ;;  %v499_v13 = vld [vmem:[%s447_s20 + $0x50] sm:$0xff]  ;;  %496 = vst [vmem:[%s445_s26 + $0x18] sm:$0xff] %v495_v11 }
  0x33   : > { %498 = vst [vmem:[%s445_s26 + $0x20] sm:$0xff] %v497_v12  ;;  %500 = vst [vmem:[%s445_s26 + $0x28] sm:$0xff] %v499_v13  ;;  %v501_v14 = vld [vmem:[%s447_s20 + $0x60] sm:$0xff]  ;;  %v503_v15 = vld [vmem:[%s447_s20 + $0x70] sm:$0xff] }
  0x34   : > { %502 = vst [vmem:[%s445_s26 + $0x30] sm:$0xff] %v501_v14  ;;  %504 = vst [vmem:[%s445_s26 + $0x38] sm:$0xff] %v503_v15 }
  0x35 PF: > { %510 = sbr.rel (!%p3568_p5) target bundleno = 68 (0x44), region = 131  ;;  %s512_s28 = sand.u32 (%p3568_p5), 1, %s3449_s23  }
  0x36   : > { %s2846_s29 = sshll.u32 (%p3568_p5), %s3453_s24, 2  ;;  %s2845_s16 = sshll.u32 (%p3568_p5), %s512_s28, 5 }
  0x37   : > { %s4276_s2 = sld [smem:[#allocation14_spill]] (%p3568_p5)  ;;  %s514_s0 = scalar_lea.vmem (%p3568_p5), [#allocation7], %s2845_s16 }
  0x3d   : > { %s516_s19 = scalar_lea.vmem %s4276_s2, %s2846_s29 }
  0x3e   : > { %v532_v16 = vld [vmem:[%s516_s19] sm:$0xf]  ;;  %v534_v17 = vld [vmem:[%s516_s19 + $0x8] sm:$0xf]  ;;  %v536_v18 = vld [vmem:[%s516_s19 + $0x10] sm:$0xf] }
  0x3f   : > { %533 = vst [vmem:[%s514_s0] sm:$0xf] %v532_v16  ;;  %535 = vst [vmem:[%s514_s0 + $0x4] sm:$0xf] %v534_v17  ;;  %v538_v19 = vld [vmem:[%s516_s19 + $0x18] sm:$0xf] }
  0x40   : > { %v540_v20 = vld [vmem:[%s516_s19 + $0x20] sm:$0xf]  ;;  %537 = vst [vmem:[%s514_s0 + $0x8] sm:$0xf] %v536_v18  ;;  %539 = vst [vmem:[%s514_s0 + $0xc] sm:$0xf] %v538_v19 }
  0x41   : > { %541 = vst [vmem:[%s514_s0 + $0x10] sm:$0xf] %v540_v20  ;;  %v542_v21 = vld [vmem:[%s516_s19 + $0x28] sm:$0xf]  ;;  %v544_v22 = vld [vmem:[%s516_s19 + $0x30] sm:$0xf] }
  0x42   : > { %v546_v23 = vld [vmem:[%s516_s19 + $0x38] sm:$0xf]  ;;  %543 = vst [vmem:[%s514_s0 + $0x14] sm:$0xf] %v542_v21  ;;  %545 = vst [vmem:[%s514_s0 + $0x18] sm:$0xf] %v544_v22 }
  0x43   : > { %547 = vst [vmem:[%s514_s0 + $0x1c] sm:$0xf] %v546_v23 }
  0x44 PF: > { %p2847_p10 = scmp.ge.s32.totalorder %s3453_s24, 1  ;;  %p585_p11 = scmp.lt.s32.totalorder %s3453_s24, 3 }
  0x46   : > { %p586_p12 = pnand %p2847_p10, %p585_p11 }
  0x47   : > { %s4277_s3 = sld [smem:[#allocation15_spill]] (!%p586_p12)  ;;  %s3610_s26 = sand.u32 (!%p586_p12), 1, %s3445_s22   ;;  %vm726_vm0 = vcmask (!%p586_p12), 261120   ;;  %v3624_v28 = vld [vmem:[%s4258_s4] sm:$0xff] (!%p586_p12)   ;;  %v3455_v29 = vmov (!%p586_p12), 0   ;;  %v3456_v30 = vmov (!%p586_p12), 0.0  }
  0x48   : > { %589 = sbr.rel (%p586_p12) target bundleno = 12074 (0x2f2a), region = 172  ;;  %s2848_s0 = sshll.u32 (!%p586_p12), %s3610_s26, 5  ;;  %3211 = vset.pattern.permute.xlu1 (!%p586_p12), %v3455_v29  ;;  %3212 = vset.pattern.permute.xlu0 (!%p586_p12), %v3455_v29  ;;  %v3632_v31 = vld [vmem:[%s4258_s4 + $0x8] sm:$0xff] (!%p586_p12)   ;;  %vm3457_vm1 = vmmov (!%p586_p12), 0   ;;  %v3667_v38 = vld [vmem:[%s4259_s5] ss:$0 sm:$0xff] (!%p586_p12) }
  0x49   : > { %s3616_s16 = scalar_lea.vmem (!%p586_p12), [#allocation5], %s2848_s0  ;;  %s3634_s20 = scalar_lea.vmem (!%p586_p12), [#allocation7], %s2848_s0  ;;  %v3221_v57 = vld [vmem:[%s4260_s6] sm:$0xff] (!%p586_p12)   ;;  %v3222_v58 = vld [vmem:[%s4260_s6 + $0x8] sm:$0xff] (!%p586_p12)  }
  0x4a   : > { %v3215_v26 = vld [vmem:[%s3616_s16] sm:$0xff] (!%p586_p12)   ;;  %v3216_v27 = vld [vmem:[%s3616_s16 + $0x8] sm:$0xff] (!%p586_p12)   ;;  %s3651_s28 = sshll.u32 (!%p586_p12), %s3610_s26, 6  ;;  %s3458_s18 = smov (!%p586_p12), 32   ;;  %v3219_v55 = vld [vmem:[%s3616_s16 + $0x10] sm:$0xff] (!%p586_p12)  }
  0x4b   : > { %3000 = vmatprep.mubr.msk.bf16.mxu0 (!%p586_p12), %vm726_vm0, %v3215_v26  ;;  %s3654_s29 = scalar_lea.vmem (!%p586_p12), [#allocation6], %s3651_s28  ;;  %v3220_v56 = vld [vmem:[%s3616_s16 + $0x18] sm:$0xff] (!%p586_p12)   ;;  %v3223_v59 = vld [vmem:[%s3634_s20] sm:$0xff] (!%p586_p12)   ;;  %3004 = vmatprep.mubr.msk.bf16.mxu1 (!%p586_p12), %vm726_vm0, %v3219_v55  ;;  %v3224_v61 = vld [vmem:[%s3634_s20 + $0x8] sm:$0xff] (!%p586_p12)   ;;  %s3459_s16 = smov (!%p586_p12), 64  }
  0x4c   : > { %v941_v32 = vld [vmem:[%s3654_s29] sm:$0xff] (!%p586_p12)  ;;  %v3225_v62 = vld [vmem:[%s3634_s20 + $0x10] sm:$0xff] (!%p586_p12)   ;;  %v3226_v63 = vld [vmem:[%s3634_s20 + $0x18] sm:$0xff] (!%p586_p12)   ;;  %s4145_s0 = scalar_lea.vmem (!%p586_p12), [#allocation8], %s3651_s28  ;;  %s4157_s17 = scalar_lea.vmem (!%p586_p12), [#allocation10], %s3651_s28 }
  0x4d   : > { %v3213_v24 = vld [vmem:[%s4277_s3] sm:$0xff] (!%p586_p12)   ;;  %v3214_v25 = vld [vmem:[%s4277_s3 + $0x8] sm:$0xff] (!%p586_p12)   ;;  %vm1024_vm2 = vcmp.gt.f32.partialorder (!%p586_p12), %v941_v32, 0.0  ;;  %s2641_s28 = sshll.u32 (!%p586_p12), %s4145_s0, 4  ;;  %s2926_s20 = sshll.u32 (!%p586_p12), %s3550_s25, 7  ;;  %s4174_s28 = int_to_ptr.vmem [resolvable:$true] %s2641_s28 }
  0x4e   : > { %2996 = vmatprep.subr.bf16.mxu0 (!%p586_p12), %v3213_v24  ;;  %3160 = vmatprep.subr.bf16.mxu1 (!%p586_p12), %v3213_v24  ;;  %v1025_v33 = vsel (!%p586_p12), %vm1024_vm2, 1, %v3455_v29  ;;  %s4181_s13 = scalar_lea.hbm (!%p586_p12), %s4265_s11, %s2926_s20  ;;  %s3460_s1 = smov (!%p586_p12), [#allocation8]  }
  0x4f   : > { %2997 = vmatpush3.bf16.msra.mxu0 %v3213_v24  ;;  %3162 = vmatpush3.bf16.msra.mxu1 %v3213_v24  ;;  %v2878_v24 = vld [vmem:[%s3654_s29 + $0x8] sm:$0xff]  ;;  %s3395_s2 = sshll.u32 %s3460_s1, 4  ;;  %s3396_s2 = int_to_ptr.vmem [resolvable:$false] %s3395_s2 }
  0x50   : > { %2998 = vmatprep.subr.bf16.mxu0 %v3214_v25  ;;  %3161 = vmatprep.subr.bf16.mxu1 %v3214_v25  ;;  %vm1109_vm4 = vcmp.gt.f32.partialorder %v2878_v24, 0.0  ;;  %s3397_s3 = scalar_lea.vmem %s3396_s2, 2048  ;;  %p3398_p2 = scmp.lt.s32.totalorder %s4174_s28, %s3396_s2 }
  0x51   : > { %1027 = vperm.xlu1 %3211, %v1025_v33   ;;  %v1110_v26 = vsel %vm1109_vm4, 1, %v3455_v29 }
  0x53   : > { %2999 = vmatpush3.bf16.msra.mxu0 %v3214_v25  ;;  %3163 = vmatpush3.bf16.msra.mxu1 %v3214_v25 }
  0x54   : > { %3020 = vmatprep.subr.bf16.mxu0 %v3456_v30  ;;  %3008 = vmatprep.subr.bf16.mxu1 %v3221_v57 }
  0x56   : > { %3001 = vmatmul.mubr.msk.bf16.vlgmr.msra.gmra.mrb[0].mxu0 %vm726_vm0, %v3216_v27  ;;  %3005 = vmatmul.mubr.msk.bf16.vlgmr.msra.gmra.mrb[0].mxu1 %vm726_vm0, %v3220_v56 }
  0x57   : > { %3021 = vmatpush3.bf16.msra.mxu0 %v3624_v28  ;;  %3024 = vmatprep.mubr.msk.bf16.mxu0 %vm3457_vm1, %v3456_v30 }
  0x58   : > { %3022 = vmatprep.subr.bf16.mxu0 %v3456_v30  ;;  %3009 = vmatpush3.bf16.msra.mxu1 %v3221_v57  ;;  %v2881_v57 = vld [vmem:[%s3654_s29 + $0x10] sm:$0xff] }
  0x59   : > { %3012 = vmatprep.mubr.msk.bf16.mxu1 %vm726_vm0, %v3223_v59  ;;  %3010 = vmatprep.subr.bf16.mxu1 %v3222_v58  ;;  %vm1194_vm6 = vcmp.gt.f32.partialorder %v2881_v57, 0.0 }
  0x5a   : > { %v1195_v59 = vsel %vm1194_vm6, 1, %v3455_v29 }
  0x5b   : > { %3023 = vmatpush3.bf16.msra.mxu0 %v3632_v31 }
  0x5c   : > { %3036 = vmatprep.subr.bf16.mxu0 %v3456_v30  ;;  %3011 = vmatpush3.bf16.msra.mxu1 %v3222_v58 }
  0x5d   : > { %3028 = vmatprep.subr.bf16.mxu1 %v3456_v30 }
  0x5e   : > { %3025 = vmatmul.mubr.bf16.vlgmr.msra.gmra.mrb[4].mxu0 %v3455_v29 }
  0x5f   : > { %3037 = vmatpush3.bf16.msra.mxu0 %v3624_v28  ;;  %3040 = vmatprep.mubr.msk.bf16.mxu0 %vm3457_vm1, %v3456_v30 }
  0x60   : > { %3038 = vmatprep.subr.bf16.mxu0 %v3456_v30  ;;  %3013 = vmatmul.mubr.msk.bf16.vlgmr.msra.gmra.mrb[4].mxu1 %vm726_vm0, %v3224_v61 }
  0x61   : > { %3029 = vmatpush3.bf16.msra.mxu1 %v3624_v28  ;;  %3016 = vmatprep.mubr.msk.bf16.mxu1 %vm726_vm0, %v3225_v62 }
  0x62   : > { %3030 = vmatprep.subr.bf16.mxu1 %v3456_v30 }
  0x63   : > { %3039 = vmatpush3.bf16.msra.mxu0 %v3632_v31 }
  0x64   : > { %3052 = vmatprep.subr.bf16.mxu0 %v3456_v30 }
  0x65   : > { %3031 = vmatpush3.bf16.msra.mxu1 %v3632_v31 }
  0x66   : > { %3044 = vmatprep.subr.bf16.mxu1 %v3456_v30 }
  0x68   : > { %3017 = vmatmul.mubr.msk.bf16.gmra.mrb[8].mxu1 %vm726_vm0, %v3226_v63 }
  0x69   : > { %3032 = vmatprep.mubr.msk.bf16.mxu1 %vm3457_vm1, %v3456_v30 }
  0xd0   : > { %v1028_v0 = vpop.permute.xlu1 %1027 }
  0xd1   : > { %vm1029_vm3 = vcmp.eq.s32.totalorder %v1028_v0, 1 }
 0x129   : > { %v3658_v34 = vpop.f32.mrb[0].mxu0  ;;  %v3703_v5 = vpop.f32.mrb[0].mxu1 }
 0x12a   : > { %v773_v35 = vpop.f32.mrb[1].mxu0  ;;  %v3705_v6 = vpop.f32.mrb[1].mxu1 }
 0x12b   : > { %v3660_v36 = vpop.f32.mrb[2].mxu0  ;;  %v3707_v7 = vpop.f32.mrb[2].mxu1 }
 0x12c   : > { %v3662_v37 = vpop.f32.mrb[3].mxu0  ;;  %v3709_v8 = vpop.f32.mrb[3].mxu1 }
 0x131   : > { %v992_v39 = vpop.f32.mrb[4].mxu0 }
 0x132   : > { %v998_v40 = vadd.f32 %v992_v39, %v773_v35  ;;  %v3026_v41 = vpop.f32.mrb[5].mxu0 }
 0x133   : > { %v995_v42 = vpop.f32.mrb[6].mxu0  ;;  %v3711_v9 = vpop.f32.mrb[4].mxu1 }
 0x134   : > { %v999_v43 = vadd.f32 %v3667_v38, %v998_v40  ;;  %v3027_v44 = vpop.f32.mrb[7].mxu0  ;;  %v3713_v10 = vpop.f32.mrb[5].mxu1 }
 0x135   : > { %v3715_v11 = vpop.f32.mrb[6].mxu1 }
 0x136   : > { %3231 = vtanh.f32 %v999_v43  ;;  %v2877_v46 = vmul.f32 -1.442695, %v999_v43  ;;  %v3717_v12 = vpop.f32.mrb[7].mxu1 }
 0x138   : > { %3233 = vpow2.f32 %v2877_v46 }
 0x13b   : > { %v3719_v13 = vpop.f32.mrb[8].mxu1 }
 0x13c   : > { %v3721_v14 = vpop.f32.mrb[9].mxu1 }
 0x13d   : > { %v3723_v15 = vpop.f32.mrb[10].mxu1 }
 0x13e   : > { %v3725_v16 = vpop.f32.mrb[11].mxu1 }
 0x140   : > { %v3232_v45 = vpop.eup %3231 }
 0x141   : > { %1009 = vrot.lane.b32.xlu0 %v3232_v45, %s3458_s18 }
 0x142   : > { %v3234_v47 = vpop.eup %3233 }
 0x143   : > { %v1003_v48 = vadd.f32 1.0, %v3234_v47 }
 0x145   : > { %3235 = vrcp.f32 %v1003_v48 }
 0x14f   : > { %v3236_v49 = vpop.eup %3235 }
 0x150   : > { %v1007_v52 = vmul.f32 0.0, %v3236_v49 }
 0x1b3   : > { %v1010_v50 = vpop.permute.xlu0 %1009 }
 0x1b4   : > { %v1012_v51 = vmul.f32 %v3236_v49, %v1010_v50 }
 0x1b6   : > { %1014 = vrot.lane.b32.xlu0 %v1012_v51, %s3458_s18 }
 0x228   : > { %v1015_v53 = vpop.permute.xlu0 %1014 }
 0x229   : > { %v3672_v54 = vadd.f32 %v1015_v53, %v1007_v52 }
 0x22b   : > { %3237 = vtanh.f32 %v3672_v54  ;;  %v1031_v40 = vsel %vm1029_vm3, %v3672_v54, 0.0 }
 0x235   : > { %v3238_v60 = vpop.eup %3237 }
 0x236   : > { %1020 = vrot.lane.b32.xlu1 %v3238_v60, %s3458_s18 }
 0x2a8   : > { %v1021_v1 = vpop.permute.xlu1 %1020 }
 0x2a9   : > { %v1023_v2 = vmul.f32 %v3236_v49, %v1021_v1 }
 0x2ab   : > { %v1030_v3 = vsel %vm1029_vm3, %v1023_v2, 0.0 }
 0x2ac   : > { %v1036_v4 = vpack.c.bf16 %v1030_v3, %v1030_v3 }
 0x2ae   : > { %1038 = vrot.lane.b32.xlu0 %v1036_v4, %s3459_s16 }
 0x320   : > { %v1039_v17 = vpop.permute.xlu0 %1038 }
 0x321   : > { %3033 = vmatmul.mubr.msk.bf16.vlgmr.msra.gmra.mrb[12].mxu1 %vm726_vm0, %v1039_v17 }
 0x322   : > { %3045 = vmatpush3.bf16.msra.mxu1 %v3624_v28  ;;  %3048 = vmatprep.mubr.msk.bf16.mxu1 %vm3457_vm1, %v3456_v30 }
 0x323   : > { %3046 = vmatprep.subr.bf16.mxu1 %v3456_v30 }
 0x326   : > { %3047 = vmatpush3.bf16.msra.mxu1 %v3632_v31 }
 0x327   : > { %3060 = vmatprep.subr.bf16.mxu1 %v3456_v30 }
 0x3f4   : > { %v1077_v18 = vpop.f32.mrb[12].mxu1 }
 0x3f5   : > { %v1083_v19 = vadd.f32 %v1077_v18, %v3662_v37  ;;  %v3034_v20 = vpop.f32.mrb[13].mxu1 }
 0x3f6   : > { %v1080_v21 = vpop.f32.mrb[14].mxu1 }
 0x3f7   : > { %v1084_v22 = vadd.f32 %v3667_v38, %v1083_v19  ;;  %v3035_v23 = vpop.f32.mrb[15].mxu1 }
 0x3f9   : > { %3239 = vtanh.f32 %v1084_v22  ;;  %v2880_v27 = vmul.f32 -1.442695, %v1084_v22 }
 0x3fb   : > { %3241 = vpow2.f32 %v2880_v27 }
 0x403   : > { %v3240_v25 = vpop.eup %3239 }
 0x404   : > { %1094 = vrot.lane.b32.xlu1 %v3240_v25, %s3458_s18 }
 0x405   : > { %v3242_v32 = vpop.eup %3241 }
 0x406   : > { %v1088_v33 = vadd.f32 1.0, %v3242_v32 }
 0x408   : > { %1112 = vperm.xlu1 %3211, %v1110_v26   ;;  %3243 = vrcp.f32 %v1088_v33 }
 0x412   : > { %v3244_v35 = vpop.eup %3243 }
 0x413   : > { %v1092_v41 = vmul.f32 %v3244_v35, %v1031_v40 }
 0x476   : > { %v1095_v37 = vpop.permute.xlu1 %1094 }
 0x477   : > { %v1097_v39 = vmul.f32 %v3244_v35, %v1095_v37 }
 0x479   : > { %1099 = vrot.lane.b32.xlu0 %v1097_v39, %s3458_s18 }
 0x487   : > { %v1113_v45 = vpop.permute.xlu1 %1112 }
 0x488   : > { %vm1114_vm5 = vcmp.eq.s32.totalorder %v1113_v45, 1 }
 0x4eb   : > { %v1100_v42 = vpop.permute.xlu0 %1099 }
 0x4ec   : > { %v1102_v43 = vadd.f32 %v1100_v42, %v1092_v41 }
 0x4ee   : > { %3245 = vtanh.f32 %v1102_v43  ;;  %v1116_v1 = vsel %vm1114_vm5, %v1102_v43, %v1031_v40 }
 0x4f8   : > { %v3246_v44 = vpop.eup %3245 }
 0x4f9   : > { %1105 = vrot.lane.b32.xlu0 %v3246_v44, %s3458_s18 }
 0x56b   : > { %v1106_v46 = vpop.permute.xlu0 %1105 }
 0x56c   : > { %v1108_v47 = vmul.f32 %v3244_v35, %v1106_v46  ;;  %v2884_v35 = vld [vmem:[%s3654_s29 + $0x18] sm:$0xff] }
 0x56d   : > { %vm1279_vm8 = vcmp.gt.f32.partialorder %v2884_v35, 0.0 }
 0x56e   : > { %v1115_v48 = vsel %vm1114_vm5, %v1108_v47, %v1030_v3  ;;  %v1280_v39 = vsel %vm1279_vm8, 1, %v3455_v29 }
 0x56f   : > { %v1121_v49 = vpack.c.bf16 %v1115_v48, %v1115_v48 }
 0x571   : > { %1123 = vrot.lane.b32.xlu1 %v1121_v49, %s3459_s16 }
 0x5e3   : > { %v1124_v50 = vpop.permute.xlu1 %1123 }
 0x5e4   : > { %3041 = vmatmul.mubr.msk.bf16.vlgmr.msra.gmra.mrb[8].mxu0 %vm726_vm0, %v1124_v50 }
 0x5e5   : > { %3053 = vmatpush3.bf16.msra.mxu0 %v3624_v28  ;;  %3056 = vmatprep.mubr.msk.bf16.mxu0 %vm3457_vm1, %v3456_v30 }
 0x5e6   : > { %3054 = vmatprep.subr.bf16.mxu0 %v3456_v30 }
 0x5e9   : > { %3055 = vmatpush3.bf16.msra.mxu0 %v3632_v31 }
 0x5ea   : > { %3068 = vmatprep.subr.bf16.mxu0 %v3456_v30 }
 0x6b7   : > { %v1162_v51 = vpop.f32.mrb[8].mxu0 }
 0x6b8   : > { %v1168_v52 = vadd.f32 %v3658_v34, %v1162_v51  ;;  %v3042_v53 = vpop.f32.mrb[9].mxu0 }
 0x6b9   : > { %v1165_v54 = vpop.f32.mrb[10].mxu0 }
 0x6ba   : > { %v1169_v55 = vadd.f32 %v3667_v38, %v1168_v52  ;;  %v3043_v56 = vpop.f32.mrb[11].mxu0 }
 0x6bc   : > { %3247 = vtanh.f32 %v1169_v55  ;;  %v2883_v60 = vmul.f32 -1.442695, %v1169_v55 }
 0x6be   : > { %3249 = vpow2.f32 %v2883_v60 }
 0x6c6   : > { %v3248_v58 = vpop.eup %3247 }
 0x6c7   : > { %1179 = vrot.lane.b32.xlu0 %v3248_v58, %s3458_s18 }
 0x6c8   : > { %v3250_v61 = vpop.eup %3249 }
 0x6c9   : > { %v1173_v62 = vadd.f32 1.0, %v3250_v61 }
 0x6cb   : > { %1197 = vperm.xlu0 %3212, %v1195_v59   ;;  %3251 = vrcp.f32 %v1173_v62  ;;  %v2887_v62 = vld [vmem:[%s3654_s29 + $0x20] sm:$0xff] }
 0x6cc   : > { %vm1364_vm10 = vcmp.gt.f32.partialorder %v2887_v62, 0.0 }
 0x6d5   : > { %v3252_v34 = vpop.eup %3251 }
 0x6d6   : > { %v1177_v2 = vmul.f32 %v3252_v34, %v1116_v1 }
 0x739   : > { %v1180_v63 = vpop.permute.xlu0 %1179 }
 0x73a   : > { %v1182_v0 = vmul.f32 %v3252_v34, %v1180_v63  ;;  %v1365_v63 = vsel %vm1364_vm10, 1, %v3455_v29 }
 0x73c   : > { %1184 = vrot.lane.b32.xlu1 %v1182_v0, %s3458_s18 }
 0x74a   : > { %v1198_v18 = vpop.permute.xlu0 %1197 }
 0x74b   : > { %vm1199_vm7 = vcmp.eq.s32.totalorder %v1198_v18, 1 }
 0x7ae   : > { %v1185_v3 = vpop.permute.xlu1 %1184 }
 0x7af   : > { %v1187_v4 = vadd.f32 %v1185_v3, %v1177_v2 }
 0x7b1   : > { %3253 = vtanh.f32 %v1187_v4  ;;  %v1201_v45 = vsel %vm1199_vm7, %v1187_v4, %v1116_v1 }
 0x7bb   : > { %v3254_v17 = vpop.eup %3253 }
 0x7bc   : > { %1190 = vrot.lane.b32.xlu1 %v3254_v17, %s3458_s18 }
 0x82e   : > { %v1191_v19 = vpop.permute.xlu1 %1190 }
 0x82f   : > { %v1193_v20 = vmul.f32 %v3252_v34, %v1191_v19 }
 0x831   : > { %v1200_v21 = vsel %vm1199_vm7, %v1193_v20, %v1115_v48 }
 0x832   : > { %v1206_v22 = vpack.c.bf16 %v1200_v21, %v1200_v21 }
 0x834   : > { %1208 = vrot.lane.b32.xlu1 %v1206_v22, %s3459_s16 }
 0x8a6   : > { %v1209_v23 = vpop.permute.xlu1 %1208 }
 0x8a7   : > { %3049 = vmatmul.mubr.msk.bf16.vlgmr.msra.gmra.mrb[16].mxu1 %vm726_vm0, %v1209_v23 }
 0x8a8   : > { %3061 = vmatpush3.bf16.msra.mxu1 %v3624_v28  ;;  %3064 = vmatprep.mubr.msk.bf16.mxu1 %vm3457_vm1, %v3456_v30 }
 0x8a9   : > { %3062 = vmatprep.subr.bf16.mxu1 %v3456_v30 }
 0x8ac   : > { %3063 = vmatpush3.bf16.msra.mxu1 %v3632_v31 }
 0x8ad   : > { %3076 = vmatprep.subr.bf16.mxu1 %v3456_v30 }
 0x97a   : > { %v1247_v24 = vpop.f32.mrb[16].mxu1 }
 0x97b   : > { %v1253_v25 = vadd.f32 %v3660_v36, %v1247_v24  ;;  %v3050_v26 = vpop.f32.mrb[17].mxu1 }
 0x97c   : > { %v1250_v27 = vpop.f32.mrb[18].mxu1 }
 0x97d   : > { %v1254_v32 = vadd.f32 %v3667_v38, %v1253_v25  ;;  %v3051_v33 = vpop.f32.mrb[19].mxu1 }
 0x97f   : > { %3255 = vtanh.f32 %v1254_v32  ;;  %v2886_v40 = vmul.f32 -1.442695, %v1254_v32 }
 0x981   : > { %3257 = vpow2.f32 %v2886_v40 }
 0x989   : > { %v3256_v37 = vpop.eup %3255 }
 0x98a   : > { %1264 = vrot.lane.b32.xlu0 %v3256_v37, %s3458_s18 }
 0x98b   : > { %v3258_v41 = vpop.eup %3257 }
 0x98c   : > { %v1258_v42 = vadd.f32 1.0, %v3258_v41  ;;  %v2890_v41 = vld [vmem:[%s3654_s29 + $0x28] sm:$0xff] }
 0x98d   : > { %vm1449_vm12 = vcmp.gt.f32.partialorder %v2890_v41, 0.0  ;;  %v2896_v41 = vld [vmem:[%s3654_s29 + $0x38] sm:$0xff] }
 0x98e   : > { %1282 = vperm.xlu0 %3212, %v1280_v39   ;;  %3259 = vrcp.f32 %v1258_v42  ;;  %v1450_v42 = vsel %vm1449_vm12, 1, %v3455_v29  ;;  %vm1619_vm2 = vcmp.gt.f32.partialorder %v2896_v41, 0.0 }
 0x998   : > { %v3260_v36 = vpop.eup %3259 }
 0x999   : > { %v1262_v46 = vmul.f32 %v3260_v36, %v1201_v45 }
 0x9fc   : > { %v1265_v43 = vpop.permute.xlu0 %1264 }
 0x9fd   : > { %v1267_v44 = vmul.f32 %v3260_v36, %v1265_v43 }
 0x9ff   : > { %1269 = vrot.lane.b32.xlu1 %v1267_v44, %s3458_s18 }
 0xa0d   : > { %v1283_v50 = vpop.permute.xlu0 %1282 }
 0xa0e   : > { %vm1284_vm9 = vcmp.eq.s32.totalorder %v1283_v50, 1 }
 0xa71   : > { %v1270_v47 = vpop.permute.xlu1 %1269 }
 0xa72   : > { %v1272_v48 = vadd.f32 %v1270_v47, %v1262_v46 }
 0xa74   : > { %3261 = vtanh.f32 %v1272_v48  ;;  %v1286_v17 = vsel %vm1284_vm9, %v1272_v48, %v1201_v45 }
 0xa7e   : > { %v3262_v49 = vpop.eup %3261 }
 0xa7f   : > { %1275 = vrot.lane.b32.xlu1 %v3262_v49, %s3458_s18 }
 0xaf1   : > { %v1276_v51 = vpop.permute.xlu1 %1275 }
 0xaf2   : > { %v1278_v52 = vmul.f32 %v3260_v36, %v1276_v51 }
 0xaf4   : > { %v1285_v53 = vsel %vm1284_vm9, %v1278_v52, %v1200_v21 }
 0xaf5   : > { %v1291_v54 = vpack.c.bf16 %v1285_v53, %v1285_v53 }
 0xaf7   : > { %1293 = vrot.lane.b32.xlu0 %v1291_v54, %s3459_s16 }
 0xb69   : > { %v1294_v55 = vpop.permute.xlu0 %1293 }
 0xb6a   : > { %3057 = vmatmul.mubr.msk.bf16.vlgmr.msra.gmra.mrb[12].mxu0 %vm726_vm0, %v1294_v55 }
 0xb6b   : > { %3069 = vmatpush3.bf16.msra.mxu0 %v3624_v28  ;;  %3072 = vmatprep.mubr.msk.bf16.mxu0 %vm3457_vm1, %v3456_v30 }
 0xb6c   : > { %3070 = vmatprep.subr.bf16.mxu0 %v3456_v30 }
 0xb6f   : > { %3071 = vmatpush3.bf16.msra.mxu0 %v3632_v31 }
 0xb70   : > { %3084 = vmatprep.subr.bf16.mxu0 %v3456_v30 }
 0xc3d   : > { %v1332_v56 = vpop.f32.mrb[12].mxu0 }
 0xc3e   : > { %v1338_v57 = vadd.f32 %v1332_v56, %v3705_v6  ;;  %v3058_v58 = vpop.f32.mrb[13].mxu0 }
 0xc3f   : > { %v1335_v59 = vpop.f32.mrb[14].mxu0 }
 0xc40   : > { %v1339_v60 = vadd.f32 %v3667_v38, %v1338_v57  ;;  %v3059_v61 = vpop.f32.mrb[15].mxu0 }
 0xc42   : > { %3263 = vtanh.f32 %v1339_v60  ;;  %v2889_v0 = vmul.f32 -1.442695, %v1339_v60 }
 0xc44   : > { %3265 = vpow2.f32 %v2889_v0 }
 0xc4c   : > { %v3264_v34 = vpop.eup %3263 }
 0xc4d   : > { %1349 = vrot.lane.b32.xlu1 %v3264_v34, %s3458_s18  ;;  %v2893_v34 = vld [vmem:[%s3654_s29 + $0x30] sm:$0xff] }
 0xc4e   : > { %v3266_v1 = vpop.eup %3265  ;;  %vm1534_vm14 = vcmp.gt.f32.partialorder %v2893_v34, 0.0 }
 0xc4f   : > { %v1343_v2 = vadd.f32 1.0, %v3266_v1  ;;  %v1535_v0 = vsel %vm1534_vm14, 1, %v3455_v29 }
 0xc51   : > { %1367 = vperm.xlu1 %3211, %v1365_v63   ;;  %3267 = vrcp.f32 %v1343_v2 }
 0xc5b   : > { %v3268_v6 = vpop.eup %3267 }
 0xc5c   : > { %v1347_v18 = vmul.f32 %v3268_v6, %v1286_v17 }
 0xcbf   : > { %v1350_v3 = vpop.permute.xlu1 %1349 }
 0xcc0   : > { %v1352_v4 = vmul.f32 %v3268_v6, %v1350_v3 }
 0xcc2   : > { %1354 = vrot.lane.b32.xlu0 %v1352_v4, %s3458_s18 }
 0xcd0   : > { %v1368_v22 = vpop.permute.xlu1 %1367 }
 0xcd1   : > { %vm1369_vm11 = vcmp.eq.s32.totalorder %v1368_v22, 1 }
 0xd34   : > { %v1355_v19 = vpop.permute.xlu0 %1354 }
 0xd35   : > { %v1357_v20 = vadd.f32 %v1355_v19, %v1347_v18 }
 0xd37   : > { %3269 = vtanh.f32 %v1357_v20  ;;  %v1371_v46 = vsel %vm1369_vm11, %v1357_v20, %v1286_v17 }
 0xd41   : > { %v3270_v21 = vpop.eup %3269 }
 0xd42   : > { %1360 = vrot.lane.b32.xlu0 %v3270_v21, %s3458_s18 }
 0xdb4   : > { %v1361_v23 = vpop.permute.xlu0 %1360 }
 0xdb5   : > { %v1363_v24 = vmul.f32 %v3268_v6, %v1361_v23 }
 0xdb7   : > { %v1370_v25 = vsel %vm1369_vm11, %v1363_v24, %v1285_v53 }
 0xdb8   : > { %v1376_v26 = vpack.c.bf16 %v1370_v25, %v1370_v25 }
 0xdba   : > { %1378 = vrot.lane.b32.xlu1 %v1376_v26, %s3459_s16 }
 0xe2c   : > { %v1379_v27 = vpop.permute.xlu1 %1378 }
 0xe2d   : > { %3065 = vmatmul.mubr.msk.bf16.vlgmr.msra.gmra.mrb[20].mxu1 %vm726_vm0, %v1379_v27 }
 0xe2e   : > { %3077 = vmatpush3.bf16.msra.mxu1 %v3624_v28  ;;  %3080 = vmatprep.mubr.msk.bf16.mxu1 %vm3457_vm1, %v3456_v30 }
 0xe2f   : > { %3078 = vmatprep.subr.bf16.mxu1 %v3456_v30 }
 0xe32   : > { %3079 = vmatpush3.bf16.msra.mxu1 %v3632_v31 }
 0xe33   : > { %3092 = vmatprep.subr.bf16.mxu1 %v3456_v30 }
 0xf00   : > { %v1417_v32 = vpop.f32.mrb[20].mxu1 }
 0xf01   : > { %v1423_v33 = vadd.f32 %v1417_v32, %v3709_v8  ;;  %v3066_v35 = vpop.f32.mrb[21].mxu1 }
 0xf02   : > { %v1420_v37 = vpop.f32.mrb[22].mxu1 }
 0xf03   : > { %v1424_v39 = vadd.f32 %v3667_v38, %v1423_v33  ;;  %v3067_v40 = vpop.f32.mrb[23].mxu1 }
 0xf05   : > { %3271 = vtanh.f32 %v1424_v39  ;;  %v2892_v31 = vmul.f32 -1.442695, %v1424_v39 }
 0xf07   : > { %3273 = vpow2.f32 %v2892_v31 }
 0xf0f   : > { %v3272_v28 = vpop.eup %3271 }
 0xf10   : > { %1434 = vrot.lane.b32.xlu0 %v3272_v28, %s3458_s18 }
 0xf11   : > { %v3274_v36 = vpop.eup %3273 }
 0xf12   : > { %v1428_v43 = vadd.f32 1.0, %v3274_v36 }
 0xf14   : > { %1452 = vperm.xlu0 %3212, %v1450_v42   ;;  %3275 = vrcp.f32 %v1428_v43  ;;  %v1620_v42 = vsel %vm1619_vm2, 1, %v3455_v29  ;;  %v3839_v29 = vld [vmem:[%s4261_s7] sm:$0xff]  }
 0xf1e   : > { %v3276_v8 = vpop.eup %3275 }
 0xf1f   : > { %v1432_v47 = vmul.f32 %v3276_v8, %v1371_v46 }
 0xf82   : > { %v1435_v44 = vpop.permute.xlu0 %1434 }
 0xf83   : > { %v1437_v45 = vmul.f32 %v3276_v8, %v1435_v44 }
 0xf85   : > { %1439 = vrot.lane.b32.xlu1 %v1437_v45, %s3458_s18 }
 0xf93   : > { %v1453_v51 = vpop.permute.xlu0 %1452 }
 0xf94   : > { %vm1454_vm13 = vcmp.eq.s32.totalorder %v1453_v51, 1 }
 0xff7   : > { %v1440_v48 = vpop.permute.xlu1 %1439 }
 0xff8   : > { %v1442_v49 = vadd.f32 %v1440_v48, %v1432_v47  ;;  %v3845_v48 = vld [vmem:[%s4261_s7 + $0x8] sm:$0xff]  }
 0xffa   : > { %3277 = vtanh.f32 %v1442_v49  ;;  %v1456_v17 = vsel %vm1454_vm13, %v1442_v49, %v1371_v46 }
0x1004   : > { %v3278_v50 = vpop.eup %3277 }
0x1005   : > { %1445 = vrot.lane.b32.xlu1 %v3278_v50, %s3458_s18 }
0x1077   : > { %v1446_v52 = vpop.permute.xlu1 %1445 }
0x1078   : > { %v1448_v53 = vmul.f32 %v3276_v8, %v1446_v52 }
0x107a   : > { %v1455_v54 = vsel %vm1454_vm13, %v1448_v53, %v1370_v25 }
0x107b   : > { %v1461_v55 = vpack.c.bf16 %v1455_v54, %v1455_v54 }
0x107d   : > { %1463 = vrot.lane.b32.xlu0 %v1461_v55, %s3459_s16 }
0x10ef   : > { %v1464_v56 = vpop.permute.xlu0 %1463 }
0x10f0   : > { %3073 = vmatmul.mubr.msk.bf16.vlgmr.msra.gmra.mrb[16].mxu0 %vm726_vm0, %v1464_v56  ;;  %v3867_v56 = vld [vmem:[%s4262_s8] ss:$0 sm:$0xff] }
0x10f1   : > { %3088 = vmatprep.mubr.msk.bf16.mxu0 %vm3457_vm1, %v3456_v30  ;;  %3085 = vmatpush3.bf16.msra.mxu0 %v3839_v29 }
0x10f2   : > { %3086 = vmatprep.subr.bf16.mxu0 %v3456_v30 }
0x10f5   : > { %3087 = vmatpush3.bf16.msra.mxu0 %v3845_v48 }
0x10f6   : > { %3100 = vmatprep.subr.bf16.mxu0 %v3456_v30 }
0x11c3   : > { %v1502_v57 = vpop.f32.mrb[16].mxu0 }
0x11c4   : > { %v1508_v58 = vadd.f32 %v3703_v5, %v1502_v57  ;;  %v3074_v59 = vpop.f32.mrb[17].mxu0 }
0x11c5   : > { %v1505_v60 = vpop.f32.mrb[18].mxu0 }
0x11c6   : > { %v1509_v61 = vadd.f32 %v3667_v38, %v1508_v58  ;;  %v3075_v62 = vpop.f32.mrb[19].mxu0 }
0x11c8   : > { %3279 = vtanh.f32 %v1509_v61  ;;  %v2895_v1 = vmul.f32 -1.442695, %v1509_v61 }
0x11ca   : > { %3281 = vpow2.f32 %v2895_v1 }
0x11d2   : > { %v3280_v63 = vpop.eup %3279 }
0x11d3   : > { %1519 = vrot.lane.b32.xlu1 %v3280_v63, %s3458_s18 }
0x11d4   : > { %v3282_v2 = vpop.eup %3281 }
0x11d5   : > { %v1513_v6 = vadd.f32 1.0, %v3282_v2 }
0x11d7   : > { %1537 = vperm.xlu1 %3211, %v1535_v0   ;;  %3283 = vrcp.f32 %v1513_v6 }
0x11e1   : > { %v3284_v5 = vpop.eup %3283 }
0x11e2   : > { %v1517_v18 = vmul.f32 %v3284_v5, %v1456_v17 }
0x1245   : > { %v1520_v3 = vpop.permute.xlu1 %1519 }
0x1246   : > { %v1522_v4 = vmul.f32 %v3284_v5, %v1520_v3 }
0x1248   : > { %1524 = vrot.lane.b32.xlu0 %v1522_v4, %s3458_s18 }
0x1256   : > { %v1538_v22 = vpop.permute.xlu1 %1537 }
0x1257   : > { %vm1539_vm15 = vcmp.eq.s32.totalorder %v1538_v22, 1 }
0x12ba   : > { %v1525_v19 = vpop.permute.xlu0 %1524 }
0x12bb   : > { %v1527_v20 = vadd.f32 %v1525_v19, %v1517_v18 }
0x12bd   : > { %3285 = vtanh.f32 %v1527_v20 }
0x12c7   : > { %v3286_v21 = vpop.eup %3285 }
0x12c8   : > { %1530 = vrot.lane.b32.xlu0 %v3286_v21, %s3458_s18 }
0x133a   : > { %v1531_v23 = vpop.permute.xlu0 %1530 }
0x133b   : > { %v1533_v24 = vmul.f32 %v3284_v5, %v1531_v23 }
0x133d   : > { %v1540_v25 = vsel %vm1539_vm15, %v1533_v24, %v1455_v54 }
0x133e   : > { %v1546_v26 = vpack.c.bf16 %v1540_v25, %v1540_v25 }
0x1340   : > { %1548 = vrot.lane.b32.xlu1 %v1546_v26, %s3459_s16 }
0x13b2   : > { %v1549_v27 = vpop.permute.xlu1 %1548 }
0x13b3   : > { %3081 = vmatmul.mubr.msk.bf16.vlgmr.msra.gmra.mrb[24].mxu1 %vm726_vm0, %v1549_v27 }
0x13b4   : > { %3096 = vmatprep.mubr.msk.bf16.mxu1 %vm3457_vm1, %v3456_v30  ;;  %3093 = vmatpush3.bf16.msra.mxu1 %v3839_v29 }
0x13b5   : > { %3094 = vmatprep.subr.bf16.mxu1 %v3456_v30 }
0x13b8   : > { %3095 = vmatpush3.bf16.msra.mxu1 %v3845_v48 }
0x13b9   : > { %3108 = vmatprep.subr.bf16.mxu1 %v3456_v30 }
0x1486   : > { %v1587_v32 = vpop.f32.mrb[24].mxu1 }
0x1487   : > { %v1593_v33 = vadd.f32 %v3707_v7, %v1587_v32  ;;  %v3082_v35 = vpop.f32.mrb[25].mxu1 }
0x1488   : > { %v1590_v37 = vpop.f32.mrb[26].mxu1 }
0x1489   : > { %v1594_v39 = vadd.f32 %v3667_v38, %v1593_v33  ;;  %v3083_v40 = vpop.f32.mrb[27].mxu1  ;;  %v1541_v38 = vsel %vm1539_vm15, %v1527_v20, %v1456_v17 }
0x148b   : > { %3287 = vtanh.f32 %v1594_v39  ;;  %v2898_v31 = vmul.f32 -1.442695, %v1594_v39 }
0x148d   : > { %3289 = vpow2.f32 %v2898_v31 }
0x1495   : > { %v3288_v28 = vpop.eup %3287 }
0x1496   : > { %1604 = vrot.lane.b32.xlu0 %v3288_v28, %s3458_s18 }
0x1497   : > { %v3290_v36 = vpop.eup %3289 }
0x1498   : > { %v1598_v43 = vadd.f32 1.0, %v3290_v36 }
0x149a   : > { %1622 = vperm.xlu0 %3212, %v1620_v42   ;;  %3291 = vrcp.f32 %v1598_v43 }
0x14a4   : > { %v3292_v7 = vpop.eup %3291 }
0x14a5   : > { %v1602_v45 = vmul.f32 %v3292_v7, %v1541_v38 }
0x1508   : > { %v1605_v8 = vpop.permute.xlu0 %1604 }
0x1509   : > { %v1607_v44 = vmul.f32 %v3292_v7, %v1605_v8 }
0x150b   : > { %1609 = vrot.lane.b32.xlu1 %v1607_v44, %s3458_s18 }
0x1519   : > { %v1623_v50 = vpop.permute.xlu0 %1622 }
0x151a   : > { %vm1624_vm3 = vcmp.eq.s32.totalorder %v1623_v50, 1 }
0x157d   : > { %v1610_v46 = vpop.permute.xlu1 %1609 }
0x157e   : > { %v1612_v47 = vadd.f32 %v1610_v46, %v1602_v45 }
0x1580   : > { %3293 = vtanh.f32 %v1612_v47 }
0x158a   : > { %v3294_v49 = vpop.eup %3293 }
0x158b   : > { %1615 = vrot.lane.b32.xlu1 %v3294_v49, %s3458_s18 }
0x15fd   : > { %v1616_v51 = vpop.permute.xlu1 %1615 }
0x15fe   : > { %v1618_v52 = vmul.f32 %v3292_v7, %v1616_v51 }
0x1600   : > { %v1625_v53 = vsel %vm1624_vm3, %v1618_v52, %v1540_v25 }
0x1601   : > { %v1628_v54 = vpack.c.bf16 %v1625_v53, %v1625_v53 }
0x1603   : > { %1630 = vrot.lane.b32.xlu0 %v1628_v54, %s3459_s16 }
0x1675   : > { %v1631_v55 = vpop.permute.xlu0 %1630 }
0x1676   : > { %3089 = vmatmul.mubr.msk.bf16.vlgmr.msra.gmra.mrb[20].mxu0 %vm726_vm0, %v1631_v55 }
0x1677   : > { %3101 = vmatpush3.bf16.msra.mxu0 %v3839_v29  ;;  %3104 = vmatprep.mubr.msk.bf16.mxu0 %vm3457_vm1, %v3456_v30 }
0x1678   : > { %3102 = vmatprep.subr.bf16.mxu0 %v3456_v30 }
0x167b   : > { %3103 = vmatpush3.bf16.msra.mxu0 %v3845_v48 }
0x167c   : > { %3116 = vmatprep.subr.bf16.mxu0 %v3456_v30 }
0x1749   : > { %v1681_v57 = vpop.f32.mrb[20].mxu0 }
0x174a   : > { %v1687_v58 = vadd.f32 %v1681_v57, %v3713_v10  ;;  %v3090_v59 = vpop.f32.mrb[21].mxu0  ;;  %v1626_v10 = vsel %vm1624_vm3, %v1612_v47, %v1541_v38 }
0x174b   : > { %v1684_v60 = vpop.f32.mrb[22].mxu0 }
0x174c   : > { %v1688_v61 = vadd.f32 %v3867_v56, %v1687_v58  ;;  %v3091_v62 = vpop.f32.mrb[23].mxu0 }
0x174e   : > { %3295 = vtanh.f32 %v1688_v61  ;;  %v2902_v63 = vmul.f32 -1.442695, %v1688_v61 }
0x1750   : > { %3297 = vpow2.f32 %v2902_v63 }
0x1758   : > { %v3296_v34 = vpop.eup %3295 }
0x1759   : > { %1698 = vrot.lane.b32.xlu1 %v3296_v34, %s3458_s18 }
0x175a   : > { %v3298_v0 = vpop.eup %3297 }
0x175b   : > { %v1692_v1 = vadd.f32 1.0, %v3298_v0 }
0x175d   : > { %3299 = vrcp.f32 %v1692_v1 }
0x1767   : > { %v3300_v2 = vpop.eup %3299 }
0x1768   : > { %v1696_v3 = vmul.f32 %v3300_v2, %v1626_v10 }
0x17cb   : > { %v1699_v6 = vpop.permute.xlu1 %1698 }
0x17cc   : > { %v1701_v5 = vmul.f32 %v3300_v2, %v1699_v6 }
0x17ce   : > { %1703 = vrot.lane.b32.xlu0 %v1701_v5, %s3458_s18 }
0x1840   : > { %v1704_v4 = vpop.permute.xlu0 %1703 }
0x1841   : > { %v1706_v17 = vadd.f32 %v1704_v4, %v1696_v3 }
0x1843   : > { %3301 = vtanh.f32 %v1706_v17 }
0x184d   : > { %v3302_v18 = vpop.eup %3301 }
0x184e   : > { %1709 = vrot.lane.b32.xlu1 %v3302_v18, %s3458_s18 }
0x18c0   : > { %v1710_v19 = vpop.permute.xlu1 %1709 }
0x18c1   : > { %v3875_v20 = vmul.f32 %v3300_v2, %v1710_v19 }
0x18c3   : > { %v1720_v21 = vpack.c.bf16 %v3875_v20, %v3875_v20 }
0x18c5   : > { %1722 = vrot.lane.b32.xlu0 %v1720_v21, %s3459_s16 }
0x1937   : > { %v1723_v22 = vpop.permute.xlu0 %1722 }
0x1938   : > { %3097 = vmatmul.mubr.msk.bf16.vlgmr.msra.gmra.mrb[28].mxu1 %vm726_vm0, %v1723_v22 }
0x1939   : > { %3109 = vmatpush3.bf16.msra.mxu1 %v3839_v29  ;;  %3112 = vmatprep.mubr.msk.bf16.mxu1 %vm3457_vm1, %v3456_v30 }
0x193a   : > { %3110 = vmatprep.subr.bf16.mxu1 %v3456_v30 }
0x193d   : > { %3111 = vmatpush3.bf16.msra.mxu1 %v3845_v48 }
0x193e   : > { %3124 = vmatprep.subr.bf16.mxu1 %v3456_v30 }
0x1a0b   : > { %v1761_v23 = vpop.f32.mrb[28].mxu1 }
0x1a0c   : > { %v1767_v24 = vadd.f32 %v1761_v23, %v3717_v12  ;;  %v3098_v25 = vpop.f32.mrb[29].mxu1 }
0x1a0d   : > { %v1764_v26 = vpop.f32.mrb[30].mxu1 }
0x1a0e   : > { %v1768_v27 = vadd.f32 %v3867_v56, %v1767_v24  ;;  %v3099_v32 = vpop.f32.mrb[31].mxu1 }
0x1a10   : > { %3303 = vtanh.f32 %v1768_v27  ;;  %v2904_v35 = vmul.f32 -1.442695, %v1768_v27 }
0x1a12   : > { %3305 = vpow2.f32 %v2904_v35 }
0x1a1a   : > { %v3304_v33 = vpop.eup %3303 }
0x1a1b   : > { %1778 = vrot.lane.b32.xlu1 %v3304_v33, %s3458_s18 }
0x1a1c   : > { %v3306_v37 = vpop.eup %3305 }
0x1a1d   : > { %v1772_v39 = vadd.f32 1.0, %v3306_v37 }
0x1a1f   : > { %3307 = vrcp.f32 %v1772_v39 }
0x1a29   : > { %v3308_v40 = vpop.eup %3307 }
0x1a2a   : > { %v1776_v12 = vmul.f32 %v3308_v40, %v1706_v17 }
0x1a8d   : > { %v1779_v41 = vpop.permute.xlu1 %1778 }
0x1a8e   : > { %v1781_v28 = vmul.f32 %v3308_v40, %v1779_v41 }
0x1a90   : > { %1783 = vrot.lane.b32.xlu0 %v1781_v28, %s3458_s18 }
0x1b02   : > { %v1784_v42 = vpop.permute.xlu0 %1783 }
0x1b03   : > { %v1786_v31 = vadd.f32 %v1784_v42, %v1776_v12 }
0x1b05   : > { %3309 = vtanh.f32 %v1786_v31 }
0x1b0f   : > { %v3310_v36 = vpop.eup %3309 }
0x1b10   : > { %1789 = vrot.lane.b32.xlu1 %v3310_v36, %s3458_s18 }
0x1b82   : > { %v1790_v43 = vpop.permute.xlu1 %1789 }
0x1b83   : > { %v3892_v7 = vmul.f32 %v3308_v40, %v1790_v43 }
0x1b85   : > { %v1801_v8 = vpack.c.bf16 %v3892_v7, %v3892_v7 }
0x1b87   : > { %1803 = vrot.lane.b32.xlu0 %v1801_v8, %s3459_s16 }
0x1bf9   : > { %v1804_v44 = vpop.permute.xlu0 %1803 }
0x1bfa   : > { %3105 = vmatmul.mubr.msk.bf16.vlgmr.msra.gmra.mrb[24].mxu0 %vm726_vm0, %v1804_v44 }
0x1bfb   : > { %3117 = vmatpush3.bf16.msra.mxu0 %v3839_v29  ;;  %3120 = vmatprep.mubr.msk.bf16.mxu0 %vm3457_vm1, %v3456_v30 }
0x1bfc   : > { %3118 = vmatprep.subr.bf16.mxu0 %v3456_v30 }
0x1bff   : > { %3119 = vmatpush3.bf16.msra.mxu0 %v3845_v48 }
0x1c00   : > { %3132 = vmatprep.subr.bf16.mxu0 %v3456_v30 }
0x1ccd   : > { %v1842_v38 = vpop.f32.mrb[24].mxu0 }
0x1cce   : > { %v1848_v45 = vadd.f32 %v3711_v9, %v1842_v38  ;;  %v3106_v46 = vpop.f32.mrb[25].mxu0 }
0x1ccf   : > { %v1845_v47 = vpop.f32.mrb[26].mxu0 }
0x1cd0   : > { %v1849_v49 = vadd.f32 %v3867_v56, %v1848_v45  ;;  %v3107_v50 = vpop.f32.mrb[27].mxu0 }
0x1cd2   : > { %3311 = vtanh.f32 %v1849_v49  ;;  %v2906_v52 = vmul.f32 -1.442695, %v1849_v49 }
0x1cd4   : > { %3313 = vpow2.f32 %v2906_v52 }
0x1cdc   : > { %v3312_v51 = vpop.eup %3311 }
0x1cdd   : > { %1859 = vrot.lane.b32.xlu1 %v3312_v51, %s3458_s18 }
0x1cde   : > { %v3314_v53 = vpop.eup %3313 }
0x1cdf   : > { %v1853_v54 = vadd.f32 1.0, %v3314_v53 }
0x1ce1   : > { %3315 = vrcp.f32 %v1853_v54 }
0x1ceb   : > { %v3316_v55 = vpop.eup %3315 }
0x1cec   : > { %v1857_v9 = vmul.f32 %v3316_v55, %v1786_v31 }
0x1d4f   : > { %v1860_v57 = vpop.permute.xlu1 %1859 }
0x1d50   : > { %v1862_v58 = vmul.f32 %v3316_v55, %v1860_v57 }
0x1d52   : > { %1864 = vrot.lane.b32.xlu0 %v1862_v58, %s3458_s18 }
0x1dc4   : > { %v1865_v59 = vpop.permute.xlu0 %1864 }
0x1dc5   : > { %v1867_v60 = vadd.f32 %v1865_v59, %v1857_v9 }
0x1dc7   : > { %3317 = vtanh.f32 %v1867_v60 }
0x1dd1   : > { %v3318_v61 = vpop.eup %3317 }
0x1dd2   : > { %1870 = vrot.lane.b32.xlu1 %v3318_v61, %s3458_s18 }
0x1e44   : > { %v1871_v62 = vpop.permute.xlu1 %1870 }
0x1e45   : > { %v3909_v34 = vmul.f32 %v3316_v55, %v1871_v62 }
0x1e47   : > { %v1882_v63 = vpack.c.bf16 %v3909_v34, %v3909_v34 }
0x1e49   : > { %1884 = vrot.lane.b32.xlu0 %v1882_v63, %s3459_s16 }
0x1ebb   : > { %v1885_v0 = vpop.permute.xlu0 %1884 }
0x1ebc   : > { %3113 = vmatmul.mubr.msk.bf16.vlgmr.msra.gmra.mrb[32].mxu1 %vm726_vm0, %v1885_v0 }
0x1ebd   : > { %3125 = vmatpush3.bf16.msra.mxu1 %v3839_v29  ;;  %3128 = vmatprep.mubr.msk.bf16.mxu1 %vm3457_vm1, %v3456_v30 }
0x1ebe   : > { %3126 = vmatprep.subr.bf16.mxu1 %v3456_v30 }
0x1ec1   : > { %3127 = vmatpush3.bf16.msra.mxu1 %v3845_v48 }
0x1ec2   : > { %3140 = vmatprep.subr.bf16.mxu1 %v3456_v30 }
0x1f8f   : > { %v1923_v1 = vpop.f32.mrb[32].mxu1 }
0x1f90   : > { %v1929_v2 = vadd.f32 %v3715_v11, %v1923_v1  ;;  %v3114_v6 = vpop.f32.mrb[33].mxu1 }
0x1f91   : > { %v1926_v5 = vpop.f32.mrb[34].mxu1 }
0x1f92   : > { %v1930_v10 = vadd.f32 %v3867_v56, %v1929_v2  ;;  %v3115_v3 = vpop.f32.mrb[35].mxu1 }
0x1f94   : > { %3319 = vtanh.f32 %v1930_v10  ;;  %v2908_v17 = vmul.f32 -1.442695, %v1930_v10 }
0x1f96   : > { %3321 = vpow2.f32 %v2908_v17 }
0x1f9e   : > { %v3320_v4 = vpop.eup %3319 }
0x1f9f   : > { %1940 = vrot.lane.b32.xlu1 %v3320_v4, %s3458_s18 }
0x1fa0   : > { %v3322_v18 = vpop.eup %3321 }
0x1fa1   : > { %v1934_v19 = vadd.f32 1.0, %v3322_v18 }
0x1fa3   : > { %3323 = vrcp.f32 %v1934_v19 }
0x1fad   : > { %v3324_v21 = vpop.eup %3323 }
0x1fae   : > { %v1938_v11 = vmul.f32 %v3324_v21, %v1867_v60 }
0x2011   : > { %v1941_v22 = vpop.permute.xlu1 %1940 }
0x2012   : > { %v1943_v23 = vmul.f32 %v3324_v21, %v1941_v22 }
0x2014   : > { %1945 = vrot.lane.b32.xlu0 %v1943_v23, %s3458_s18 }
0x2086   : > { %v1946_v24 = vpop.permute.xlu0 %1945 }
0x2087   : > { %v1948_v25 = vadd.f32 %v1946_v24, %v1938_v11 }
0x2089   : > { %3325 = vtanh.f32 %v1948_v25 }
0x2093   : > { %v3326_v26 = vpop.eup %3325 }
0x2094   : > { %1951 = vrot.lane.b32.xlu1 %v3326_v26, %s3458_s18 }
0x2106   : > { %v1952_v27 = vpop.permute.xlu1 %1951 }
0x2107   : > { %v3926_v32 = vmul.f32 %v3324_v21, %v1952_v27 }
0x2109   : > { %v1963_v33 = vpack.c.bf16 %v3926_v32, %v3926_v32 }
0x210b   : > { %1965 = vrot.lane.b32.xlu0 %v1963_v33, %s3459_s16 }
0x217d   : > { %v1966_v35 = vpop.permute.xlu0 %1965 }
0x217e   : > { %3121 = vmatmul.mubr.msk.bf16.vlgmr.msra.gmra.mrb[28].mxu0 %vm726_vm0, %v1966_v35 }
0x217f   : > { %3133 = vmatpush3.bf16.msra.mxu0 %v3839_v29  ;;  %3136 = vmatprep.mubr.msk.bf16.mxu0 %vm3457_vm1, %v3456_v30 }
0x2180   : > { %3134 = vmatprep.subr.bf16.mxu0 %v3456_v30 }
0x2183   : > { %3135 = vmatpush3.bf16.msra.mxu0 %v3845_v48 }
0x2251   : > { %v2004_v37 = vpop.f32.mrb[28].mxu0 }
0x2252   : > { %v2010_v39 = vadd.f32 %v2004_v37, %v3721_v14  ;;  %v3122_v40 = vpop.f32.mrb[29].mxu0 }
0x2253   : > { %v2007_v41 = vpop.f32.mrb[30].mxu0 }
0x2254   : > { %v2011_v28 = vadd.f32 %v3867_v56, %v2010_v39  ;;  %v3123_v12 = vpop.f32.mrb[31].mxu0 }
0x2256   : > { %3327 = vtanh.f32 %v2011_v28  ;;  %v2910_v31 = vmul.f32 -1.442695, %v2011_v28 }
0x2258   : > { %3329 = vpow2.f32 %v2910_v31 }
0x2260   : > { %v3328_v42 = vpop.eup %3327 }
0x2261   : > { %2021 = vrot.lane.b32.xlu1 %v3328_v42, %s3458_s18 }
0x2262   : > { %v3330_v36 = vpop.eup %3329 }
0x2263   : > { %v2015_v43 = vadd.f32 1.0, %v3330_v36 }
0x2265   : > { %3331 = vrcp.f32 %v2015_v43 }
0x226f   : > { %v3332_v8 = vpop.eup %3331 }
0x2270   : > { %v2019_v14 = vmul.f32 %v3332_v8, %v1948_v25 }
0x22d3   : > { %v2022_v44 = vpop.permute.xlu1 %2021 }
0x22d4   : > { %v2024_v38 = vmul.f32 %v3332_v8, %v2022_v44 }
0x22d6   : > { %2026 = vrot.lane.b32.xlu0 %v2024_v38, %s3458_s18 }
0x2348   : > { %v2027_v45 = vpop.permute.xlu0 %2026 }
0x2349   : > { %v2029_v46 = vadd.f32 %v2027_v45, %v2019_v14 }
0x234b   : > { %3333 = vtanh.f32 %v2029_v46 }
0x2355   : > { %v3334_v47 = vpop.eup %3333 }
0x2356   : > { %2032 = vrot.lane.b32.xlu1 %v3334_v47, %s3458_s18 }
0x23c8   : > { %v2033_v49 = vpop.permute.xlu1 %2032 }
0x23c9   : > { %v3942_v50 = vmul.f32 %v3332_v8, %v2033_v49 }
0x23cb   : > { %v2044_v51 = vpack.c.bf16 %v3942_v50, %v3942_v50 }
0x23cd   : > { %2046 = vrot.lane.b32.xlu0 %v2044_v51, %s3459_s16 }
0x243f   : > { %v2047_v52 = vpop.permute.xlu0 %2046 }
0x2440   : > { %3129 = vmatmul.mubr.msk.bf16.vlgmr.msra.gmra.mrb[36].mxu1 %vm726_vm0, %v2047_v52 }
0x2441   : > { %3141 = vmatpush3.bf16.msra.mxu1 %v3839_v29  ;;  %3144 = vmatprep.mubr.msk.bf16.mxu1 %vm3457_vm1, %v3456_v30 }
0x2442   : > { %3142 = vmatprep.subr.bf16.mxu1 %v3456_v30 }
0x2445   : > { %3143 = vmatpush3.bf16.msra.mxu1 %v3845_v48 }
0x2513   : > { %v2085_v53 = vpop.f32.mrb[36].mxu1 }
0x2514   : > { %v2091_v54 = vadd.f32 %v2085_v53, %v3725_v16  ;;  %v3130_v55 = vpop.f32.mrb[37].mxu1 }
0x2515   : > { %v2088_v57 = vpop.f32.mrb[38].mxu1 }
0x2516   : > { %v2092_v58 = vadd.f32 %v3867_v56, %v2091_v54  ;;  %v3131_v9 = vpop.f32.mrb[39].mxu1  ;;  %v3230_v54 = vld [vmem:[%s4263_s9 + $0x8] sm:$0xff]  }
0x2518   : > { %3335 = vtanh.f32 %v2092_v58  ;;  %v2912_v29 = vmul.f32 -1.442695, %v2092_v58 }
0x251a   : > { %3337 = vpow2.f32 %v2912_v29 }
0x2522   : > { %v3336_v59 = vpop.eup %3335 }
0x2523   : > { %2102 = vrot.lane.b32.xlu1 %v3336_v59, %s3458_s18 }
0x2524   : > { %v3338_v60 = vpop.eup %3337 }
0x2525   : > { %v2096_v61 = vadd.f32 1.0, %v3338_v60 }
0x2527   : > { %3339 = vrcp.f32 %v2096_v61 }
0x2531   : > { %v3340_v30 = vpop.eup %3339 }
0x2532   : > { %v2100_v16 = vmul.f32 %v3340_v30, %v2029_v46 }
0x2595   : > { %v2103_v62 = vpop.permute.xlu1 %2102 }
0x2596   : > { %v2105_v48 = vmul.f32 %v3340_v30, %v2103_v62 }
0x2598   : > { %2107 = vrot.lane.b32.xlu0 %v2105_v48, %s3458_s18 }
0x260a   : > { %v2108_v63 = vpop.permute.xlu0 %2107 }
0x260b   : > { %v2110_v0 = vadd.f32 %v2108_v63, %v2100_v16 }
0x260d   : > { %3341 = vtanh.f32 %v2110_v0 }
0x2617   : > { %v3342_v1 = vpop.eup %3341 }
0x2618   : > { %2113 = vrot.lane.b32.xlu1 %v3342_v1, %s3458_s18 }
0x268a   : > { %v2114_v2 = vpop.permute.xlu1 %2113 }
0x268b   : > { %v3958_v6 = vmul.f32 %v3340_v30, %v2114_v2 }
0x268d   : > { %v2125_v5 = vpack.c.bf16 %v3958_v6, %v3958_v6 }
0x268f   : > { %2127 = vrot.lane.b32.xlu0 %v2125_v5, %s3459_s16  ;;  %v2917_v5 = vld [vmem:[%s4264_s10] ss:$0 sm:$0xff] }
0x2701   : > { %v2128_v10 = vpop.permute.xlu0 %2127 }
0x2702   : > { %3137 = vmatmul.mubr.msk.bf16.vlgmr.msra.gmra.mrb[32].mxu0 %vm726_vm0, %v2128_v10 }
0x27d5   : > { %v2166_v3 = vpop.f32.mrb[32].mxu0 }
0x27d6   : > { %v2172_v4 = vadd.f32 %v3719_v13, %v2166_v3  ;;  %v3138_v17 = vpop.f32.mrb[33].mxu0 }
0x27d7   : > { %v2169_v18 = vpop.f32.mrb[34].mxu0 }
0x27d8   : > { %v2173_v19 = vadd.f32 %v3867_v56, %v2172_v4  ;;  %v3139_v21 = vpop.f32.mrb[35].mxu0 }
0x27da   : > { %3343 = vtanh.f32 %v2173_v19  ;;  %v2914_v23 = vmul.f32 -1.442695, %v2173_v19 }
0x27dc   : > { %3345 = vpow2.f32 %v2914_v23 }
0x27e4   : > { %v3344_v22 = vpop.eup %3343 }
0x27e5   : > { %2183 = vrot.lane.b32.xlu1 %v3344_v22, %s3458_s18 }
0x27e6   : > { %v3346_v11 = vpop.eup %3345 }
0x27e7   : > { %v2177_v24 = vadd.f32 1.0, %v3346_v11 }
0x27e9   : > { %3347 = vrcp.f32 %v2177_v24 }
0x27f3   : > { %v3348_v25 = vpop.eup %3347 }
0x27f4   : > { %v2181_v13 = vmul.f32 %v3348_v25, %v2110_v0 }
0x2857   : > { %v2184_v26 = vpop.permute.xlu1 %2183 }
0x2858   : > { %v2186_v27 = vmul.f32 %v3348_v25, %v2184_v26 }
0x285a   : > { %2188 = vrot.lane.b32.xlu0 %v2186_v27, %s3458_s18 }
0x28cc   : > { %v2189_v33 = vpop.permute.xlu0 %2188 }
0x28cd   : > { %v2191_v35 = vadd.f32 %v2189_v33, %v2181_v13 }
0x28cf   : > { %3349 = vtanh.f32 %v2191_v35 }
0x28d9   : > { %v3350_v37 = vpop.eup %3349 }
0x28da   : > { %2194 = vrot.lane.b32.xlu1 %v3350_v37, %s3458_s18 }
0x294c   : > { %v2195_v39 = vpop.permute.xlu1 %2194 }
0x294d   : > { %v2197_v40 = vmul.f32 %v3348_v25, %v2195_v39 }
0x294f   : > { %v2206_v41 = vpack.c.bf16 %v2197_v40, %v2197_v40 }
0x2951   : > { %2208 = vrot.lane.b32.xlu0 %v2206_v41, %s3459_s16 }
0x29c3   : > { %v2209_v28 = vpop.permute.xlu0 %2208 }
0x29c4   : > { %3145 = vmatmul.mubr.msk.bf16.vlgmr.msra.gmra.mrb[40].mxu1 %vm726_vm0, %v2209_v28 }
0x2a97   : > { %v2247_v12 = vpop.f32.mrb[40].mxu1 }
0x2a98   : > { %v2253_v42 = vadd.f32 %v3723_v15, %v2247_v12  ;;  %v3146_v31 = vpop.f32.mrb[41].mxu1 }
0x2a99   : > { %v2250_v36 = vpop.f32.mrb[42].mxu1 }
0x2a9a   : > { %v2254_v43 = vadd.f32 %v3867_v56, %v2253_v42  ;;  %v3147_v8 = vpop.f32.mrb[43].mxu1 }
0x2a9c   : > { %3351 = vtanh.f32 %v2254_v43  ;;  %v2916_v38 = vmul.f32 -1.442695, %v2254_v43 }
0x2a9e   : > { %3353 = vpow2.f32 %v2916_v38 }
0x2aa6   : > { %v3352_v44 = vpop.eup %3351 }
0x2aa7   : > { %2264 = vrot.lane.b32.xlu1 %v3352_v44, %s3458_s18 }
0x2aa8   : > { %v3354_v14 = vpop.eup %3353 }
0x2aa9   : > { %v2258_v45 = vadd.f32 1.0, %v3354_v14 }
0x2aab   : > { %3355 = vrcp.f32 %v2258_v45 }
0x2ab5   : > { %v3356_v46 = vpop.eup %3355 }
0x2ab6   : > { %v2262_v15 = vmul.f32 %v3356_v46, %v2191_v35  ;;  %v2485_v35 = vlaneseq }
0x2ab8   : > { %v2486_v37 = vand.u32 127, %v2485_v35 }
0x2b19   : > { %v2265_v47 = vpop.permute.xlu1 %2264 }
0x2b1a   : > { %v2267_v49 = vmul.f32 %v3356_v46, %v2265_v47 }
0x2b1c   : > { %2269 = vrot.lane.b32.xlu0 %v2267_v49, %s3458_s18 }
0x2b20   : > { %1714 = vrot.lane.b32.xlu0 %v3875_v20, %s3459_s16  ;;  %v3229_v20 = vld [vmem:[%s4263_s9] sm:$0xff]  }
0x2b21   : > { %3148 = vmatprep.subr.bf16.mxu0 %v3229_v20 }
0x2b22   : > { %3149 = vmatpush3.bf16.msra.mxu0 %v3229_v20 }
0x2b23   : > { %3150 = vmatprep.subr.bf16.mxu0 %v3230_v54 }
0x2b24   : > { %1875 = vrot.lane.b32.xlu0 %v3909_v34, %s3459_s16 }
0x2b26   : > { %3151 = vmatpush3.bf16.msra.mxu0 %v3230_v54 }
0x2b28   : > { %2037 = vrot.lane.b32.xlu0 %v3942_v50, %s3459_s16 }
0x2b2c   : > { %2199 = vrot.lane.b32.xlu0 %v2197_v40, %s3459_s16 }
0x2b8e   : > { %v2270_v56 = vpop.permute.xlu0 %2269 }
0x2b8f   : > { %v2272_v51 = vadd.f32 %v2270_v56, %v2262_v15 }
0x2b91   : > { %3357 = vtanh.f32 %v2272_v51 }
0x2b92   : > { %v1715_v52 = vpop.permute.xlu0 %1714 }
0x2b93   : > { %1717 = vst.msk [vmem:[#allocation4] sm:$0xff] %vm726_vm0, %v1715_v52 }
0x2b96   : > { %v1876_v53 = vpop.permute.xlu0 %1875 }
0x2b97   : > { %1879 = vst.msk [vmem:[#allocation4 + $0x10] sm:$0xff] %vm726_vm0, %v1876_v53 }
0x2b9a   : > { %v2038_v34 = vpop.permute.xlu0 %2037  ;;  %v2285_v60 = vld [vmem:[#allocation4] sm:$0xff] }
0x2b9b   : > { %v3358_v50 = vpop.eup %3357  ;;  %2041 = vst.msk [vmem:[#allocation4 + $0x20] sm:$0xff] %vm726_vm0, %v2038_v34 }
0x2b9c   : > { %2275 = vrot.lane.b32.xlu1 %v3358_v50, %s3458_s18 }
0x2b9e   : > { %v2200_v55 = vpop.permute.xlu0 %2199 }
0x2b9f   : > { %2203 = vst.msk [vmem:[#allocation4 + $0x30] sm:$0xff] %vm726_vm0, %v2200_v55 }
0x2ba0   : > { %1794 = vrot.lane.b32.xlu1 %v3892_v7, %s3459_s16 }
0x2ba2   : > { %v2289_v48 = vld [vmem:[#allocation4 + $0x20] sm:$0xff] }
0x2ba4   : > { %1956 = vrot.lane.b32.xlu1 %v3926_v32, %s3459_s16  ;;  %v2287_v32 = vld [vmem:[#allocation4 + $0x10] sm:$0xff] }
0x2ba6   : > { %v2291_v1 = vld [vmem:[#allocation4 + $0x30] sm:$0xff] }
0x2ba8   : > { %2118 = vrot.lane.b32.xlu1 %v3958_v6, %s3459_s16 }
0x2c0e   : > { %v2276_v57 = vpop.permute.xlu1 %2275 }
0x2c0f   : > { %v2278_v58 = vmul.f32 %v3356_v46, %v2276_v57 }
0x2c11   : > { %2280 = vrot.lane.b32.xlu1 %v2278_v58, %s3459_s16  ;;  %s3391_s16 = scalar_lea.vmem %s4174_s28, 1024 }
0x2c12   : > { %v1795_v9 = vpop.permute.xlu1 %1794  ;;  %p3392_p13 = scmp.ne.s32.totalorder %s4174_s28, %s3391_s16  ;;  %p3399_p3 = scmp.lt.s32.totalorder %s3397_s3, %s3391_s16 }
0x2c13   : > { %1798 = vst.msk [vmem:[#allocation4 + $0x8] sm:$0xff] %vm726_vm0, %v1795_v9 }
0x2c14   : > { %p3393_p0 = pnand %p3392_p13, %p3572_p6  ;;  %p3400_p4 = por %p3399_p3, %p3398_p2 }
0x2c16   : > { %v1957_v59 = vpop.permute.xlu1 %1956  ;;  %p3394_p1 = pneg %p3393_p0 }
0x2c17   : > { %1960 = vst.msk [vmem:[#allocation4 + $0x18] sm:$0xff] %vm726_vm0, %v1957_v59 }
0x2c18   : > { %p3401_p5 = pnand %p3400_p4, %p3394_p1 }
0x2c1a   : > { %v2119_v29 = vpop.permute.xlu1 %2118  ;;  %v2286_v61 = vld [vmem:[#allocation4 + $0x8] sm:$0xff] }
0x2c1b   : > { %2122 = vst.msk [vmem:[#allocation4 + $0x28] sm:$0xff] %vm726_vm0, %v2119_v29  ;;  %v2293_v7 = vpack.c.bf16 %v2286_v61, %v2285_v60 }
0x2c1d   : > { %3152 = vmatprep.mubr.msk.bf16.mxu0 %vm726_vm0, %v2293_v7 }
0x2c1e   : > { %v2288_v30 = vld [vmem:[#allocation4 + $0x18] sm:$0xff] }
0x2c1f   : > { %v2294_v62 = vpack.c.bf16 %v2288_v30, %v2287_v32 }
0x2c21   : > { %3153 = vmatmul.mubr.msk.bf16.vlgmr.msra.gmra.mrb[36].mxu0 %vm726_vm0, %v2294_v62 }
0x2c22   : > { %v2290_v16 = vld [vmem:[#allocation4 + $0x28] sm:$0xff] }
0x2c23   : > { %v2295_v63 = vpack.c.bf16 %v2290_v16, %v2289_v48 }
0x2c25   : > { %3156 = vmatprep.mubr.msk.bf16.mxu0 %vm726_vm0, %v2295_v63 }
0x2c83   : > { %v2281_v0 = vpop.permute.xlu1 %2280 }
0x2c84   : > { %2284 = vst.msk [vmem:[#allocation4 + $0x38] sm:$0xff] %vm726_vm0, %v2281_v0 }
0x2c8b   : > { %v2292_v2 = vld [vmem:[#allocation4 + $0x38] sm:$0xff] }
0x2c8c   : > { %v2296_v6 = vpack.c.bf16 %v2292_v2, %v2291_v1 }
0x2c8e   : > { %3157 = vmatmul.mubr.msk.bf16.gmra.mrb[40].mxu0 %vm726_vm0, %v2296_v6 }
0x2cf4   : > { %v3154_v10 = vpop.f32.mrb[36].mxu0 }
0x2cf5   : > { %v2366_v3 = vpop.f32.mrb[37].mxu0  ;;  %v2375_v21 = vadd.f32 %v3154_v10, %v2917_v5 }
0x2cf6   : > { %v2367_v4 = vadd.f32 %v2917_v5, %v2366_v3  ;;  %v3155_v17 = vpop.f32.mrb[38].mxu0 }
0x2cf7   : > { %v2369_v18 = vpop.f32.mrb[39].mxu0  ;;  %v2378_v22 = vadd.f32 %v3155_v17, %v2917_v5 }
0x2cf8   : > { %v2370_v19 = vadd.f32 %v2917_v5, %v2369_v18  ;;  %2397 = vmax.xlane.f32.xlu0 %v2367_v4 }
0x2cfa   : > { %2399 = vmax.xlane.f32.xlu1 %v2370_v19 }
0x2cfc   : > { %2401 = vmax.xlane.f32.xlu0 %v2375_v21 }
0x2d00   : > { %2403 = vmax.xlane.f32.xlu0 %v2378_v22 }
0x2d61   : > { %v3158_v23 = vpop.f32.mrb[40].mxu0 }
0x2d62   : > { %v2382_v11 = vpop.f32.mrb[41].mxu0  ;;  %v4016_v13 = vadd.f32 %v3158_v23, %v2917_v5 }
0x2d63   : > { %v4011_v24 = vadd.f32 %v2917_v5, %v2382_v11  ;;  %v3159_v25 = vpop.f32.mrb[42].mxu0 }
0x2d64   : > { %v2385_v26 = vpop.f32.mrb[43].mxu0  ;;  %v4019_v33 = vadd.f32 %v3159_v25, %v2917_v5 }
0x2d65   : > { %v4013_v27 = vadd.f32 %v2917_v5, %v2385_v26  ;;  %2405 = vmax.xlane.f32.xlu1 %v4011_v24 }
0x2d67   : > { %2407 = vmax.xlane.f32.xlu0 %v4013_v27 }
0x2d69   : > { %2409 = vmax.xlane.f32.xlu1 %v4016_v13 }
0x2d6b   : > { %2411 = vmax.xlane.f32.xlu0 %v4019_v33 }
0x2d85   : > { %v2398_v39 = vpop.xlane.xlu0 %2397 }
0x2d86   : > { %vm2487_vm0 = vcmp.eq.f32.partialorder %v2367_v4, %v2398_v39  ;;  %v4047_v49 = vsub.f32 %v2367_v4, %v2398_v39 }
0x2d87   : > { %v4023_v40 = vsel %vm2487_vm0, %v2486_v37, 128  ;;  %v2400_v41 = vpop.xlane.xlu1 %2399  ;;  %vm2615_vm0 = vcmask 7168  }
0x2d88   : > { %vm2488_vm1 = vcmp.eq.f32.partialorder %v2370_v19, %v2400_v41  ;;  %v2504_v42 = vshra.s32 %v4023_v40, 16  ;;  %v4049_v15 = vsub.f32 %v2370_v19, %v2400_v41  ;;  %v2421_v51 = vmul.f32 1.442695, %v4047_v49 }
0x2d89   : > { %v4025_v28 = vsel %vm2488_vm1, %v2486_v37, 128  ;;  %v2402_v12 = vpop.xlane.xlu0 %2401  ;;  %v2503_v18 = vand.u32 65535, %v4023_v40 }
0x2d8a   : > { %vm2489_vm4 = vcmp.eq.f32.partialorder %v2375_v21, %v2402_v12  ;;  %v4028_v31 = vcvt.s32.f32 %v2504_v42  ;;  %v2518_v36 = vshra.s32 %v4025_v28, 16  ;;  %v4052_v52 = vsub.f32 %v2375_v21, %v2402_v12 }
0x2d8b   : > { %v4031_v43 = vsel %vm2489_vm4, %v2486_v37, 128  ;;  %v2423_v34 = vmul.f32 1.442695, %v4049_v15  ;;  %3359 = vpow2.f32 %v2421_v51  ;;  %v2517_v21 = vand.u32 65535, %v4025_v28 }
0x2d8c   : > { %2507 = vmin.xlane.f32.xlu1 %v4028_v31  ;;  %v4034_v44 = vcvt.s32.f32 %v2518_v36  ;;  %v2532_v38 = vshra.s32 %v4031_v43, 16  ;;  %v2425_v58 = vmul.f32 1.442695, %v4052_v52  ;;  %v2505_v11 = vcvt.s32.f32 %v2503_v18 }
0x2d8d   : > { %v2404_v8 = vpop.xlane.xlu0 %2403  ;;  %3361 = vpow2.f32 %v2423_v34  ;;  %v2519_v26 = vcvt.s32.f32 %v2517_v21  ;;  %v2531_v35 = vand.u32 65535, %v4031_v43 }
0x2d8e   : > { %vm2490_vm5 = vcmp.eq.f32.partialorder %v2378_v22, %v2404_v8  ;;  %2521 = vmin.xlane.f32.xlu0 %v4034_v44  ;;  %v4040_v45 = vcvt.s32.f32 %v2532_v38  ;;  %v4058_v50 = vsub.f32 %v2378_v22, %v2404_v8  ;;  %3363 = vpow2.f32 %v2425_v58 }
0x2d8f   : > { %v4037_v14 = vsel %vm2490_vm5, %v2486_v37, 128  ;;  %v2533_v12 = vcvt.s32.f32 %v2531_v35 }
0x2d90   : > { %v2546_v46 = vshra.s32 %v4037_v14, 16  ;;  %2535 = vmin.xlane.f32.xlu1 %v4040_v45  ;;  %v2427_v60 = vmul.f32 1.442695, %v4058_v50  ;;  %v2545_v40 = vand.u32 65535, %v4037_v14 }
0x2d92   : > { %v4044_v47 = vcvt.s32.f32 %v2546_v46  ;;  %3365 = vpow2.f32 %v2427_v60 }
0x2d94   : > { %2549 = vmin.xlane.f32.xlu0 %v4044_v47 }
0x2d95   : > { %v3360_v63 = vpop.eup %3359 }
0x2d97   : > { %v3362_v0 = vpop.eup %3361 }
0x2d98   : > { %v3364_v1 = vpop.eup %3363 }
0x2d9c   : > { %v3366_v2 = vpop.eup %3365 }
0x2df2   : > { %v2406_v56 = vpop.xlane.xlu1 %2405 }
0x2df3   : > { %vm2491_vm6 = vcmp.eq.f32.partialorder %v4011_v24, %v2406_v56  ;;  %v4094_v10 = vsub.f32 %v4011_v24, %v2406_v56 }
0x2df4   : > { %v4055_v53 = vsel %vm2491_vm6, %v2486_v37, 128  ;;  %v2408_v20 = vpop.xlane.xlu0 %2407 }
0x2df5   : > { %vm2492_vm7 = vcmp.eq.f32.partialorder %v4013_v27, %v2408_v20  ;;  %v2560_v57 = vshra.s32 %v4055_v53, 16  ;;  %v4098_v4 = vsub.f32 %v4013_v27, %v2408_v20  ;;  %v2429_v19 = vmul.f32 1.442695, %v4094_v10 }
0x2df6   : > { %v4061_v54 = vsel %vm2492_vm7, %v2486_v37, 128  ;;  %v2410_v55 = vpop.xlane.xlu1 %2409  ;;  %v2559_v43 = vand.u32 65535, %v4055_v53 }
0x2df7   : > { %vm2493_vm8 = vcmp.eq.f32.partialorder %v4016_v13, %v2410_v55  ;;  %v4066_v59 = vcvt.s32.f32 %v2560_v57  ;;  %v2574_v29 = vshra.s32 %v4061_v54, 16  ;;  %v4088_v6 = vsub.f32 %v4016_v13, %v2410_v55 }
0x2df8   : > { %v2412_v9 = vpop.xlane.xlu0 %2411  ;;  %v4070_v61 = vsel %vm2493_vm8, %v2486_v37, 128  ;;  %v2431_v22 = vmul.f32 1.442695, %v4098_v4  ;;  %v2573_v8 = vand.u32 65535, %v4061_v54  ;;  %v2561_v14 = vcvt.s32.f32 %v2559_v43 }
0x2df9   : > { %vm2494_vm9 = vcmp.eq.f32.partialorder %v4019_v33, %v2412_v9  ;;  %2563 = vmin.xlane.f32.xlu1 %v4066_v59  ;;  %v4074_v7 = vcvt.s32.f32 %v2574_v29  ;;  %v2588_v32 = vshra.s32 %v4070_v61, 16  ;;  %v4091_v5 = vsub.f32 %v4019_v33, %v2412_v9 }
0x2dfa   : > { %v4077_v30 = vsel %vm2494_vm9, %v2486_v37, 128  ;;  %v2433_v3 = vmul.f32 1.442695, %v4088_v6  ;;  %v2575_v56 = vcvt.s32.f32 %v2573_v8 }
0x2dfb   : > { %2577 = vmin.xlane.f32.xlu0 %v4074_v7  ;;  %v4080_v62 = vcvt.s32.f32 %v2588_v32  ;;  %v2602_v48 = vshra.s32 %v4077_v30, 16  ;;  %v2435_v17 = vmul.f32 1.442695, %v4091_v5 }
0x2dfc   : > { %3367 = vpow2.f32 %v2433_v3 }
0x2dfd   : > { %2591 = vmin.xlane.f32.xlu1 %v4080_v62  ;;  %v4084_v16 = vcvt.s32.f32 %v2602_v48  ;;  %3369 = vpow2.f32 %v2435_v17 }
0x2dfe   : > { %3371 = vpow2.f32 %v2429_v19 }
0x2dff   : > { %2605 = vmin.xlane.f32.xlu0 %v4084_v16  ;;  %3373 = vpow2.f32 %v2431_v22 }
0x2e01   : > { %2437 = vadd.xlane.f32.xlu1 %v3360_v63 }
0x2e03   : > { %2439 = vadd.xlane.f32.xlu0 %v3362_v0 }
0x2e05   : > { %2441 = vadd.xlane.f32.xlu1 %v3364_v1 }
0x2e06   : > { %v3368_v13 = vpop.eup %3367 }
0x2e07   : > { %2443 = vadd.xlane.f32.xlu0 %v3366_v2  ;;  %v3370_v33 = vpop.eup %3369 }
0x2e08   : > { %v3372_v39 = vpop.eup %3371 }
0x2e09   : > { %v3374_v28 = vpop.eup %3373 }
0x2e19   : > { %v4105_v23 = vpop.xlane.xlu1 %2507 }
0x2e1a   : > { %vm2509_vm10 = vcmp.eq.f32.partialorder %v4028_v31, %v4105_v23  ;;  %v2547_v31 = vcvt.s32.f32 %v2545_v40  ;;  %v2514_v2 = vcvt.f32.s32 %v4105_v23 }
0x2e1b   : > { %v4109_v24 = vpop.xlane.xlu0 %2521  ;;  %v2510_v25 = vsel %vm2509_vm10, %v2505_v11, inf }
0x2e1c   : > { %vm2523_vm11 = vcmp.eq.f32.partialorder %v4034_v44, %v4109_v24  ;;  %2511 = vmin.xlane.f32.xlu1 %v2510_v25  ;;  %v2587_v44 = vand.u32 65535, %v4070_v61  ;;  %v2528_v3 = vcvt.f32.s32 %v4109_v24  ;;  %v2515_v18 = vshll.u32 %v2514_v2, 16 }
0x2e1d   : > { %v2524_v27 = vsel %vm2523_vm11, %v2519_v26, inf  ;;  %v4114_v37 = vpop.xlane.xlu1 %2535 }
0x2e1e   : > { %2525 = vmin.xlane.f32.xlu0 %v2524_v27  ;;  %vm2537_vm12 = vcmp.eq.f32.partialorder %v4040_v45, %v4114_v37  ;;  %v2601_v45 = vand.u32 65535, %v4077_v30  ;;  %v2589_v20 = vcvt.s32.f32 %v2587_v44  ;;  %v2529_v21 = vshll.u32 %v2528_v3, 16 }
0x2e1f   : > { %v2538_v42 = vsel %vm2537_vm12, %v2533_v12, inf  ;;  %v2542_v24 = vcvt.f32.s32 %v4114_v37 }
0x2e20   : > { %2449 = vadd.xlane.f32.xlu1 %v3368_v13  ;;  %v2603_v55 = vcvt.s32.f32 %v2601_v45 }
0x2e21   : > { %v4117_v41 = vpop.xlane.xlu0 %2549 }
0x2e22   : > { %2451 = vadd.xlane.f32.xlu0 %v3370_v33  ;;  %vm2551_vm13 = vcmp.eq.f32.partialorder %v4044_v47, %v4117_v41  ;;  %v2556_v27 = vcvt.f32.s32 %v4117_v41  ;;  %v2543_v33 = vshll.u32 %v2542_v24, 16 }
0x2e23   : > { %v2552_v36 = vsel %vm2551_vm13, %v2547_v31, inf }
0x2e24   : > { %2445 = vadd.xlane.f32.xlu1 %v3372_v39 }
0x2e26   : > { %2447 = vadd.xlane.f32.xlu0 %v3374_v28  ;;  %v2557_v28 = vshll.u32 %v2556_v27, 16 }
0x2e28   : > { %2539 = vmin.xlane.f32.xlu1 %v2538_v42 }
0x2e2a   : > { %2553 = vmin.xlane.f32.xlu0 %v2552_v36 }
0x2e86   : > { %v4126_v38 = vpop.xlane.xlu1 %2563 }
0x2e87   : > { %vm2565_vm14 = vcmp.eq.f32.partialorder %v4066_v59, %v4126_v38 }
0x2e88   : > { %v4131_v46 = vpop.xlane.xlu0 %2577  ;;  %v2566_v47 = vsel %vm2565_vm14, %v2561_v14, inf }
0x2e89   : > { %vm2579_vm15 = vcmp.eq.f32.partialorder %v4074_v7, %v4131_v46  ;;  %2567 = vmin.xlane.f32.xlu1 %v2566_v47 }
0x2e8a   : > { %v4135_v51 = vpop.xlane.xlu1 %2591  ;;  %v2580_v53 = vsel %vm2579_vm15, %v2575_v56, inf }
0x2e8b   : > { %vm2593_vm2 = vcmp.eq.f32.partialorder %v4080_v62, %v4135_v51  ;;  %2581 = vmin.xlane.f32.xlu0 %v2580_v53 }
0x2e8c   : > { %v4139_v34 = vpop.xlane.xlu0 %2605  ;;  %v2594_v54 = vsel %vm2593_vm2, %v2589_v20, inf }
0x2e8d   : > { %vm2607_vm3 = vcmp.eq.f32.partialorder %v4084_v16, %v4139_v34  ;;  %2595 = vmin.xlane.f32.xlu1 %v2594_v54 }
0x2e8e   : > { %v2438_v57 = vpop.xlane.xlu1 %2437  ;;  %v2608_v58 = vsel %vm2607_vm3, %v2603_v55, inf }
0x2e8f   : > { %3375 = vlog2.f32 %v2438_v57  ;;  %2609 = vmin.xlane.f32.xlu0 %v2608_v58 }
0x2e90   : > { %v2440_v9 = vpop.xlane.xlu0 %2439 }
0x2e91   : > { %3377 = vlog2.f32 %v2440_v9 }
0x2e92   : > { %v2442_v59 = vpop.xlane.xlu1 %2441 }
0x2e93   : > { %3379 = vlog2.f32 %v2442_v59 }
0x2e94   : > { %v2444_v29 = vpop.xlane.xlu0 %2443 }
0x2e95   : > { %3381 = vlog2.f32 %v2444_v29 }
0x2e99   : > { %v3376_v60 = vpop.eup %3375 }
0x2e9a   : > { %v2454_v61 = vmul.f32 0.6931472, %v3376_v60 }
0x2e9b   : > { %v3378_v7 = vpop.eup %3377 }
0x2e9c   : > { %v2469_v32 = vsub.f32 %v4047_v49, %v2454_v61  ;;  %v2456_v30 = vmul.f32 0.6931472, %v3378_v7 }
0x2e9d   : > { %v3380_v62 = vpop.eup %3379 }
0x2e9e   : > { %2477 = vst [vmem:[%s4145_s0] sm:$0xff] %v2469_v32  ;;  %v2470_v48 = vsub.f32 %v4049_v15, %v2456_v30  ;;  %v2458_v16 = vmul.f32 0.6931472, %v3380_v62 }
0x2e9f   : > { %v3382_v63 = vpop.eup %3381 }
0x2ea0   : > { %2478 = vst [vmem:[%s4145_s0 + $0x8] sm:$0xff] %v2470_v48  ;;  %v2471_v0 = vsub.f32 %v4052_v52, %v2458_v16  ;;  %v2460_v1 = vmul.f32 0.6931472, %v3382_v63 }
0x2ea2   : > { %2479 = vst [vmem:[%s4145_s0 + $0x10] sm:$0xff] %v2471_v0  ;;  %v2472_v49 = vsub.f32 %v4058_v50, %v2460_v1 }
0x2ea4   : > { %2480 = vst [vmem:[%s4145_s0 + $0x18] sm:$0xff] %v2472_v49 }
0x2ea9   : > { %v2512_v17 = vpop.xlane.xlu1 %2511 }
0x2eaa   : > { %v2513_v19 = vcvt.f32.s32 %v2512_v17 }
0x2eab   : > { %v2526_v15 = vpop.xlane.xlu0 %2525 }
0x2eac   : > { %v2516_v22 = vadd.s32 %v2515_v18, %v2513_v19  ;;  %v2527_v11 = vcvt.f32.s32 %v2526_v15 }
0x2ead   : > { %v2450_v25 = vpop.xlane.xlu1 %2449 }
0x2eae   : > { %2616 = vst.msk [vmem:[%s4157_s17] sm:$0xff] %vm2615_vm0, %v2516_v22  ;;  %v2530_v52 = vadd.s32 %v2529_v21, %v2527_v11  ;;  %3383 = vlog2.f32 %v2450_v25 }
0x2eaf   : > { %v2452_v50 = vpop.xlane.xlu0 %2451 }
0x2eb0   : > { %2617 = vst.msk [vmem:[%s4157_s17 + $0x8] sm:$0xff] %vm2615_vm0, %v2530_v52  ;;  %3385 = vlog2.f32 %v2452_v50 }
0x2eb1   : > { %v2446_v23 = vpop.xlane.xlu1 %2445 }
0x2eb2   : > { %3387 = vlog2.f32 %v2446_v23 }
0x2eb3   : > { %v2448_v26 = vpop.xlane.xlu0 %2447 }
0x2eb4   : > { %3389 = vlog2.f32 %v2448_v26 }
0x2eb5   : > { %v2540_v13 = vpop.xlane.xlu1 %2539 }
0x2eb6   : > { %v2541_v35 = vcvt.f32.s32 %v2540_v13 }
0x2eb7   : > { %v2554_v39 = vpop.xlane.xlu0 %2553 }
0x2eb8   : > { %v3384_v40 = vpop.eup %3383  ;;  %v2544_v12 = vadd.s32 %v2543_v33, %v2541_v35  ;;  %v2555_v42 = vcvt.f32.s32 %v2554_v39 }
0x2eb9   : > { %v2466_v31 = vmul.f32 0.6931472, %v3384_v40 }
0x2eba   : > { %v3386_v37 = vpop.eup %3385  ;;  %2618 = vst.msk [vmem:[%s4157_s17 + $0x10] sm:$0xff] %vm2615_vm0, %v2544_v12  ;;  %v2558_v36 = vadd.s32 %v2557_v28, %v2555_v42 }
0x2ebb   : > { %v2475_v41 = vsub.f32 %v4088_v6, %v2466_v31  ;;  %v2468_v43 = vmul.f32 0.6931472, %v3386_v37 }
0x2ebc   : > { %v3388_v8 = vpop.eup %3387  ;;  %2619 = vst.msk [vmem:[%s4157_s17 + $0x18] sm:$0xff] %vm2615_vm0, %v2558_v36 }
0x2ebd   : > { %2483 = vst [vmem:[%s4145_s0 + $0x30] sm:$0xff] %v2475_v41  ;;  %v2476_v44 = vsub.f32 %v4091_v5, %v2468_v43  ;;  %v2462_v14 = vmul.f32 0.6931472, %v3388_v8 }
0x2ebe   : > { %v3390_v45 = vpop.eup %3389 }
0x2ebf   : > { %2484 = vst [vmem:[%s4145_s0 + $0x38] sm:$0xff] %v2476_v44  ;;  %v2473_v6 = vsub.f32 %v4094_v10, %v2462_v14  ;;  %v2464_v47 = vmul.f32 0.6931472, %v3390_v45 }
0x2ec1   : > { %2481 = vst [vmem:[%s4145_s0 + $0x20] sm:$0xff] %v2473_v6  ;;  %v2474_v5 = vsub.f32 %v4098_v4, %v2464_v47 }
0x2ec3   : > { %2482 = vst [vmem:[%s4145_s0 + $0x28] sm:$0xff] %v2474_v5 }
0x2ec4   : > { %3404 = shalt.err (!%p3401_p5)
}
0x2ec5   : > { %s3405_s0 = scalar_lea.hbm %s4181_s13, 1024  ;;  %s3409_s1 = scalar_lea.hbm %s4265_s11, 2048 }
0x2ec6   : > { %p3406_p7 = scmp.ne.s32.totalorder %s4181_s13, %s3405_s0  ;;  %p3410_p12 = scmp.lt.u32.totalorder %s4181_s13, %s4265_s11 }
0x2ec7   : > { %p3411_p13 = scmp.lt.u32.totalorder %s3409_s1, %s3405_s0  ;;  %p3413_p1 = scmp.lt.u32.totalorder %s3405_s0, %s4181_s13 }
0x2ec8   : > { %p3407_p10 = pnand %p3406_p7, %p3572_p6 }
0x2ec9   : > { %p3412_p0 = por %p3411_p13, %p3410_p12 }
0x2eca   : > { %p3408_p11 = pneg %p3407_p10 }
0x2ecb   : > { %p3414_p2 = por %p3413_p1, %p3412_p0 }
0x2ecd   : > { %p3415_p3 = pnand %p3414_p2, %p3408_p11 }
0x2ecf   : > { %3418 = shalt.err (!%p3415_p3)
}
0x2ed0   : > { %s3461_s3 = smov 128   ;;  %s3462_s16 = smov 256   ;;  %v2570_v10 = vcvt.f32.s32 %v4126_v38  ;;  %v2584_v4 = vcvt.f32.s32 %v4131_v46  ;;  %v2598_v20 = vcvt.f32.s32 %v4135_v51  ;;  %v2612_v58 = vcvt.f32.s32 %v4139_v34  ;;  %v2694_v34 = vld [vmem:[%s4157_s17] sm:$0xff] (%p3572_p6)  ;;  %v2696_v62 = vld [vmem:[%s4157_s17 + $0x8] sm:$0xff] (%p3572_p6)  ;;  %v2698_v48 = vld [vmem:[%s4157_s17 + $0x10] sm:$0xff] (%p3572_p6) }
0x2ed1   : > { %s3463_s18 = smov 8   ;;  %s4278_s20 = scalar_lea.sflag [#allocation9], %s3610_s26  ;;  %v2700_v16 = vld [vmem:[%s4157_s17 + $0x18] sm:$0xff] (%p3572_p6) }
0x2ed2   : > { %3164 = dma.vmem_to_hbm [thread:$0]  (%p3572_p6), %s4174_s28, 1024, %s4181_s13, %s4278_s20, %s3461_s3, %s3462_s16, %s3463_s18   ;;  %v2571_v53 = vshll.u32 %v2570_v10, 16  ;;  %v2585_v57 = vshll.u32 %v2584_v4, 16  ;;  %v2599_v60 = vshll.u32 %v2598_v20, 16  ;;  %v2613_v7 = vshll.u32 %v2612_v58, 16 }
0x2ed3   : > { %s2927_s26 = sshll.u32 (%p3572_p6), %s3550_s25, 3 }
0x2ed4   : > { %s2652_s18 = scalar_lea.vmem (%p3572_p6), %s4266_s12, %s2927_s26 }
0x2ed5   : > { %2695 = vst [vmem:[%s2652_s18] sm:$0xff] (%p3572_p6), %v2694_v34  ;;  %2697 = vst [vmem:[%s2652_s18 + $0x10] sm:$0xff] (%p3572_p6), %v2696_v62 }
0x2ed6   : > { %2699 = vst [vmem:[%s2652_s18 + $0x20] sm:$0xff] (%p3572_p6), %v2698_v48  ;;  %2701 = vst [vmem:[%s2652_s18 + $0x30] sm:$0xff] (%p3572_p6), %v2700_v16 }
0x2f16   : > { %v2568_v56 = vpop.xlane.xlu1 %2567 }
0x2f17   : > { %v2569_v54 = vcvt.f32.s32 %v2568_v56 }
0x2f18   : > { %v2582_v55 = vpop.xlane.xlu0 %2581 }
0x2f19   : > { %v2572_v9 = vadd.s32 %v2571_v53, %v2569_v54  ;;  %v2583_v59 = vcvt.f32.s32 %v2582_v55 }
0x2f1a   : > { %v2596_v29 = vpop.xlane.xlu1 %2595 }
0x2f1b   : > { %2620 = vst.msk [vmem:[%s4157_s17 + $0x20] sm:$0xff] %vm2615_vm0, %v2572_v9  ;;  %v2586_v38 = vadd.s32 %v2585_v57, %v2583_v59  ;;  %v2597_v46 = vcvt.f32.s32 %v2596_v29  ;;  %2650 = sbr.rel (!%p3572_p6) target bundleno = 12074 (0x2f2a), region = 192 }
0x2f1c   : > { %v2610_v61 = vpop.xlane.xlu0 %2609 }
0x2f1d   : > { %2621 = vst.msk [vmem:[%s4157_s17 + $0x28] sm:$0xff] %vm2615_vm0, %v2586_v38  ;;  %v2600_v51 = vadd.s32 %v2599_v60, %v2597_v46  ;;  %v2611_v32 = vcvt.f32.s32 %v2610_v61 }
0x2f1f   : > { %2622 = vst.msk [vmem:[%s4157_s17 + $0x30] sm:$0xff] %vm2615_vm0, %v2600_v51  ;;  %v2614_v30 = vadd.s32 %v2613_v7, %v2611_v32 }
0x2f21   : > { %2623 = vst.msk [vmem:[%s4157_s17 + $0x38] sm:$0xff] %vm2615_vm0, %v2614_v30 }
0x2f22   : > { %v2702_v63 = vld [vmem:[%s4157_s17 + $0x20] sm:$0xff] }
0x2f23   : > { %2703 = vst [vmem:[%s2652_s18 + $0x40] sm:$0xff] %v2702_v63 }
0x2f24   : > { %v2704_v0 = vld [vmem:[%s4157_s17 + $0x28] sm:$0xff] }
0x2f25   : > { %2705 = vst [vmem:[%s2652_s18 + $0x50] sm:$0xff] %v2704_v0 }
0x2f26   : > { %v2706_v1 = vld [vmem:[%s4157_s17 + $0x30] sm:$0xff] }
0x2f27   : > { %2707 = vst [vmem:[%s2652_s18 + $0x60] sm:$0xff] %v2706_v1 }
0x2f28   : > { %v2708_v49 = vld [vmem:[%s4157_s17 + $0x38] sm:$0xff] }
0x2f29   : > { %2709 = vst [vmem:[%s2652_s18 + $0x70] sm:$0xff] %v2708_v49 }
0x2f2a PF: > { %s2721_s25 = sand.u32 1, %s3441_s21   ;;  %p3167_p6 = pnand %p2840_p9, %p3576_p8 }
0x2f2b   : > { %s2722_s14 = scalar_lea.sflag [#allocation9], %s2721_s25 }
0x2f2c   : > { %3436 = dma.done.wait (!%p3167_p6), %s2722_s14, 1024  }
0x2f2d   : > { %3438 = vsyncadd (!%p3167_p6), %s2722_s14, 4294966272  ;;  %p23_p4 = scmp.ge.s32.totalorder %s3554_s27, 4   ;;  %s4279_s21 = smov %s3445_s22 }
0x2f2e   : > { %s4280_s22 = smov %s3449_s23  ;;  %s4281_s23 = smov %s3566_s30 }
0x2f2f   : > { %s4282_s24 = smov %s3554_s27  ;;  %25 = sbr.rel (!%p23_p4) target bundleno = 8 (0x8), region = 318 }
0x2f36   :  { %2734 = vsyncpa [#allocation9], 1 }
0x2f37   :  { %2736 = vsyncpa [#allocation9 + $0x1], 1 }

</bundles_post_ra>
